<compile_context>
chip_gen: v7x
topology: tpu7x:2x2x1
jax: 0.10.0
libtpu: 0.0.40
codegen_flags: <defaults>
</compile_context>

<pallas_src>
import functools
import math

import jax
import jax.numpy as jnp
from jax import lax
from jax.experimental import pallas as pl
from jax.experimental.pallas import tpu as pltpu

PATCH = 16            # patch_size (small synthetic config)
ENC_DIM = 32          # encoder hidden_sizes[-1] stand-in
DEC_DIM = 128         # decoder_embed_dim stand-in (multiple of 128 -> lane dense)
KDIM = PATCH * PATCH * 3
MASK_RATIO = 0.6
LN_EPS = 1e-5         # torch.nn.LayerNorm default eps


# ------------------------------ Pallas kernels ------------------------------

def _erf(x):
    # Abramowitz & Stegun 7.1.26 rational approximation (|err| < 1.5e-7 ~ f32 eps),
    # so the exact-GELU path lowers with only exp/mul/add (no lax.erf dependency).
    a1, a2, a3, a4, a5 = (0.254829592, -0.284496736, 1.421413741,
                          -1.453152027, 1.061405429)
    p = 0.3275911
    sgn = jnp.where(x >= 0.0, 1.0, -1.0)
    ax = jnp.abs(x)
    t = 1.0 / (1.0 + p * ax)
    poly = ((((a5 * t + a4) * t + a3) * t + a2) * t + a1) * t
    return sgn * (1.0 - poly * jnp.exp(-ax * ax))


def _gelu_exact(x):
    # matches torch.nn.GELU() (erf form)
    return 0.5 * x * (1.0 + _erf(x * (1.0 / math.sqrt(2.0))))


def _decoder_kernel(patches_ref, mask_ref, fw_ref, fb_ref, mtok_ref,
                    dww_ref, dwb_ref, lng_ref, lnb_ref,
                    pw1w_ref, pw1b_ref, pw2w_ref, pw2b_ref,
                    predw_ref, predb_ref, out_ref, xp_ref, *, h, w):
    nb, hw, kdim = patches_ref.shape
    d = fw_ref.shape[1]
    pdim = predw_ref.shape[1]
    m_tok = nb * hw

    # ---- fused patch-embed stem + proj 1x1 conv: one bf16 matmul, f32 accumulate ----
    pt = patches_ref[...].reshape(m_tok, kdim)                         # bf16
    x = jnp.dot(pt, fw_ref[...],
                preferred_element_type=jnp.float32) + fb_ref[...]      # (M, d) f32

    # ---- mask-token mixing: x*(1-m) + mask_token*m ----
    m = mask_ref[...].reshape(m_tok, 1)                                # f32 0/1
    x = x * (1.0 - m) + mtok_ref[...] * m
    resid = x

    # ---- ConvNeXt block: depthwise 7x7 conv (padding=3) via halo-padded scratch ----
    # only the 3-wide halo bands are zeroed each step; interior is overwritten.
    x_sp = x.reshape(nb, h, w, d)
    zrow = jnp.zeros((nb, 3, w + 6, d), jnp.float32)
    zcol = jnp.zeros((nb, h + 6, 3, d), jnp.float32)
    xp_ref[:, 0:3, :, :] = zrow
    xp_ref[:, h + 3:h + 6, :, :] = zrow
    xp_ref[:, :, 0:3, :] = zcol
    xp_ref[:, :, w + 3:w + 6, :] = zcol
    xp_ref[:, 3:3 + h, 3:3 + w, :] = x_sp

    dww = dww_ref[...]                                                 # (7, 7, d) f32
    acc = jnp.zeros((nb, h, w, d), jnp.float32)
    for kh in range(7):
        for kw in range(7):
            acc = acc + xp_ref[:, kh:kh + h, kw:kw + w, :] * dww[kh, kw]
    xc = acc.reshape(m_tok, d) + dwb_ref[...]

    # ---- LayerNorm over channels (channels-last), rsqrt on the EUP ----
    mu = jnp.mean(xc, axis=-1, keepdims=True)
    var = jnp.mean((xc - mu) ** 2, axis=-1, keepdims=True)
    xn = (xc - mu) * lax.rsqrt(var + LN_EPS)
    xn = xn * lng_ref[...] + lnb_ref[...]

    # ---- MLP: pwconv1 -> GELU -> pwconv2, then residual (bf16 MXU operands) ----
    y = jnp.dot(xn.astype(jnp.bfloat16), pw1w_ref[...],
                preferred_element_type=jnp.float32) + pw1b_ref[...]
    y = _gelu_exact(y)
    y = jnp.dot(y.astype(jnp.bfloat16), pw2w_ref[...],
                preferred_element_type=jnp.float32) + pw2b_ref[...]
    xo = resid + y

    # ---- pred head: 1x1 conv, token-major lane-dense output ----
    out = jnp.dot(xo.astype(jnp.bfloat16), predw_ref[...],
                  preferred_element_type=jnp.float32) + predb_ref[...]
    out_ref[...] = out.reshape(nb, hw, pdim).astype(out_ref.dtype)


def _loss_kernel(pred_ref, tgt_ref, mask_ref, se_ref, cnt_ref):
    # tiled masked-MSE reduction; (1,1) outputs act as resident accumulators (P3).
    @pl.when(pl.program_id(0) == 0)
    def _():
        se_ref[...] = jnp.zeros_like(se_ref)
        cnt_ref[...] = jnp.zeros_like(cnt_ref)

    diff = pred_ref[...] - tgt_ref[...]
    per_patch = jnp.mean(diff * diff, axis=-1, keepdims=True)          # (1, L, 1)
    m = mask_ref[...]                                                  # (1, L, 1)
    se_ref[...] = se_ref[...] + jnp.sum(per_patch * m).reshape(1, 1)
    cnt_ref[...] = cnt_ref[...] + jnp.sum(m).reshape(1, 1)


# --------------------------------- wrappers ---------------------------------

def _full_spec(shape):
    zeros = (0,) * len(shape)
    return pl.BlockSpec(shape, lambda b, _z=zeros: _z)


def patchify(imgs, p):
    n, _, hh, ww = imgs.shape
    h, w = hh // p, ww // p
    x = imgs.reshape(n, 3, h, p, w, p)
    x = jnp.einsum('nchpwq->nhwpqc', x)
    return x.reshape(n, h * w, p * p * 3)


def generate_mask(key, n, l, mask_ratio):
    # same semantics as torch version (0=keep, 1=remove), different RNG stream
    len_keep = int(l * (1 - mask_ratio))
    noise = jax.random.uniform(key, (n, l))
    ids_shuffle = jnp.argsort(noise, axis=1)
    ids_restore = jnp.argsort(ids_shuffle, axis=1)
    mask = jnp.ones((n, l), jnp.bfloat16).at[:, :len_keep].set(0)
    return jnp.take_along_axis(mask, ids_restore, axis=1)


def _pick_nb(n, hw, target_tokens=128):
    # batch enough images per grid step that the matmul M dim approaches >=128 tokens
    nb = max(1, min(n, -(-target_tokens // hw)))
    while n % nb:
        nb -= 1
    return nb


def forward_decoder(params, patches_bf16, mask_f, h, w):
    n, hw, kdim = patches_bf16.shape
    d = DEC_DIM
    pdim = KDIM
    nb = _pick_nb(n, hw)
    grid = (n // nb,)

    # TODO(synk): ConvNextV2Classifier backbone is an external HF module not defined in
    # the reference file; replaced by a linear patch-embed stem, fused here with the
    # decoder `proj` 1x1 conv: W_fused = W_stem @ W_proj, b_fused = b_stem@W_proj + b_proj.
    fw = params['stem_w'] @ params['proj_w']                           # (K, d)
    fb = params['stem_b'] @ params['proj_w'] + params['proj_b']        # (1, d)

    weights = [fw.astype(jnp.bfloat16), fb,
               params['mask_token'], params['dw_w'], params['dw_b'],
               params['ln_g'], params['ln_b'],
               params['pw1_w'].astype(jnp.bfloat16), params['pw1_b'],
               params['pw2_w'].astype(jnp.bfloat16), params['pw2_b'],
               params['pred_w'].astype(jnp.bfloat16), params['pred_b']]

    in_specs = [pl.BlockSpec((nb, hw, kdim), lambda b: (b, 0, 0)),
                pl.BlockSpec((nb, hw, 1), lambda b: (b, 0, 0))]
    in_specs += [_full_spec(wt.shape) for wt in weights]

    kernel = functools.partial(_decoder_kernel, h=h, w=w)
    pred_tok = pl.pallas_call(
        kernel,
        grid=grid,
        in_specs=in_specs,
        out_specs=pl.BlockSpec((nb, hw, pdim), lambda b: (b, 0, 0)),
        out_shape=jax.ShapeDtypeStruct((n, hw, pdim), jnp.float32),
        scratch_shapes=[pltpu.VMEM((nb, h + 6, w + 6, d), jnp.float32)],
        compiler_params=pltpu.CompilerParams(
            dimension_semantics=("parallel",),
            # explicit budget derived with v7x's 64 MiB physical VMEM in mind
            vmem_limit_bytes=32 * 1024 * 1024),
    )(patches_bf16, mask_f, *weights)
    return pred_tok                                                    # (N, h*w, p*p*3)


def forward_loss(pred_tok, target, mask_f):
    n, l, pdim = pred_tok.shape
    se, cnt = pl.pallas_call(
        _loss_kernel,
        grid=(n,),
        in_specs=[pl.BlockSpec((1, l, pdim), lambda b: (b, 0, 0)),
                  pl.BlockSpec((1, l, pdim), lambda b: (b, 0, 0)),
                  pl.BlockSpec((1, l, 1), lambda b: (b, 0, 0))],
        out_specs=(pl.BlockSpec((1, 1), lambda b: (0, 0)),
                   pl.BlockSpec((1, 1), lambda b: (0, 0))),
        out_shape=(jax.ShapeDtypeStruct((1, 1), jnp.float32),
                   jax.ShapeDtypeStruct((1, 1), jnp.float32)),
        compiler_params=pltpu.CompilerParams(
            dimension_semantics=("arbitrary",)),
    )(pred_tok, target, mask_f)
    return se[0, 0] / cnt[0, 0]


def fcmae_forward(params, imgs, mask_key, mask_ratio=MASK_RATIO):
    n = imgs.shape[0]
    hp = imgs.shape[2] // PATCH
    l = hp * hp

    mask = generate_mask(mask_key, n, l, mask_ratio)                   # (N, L) bf16
    mask_f = mask.astype(jnp.float32).reshape(n, l, 1)

    patches = patchify(imgs, PATCH)                                    # (N, L, p*p*3) f32
    pred_tok = forward_decoder(params, patches.astype(jnp.bfloat16), mask_f, hp, hp)

    loss = forward_loss(pred_tok, patches, mask_f)                     # norm_pix_loss=False

    # torch returns pred as (N, p*p*3, h, w)
    pred_nchw = jnp.transpose(pred_tok.reshape(n, hp, hp, KDIM), (0, 3, 1, 2))
    return loss, pred_nchw, mask


def init_params(key):
    k = KDIM
    d = DEC_DIM
    ks = jax.random.split(key, 8)
    return {
        'stem_w': jax.random.normal(ks[0], (k, ENC_DIM), jnp.float32) * 0.02,
        'stem_b': jnp.zeros((1, ENC_DIM), jnp.float32),
        'proj_w': jax.random.normal(ks[1], (ENC_DIM, d), jnp.float32) * 0.02,
        'proj_b': jnp.zeros((1, d), jnp.float32),
        'mask_token': jax.random.normal(ks[2], (1, d), jnp.float32) * 0.02,
        'dw_w': jax.random.normal(ks[3], (7, 7, d), jnp.float32) * 0.02,
        'dw_b': jnp.zeros((1, d), jnp.float32),
        'ln_g': jnp.ones((1, d), jnp.float32),
        'ln_b': jnp.zeros((1, d), jnp.float32),
        'pw1_w': jax.random.normal(ks[4], (d, 4 * d), jnp.float32) * 0.02,
        'pw1_b': jnp.zeros((1, 4 * d), jnp.float32),
        'pw2_w': jax.random.normal(ks[5], (4 * d, d), jnp.float32) * 0.02,
        'pw2_b': jnp.zeros((1, d), jnp.float32),
        'pred_w': jax.random.normal(ks[6], (d, k), jnp.float32) * 0.02,
        'pred_b': jnp.zeros((1, k), jnp.float32),
    }


if __name__ == "__main__":
    root = jax.random.PRNGKey(0)
    k_param, k_img, k_mask = jax.random.split(root, 3)
    params = init_params(k_param)
    imgs = jax.random.normal(k_img, (2, 3, 64, 64), jnp.float32)       # (N, 3, H, W)

    loss, pred, mask = fcmae_forward(params, imgs, k_mask)
    jax.block_until_ready((loss, pred, mask))

    assert pred.shape == (2, PATCH * PATCH * 3, 4, 4)
    assert mask.shape == (2, 16) and mask.dtype == jnp.bfloat16
    assert loss.shape == () and jnp.isfinite(loss)
    print("KERNEL_OK")
</pallas_src>

<mosaic_0001>
module attributes {stable_mosaic.version = 11 : i64} {
  func.func @_decoder_kernel(%arg0: i32, %arg1: memref<2x16x768xbf16, #tpu.memory_space<vmem>>, %arg2: memref<2x16x1xf32, #tpu.memory_space<vmem>>, %arg3: memref<768x128xbf16, #tpu.memory_space<vmem>>, %arg4: memref<1x128xf32, #tpu.memory_space<vmem>>, %arg5: memref<1x128xf32, #tpu.memory_space<vmem>>, %arg6: memref<7x7x128xf32, #tpu.memory_space<vmem>>, %arg7: memref<1x128xf32, #tpu.memory_space<vmem>>, %arg8: memref<1x128xf32, #tpu.memory_space<vmem>>, %arg9: memref<1x128xf32, #tpu.memory_space<vmem>>, %arg10: memref<128x512xbf16, #tpu.memory_space<vmem>>, %arg11: memref<1x512xf32, #tpu.memory_space<vmem>>, %arg12: memref<512x128xbf16, #tpu.memory_space<vmem>>, %arg13: memref<1x128xf32, #tpu.memory_space<vmem>>, %arg14: memref<128x768xbf16, #tpu.memory_space<vmem>>, %arg15: memref<1x768xf32, #tpu.memory_space<vmem>>, %arg16: memref<2x16x768xf32, #tpu.memory_space<vmem>>, %arg17: memref<2x10x10x128xf32, #tpu.memory_space<vmem>>) attributes {dimension_semantics = [#tpu.dimension_semantics<parallel>], iteration_bounds = array<i64: 1>, scalar_prefetch = 0 : i64, scratch_operands = 1 : i64, tpu.core_type = #tpu.core_type<tc>, window_params = [{transform_indices = @transform_0, window_bounds = array<i64: 2, 16, 768>}, {transform_indices = @transform_1, window_bounds = array<i64: 2, 16, 1>}, {pipeline_mode = #tpu.pipeline_mode<synchronous>, transform_indices = @transform_2, window_bounds = array<i64: 768, 128>}, {pipeline_mode = #tpu.pipeline_mode<synchronous>, transform_indices = @transform_3, window_bounds = array<i64: 1, 128>}, {pipeline_mode = #tpu.pipeline_mode<synchronous>, transform_indices = @transform_4, window_bounds = array<i64: 1, 128>}, {pipeline_mode = #tpu.pipeline_mode<synchronous>, transform_indices = @transform_5, window_bounds = array<i64: 7, 7, 128>}, {pipeline_mode = #tpu.pipeline_mode<synchronous>, transform_indices = @transform_6, window_bounds = array<i64: 1, 128>}, {pipeline_mode = #tpu.pipeline_mode<synchronous>, transform_indices = @transform_7, window_bounds = array<i64: 1, 128>}, {pipeline_mode = #tpu.pipeline_mode<synchronous>, transform_indices = @transform_8, window_bounds = array<i64: 1, 128>}, {pipeline_mode = #tpu.pipeline_mode<synchronous>, transform_indices = @transform_9, window_bounds = array<i64: 128, 512>}, {pipeline_mode = #tpu.pipeline_mode<synchronous>, transform_indices = @transform_10, window_bounds = array<i64: 1, 512>}, {pipeline_mode = #tpu.pipeline_mode<synchronous>, transform_indices = @transform_11, window_bounds = array<i64: 512, 128>}, {pipeline_mode = #tpu.pipeline_mode<synchronous>, transform_indices = @transform_12, window_bounds = array<i64: 1, 128>}, {pipeline_mode = #tpu.pipeline_mode<synchronous>, transform_indices = @transform_13, window_bounds = array<i64: 128, 768>}, {pipeline_mode = #tpu.pipeline_mode<synchronous>, transform_indices = @transform_14, window_bounds = array<i64: 1, 768>}, {transform_indices = @transform_15, window_bounds = array<i64: 2, 16, 768>}]} {
    %c0 = arith.constant 0 : index
    %c0_0 = arith.constant 0 : index
    %c0_1 = arith.constant 0 : index
    %0 = vector.load %arg1[%c0, %c0_0, %c0_1] : memref<2x16x768xbf16, #tpu.memory_space<vmem>>, vector<2x16x768xbf16>
    %1 = vector.shape_cast %0 : vector<2x16x768xbf16> to vector<32x768xbf16>
    %c0_2 = arith.constant 0 : index
    %c0_3 = arith.constant 0 : index
    %2 = vector.load %arg3[%c0_2, %c0_3] : memref<768x128xbf16, #tpu.memory_space<vmem>>, vector<768x128xbf16>
    %cst = arith.constant dense<0.000000e+00> : vector<32x128xf32>
    %3 = tpu.matmul %1, %2, %cst {dimension_numbers = #tpu.dot_dimension_numbers<[1], [0], [0], [1], [0, 0, 1, 1], [], []>} : vector<32x768xbf16>, vector<768x128xbf16>, vector<32x128xf32> -> vector<32x128xf32>
    %c0_4 = arith.constant 0 : index
    %c0_5 = arith.constant 0 : index
    %4 = vector.load %arg4[%c0_4, %c0_5] : memref<1x128xf32, #tpu.memory_space<vmem>>, vector<1x128xf32>
    %5 = vector.broadcast %4 : vector<1x128xf32> to vector<32x128xf32>
    %6 = arith.addf %3, %5 : vector<32x128xf32>
    %c0_6 = arith.constant 0 : index
    %c0_7 = arith.constant 0 : index
    %c0_8 = arith.constant 0 : index
    %7 = vector.load %arg2[%c0_6, %c0_7, %c0_8] : memref<2x16x1xf32, #tpu.memory_space<vmem>>, vector<2x16x1xf32>
    %8 = vector.shape_cast %7 : vector<2x16x1xf32> to vector<32x1xf32>
    %cst_9 = arith.constant 1.000000e+00 : f32
    %9 = vector.broadcast %cst_9 : f32 to vector<32x1xf32>
    %10 = arith.subf %9, %8 : vector<32x1xf32>
    %11 = vector.broadcast %10 : vector<32x1xf32> to vector<32x128xf32>
    %12 = arith.mulf %6, %11 : vector<32x128xf32>
    %c0_10 = arith.constant 0 : index
    %c0_11 = arith.constant 0 : index
    %13 = vector.load %arg5[%c0_10, %c0_11] : memref<1x128xf32, #tpu.memory_space<vmem>>, vector<1x128xf32>
    %14 = vector.broadcast %13 : vector<1x128xf32> to vector<32x128xf32>
    %15 = vector.broadcast %8 : vector<32x1xf32> to vector<32x128xf32>
    %16 = arith.mulf %14, %15 : vector<32x128xf32>
    %17 = arith.addf %12, %16 : vector<32x128xf32>
    %18 = vector.shape_cast %17 : vector<32x128xf32> to vector<2x4x4x128xf32>
    %cst_12 = arith.constant 0.000000e+00 : f32
    %19 = vector.broadcast %cst_12 : f32 to vector<2x3x10x128xf32>
    %cst_13 = arith.constant 0.000000e+00 : f32
    %20 = vector.broadcast %cst_13 : f32 to vector<2x10x3x128xf32>
    %c0_14 = arith.constant 0 : index
    %c0_15 = arith.constant 0 : index
    %c0_16 = arith.constant 0 : index
    %c0_17 = arith.constant 0 : index
    %21 = vector.load %arg17[%c0_14, %c0_15, %c0_16, %c0_17] : memref<2x10x10x128xf32, #tpu.memory_space<vmem>>, vector<2x3x10x128xf32>
    tpu.vector_store %arg17[%c0_14, %c0_15, %c0_16, %c0_17], %19 {strides = array<i32>} : memref<2x10x10x128xf32, #tpu.memory_space<vmem>>, vector<2x3x10x128xf32>,
    %c0_18 = arith.constant 0 : index
    %c7 = arith.constant 7 : index
    %c0_19 = arith.constant 0 : index
    %c0_20 = arith.constant 0 : index
    %22 = vector.load %arg17[%c0_18, %c7, %c0_19, %c0_20] : memref<2x10x10x128xf32, #tpu.memory_space<vmem>>, vector<2x3x10x128xf32>
    tpu.vector_store %arg17[%c0_18, %c7, %c0_19, %c0_20], %19 {strides = array<i32>} : memref<2x10x10x128xf32, #tpu.memory_space<vmem>>, vector<2x3x10x128xf32>,
    %c0_21 = arith.constant 0 : index
    %c0_22 = arith.constant 0 : index
    %c0_23 = arith.constant 0 : index
    %c0_24 = arith.constant 0 : index
    %23 = vector.load %arg17[%c0_21, %c0_22, %c0_23, %c0_24] : memref<2x10x10x128xf32, #tpu.memory_space<vmem>>, vector<2x10x3x128xf32>
    tpu.vector_store %arg17[%c0_21, %c0_22, %c0_23, %c0_24], %20 {strides = array<i32>} : memref<2x10x10x128xf32, #tpu.memory_space<vmem>>, vector<2x10x3x128xf32>,
    %c0_25 = arith.constant 0 : index
    %c0_26 = arith.constant 0 : index
    %c7_27 = arith.constant 7 : index
    %c0_28 = arith.constant 0 : index
    %24 = vector.load %arg17[%c0_25, %c0_26, %c7_27, %c0_28] : memref<2x10x10x128xf32, #tpu.memory_space<vmem>>, vector<2x10x3x128xf32>
    tpu.vector_store %arg17[%c0_25, %c0_26, %c7_27, %c0_28], %20 {strides = array<i32>} : memref<2x10x10x128xf32, #tpu.memory_space<vmem>>, vector<2x10x3x128xf32>,
    %c0_29 = arith.constant 0 : index
    %c3 = arith.constant 3 : index
    %c3_30 = arith.constant 3 : index
    %c0_31 = arith.constant 0 : index
    %25 = vector.load %arg17[%c0_29, %c3, %c3_30, %c0_31] : memref<2x10x10x128xf32, #tpu.memory_space<vmem>>, vector<2x4x4x128xf32>
    tpu.vector_store %arg17[%c0_29, %c3, %c3_30, %c0_31], %18 {strides = array<i32>} : memref<2x10x10x128xf32, #tpu.memory_space<vmem>>, vector<2x4x4x128xf32>,
    %c0_32 = arith.constant 0 : index
    %c0_33 = arith.constant 0 : index
    %c0_34 = arith.constant 0 : index
    %26 = vector.load %arg6[%c0_32, %c0_33, %c0_34] : memref<7x7x128xf32, #tpu.memory_space<vmem>>, vector<7x7x128xf32>
    %cst_35 = arith.constant 0.000000e+00 : f32
    %27 = vector.broadcast %cst_35 : f32 to vector<2x4x4x128xf32>
    %c0_36 = arith.constant 0 : index
    %c0_37 = arith.constant 0 : index
    %c0_38 = arith.constant 0 : index
    %c0_39 = arith.constant 0 : index
    %28 = vector.load %arg17[%c0_36, %c0_37, %c0_38, %c0_39] : memref<2x10x10x128xf32, #tpu.memory_space<vmem>>, vector<2x4x4x128xf32>
    %29 = vector.extract_strided_slice %26 {offsets = [0, 0, 0], sizes = [1, 1, 128], strides = [1, 1, 1]} : vector<7x7x128xf32> to vector<1x1x128xf32>
    %30 = vector.shape_cast %29 : vector<1x1x128xf32> to vector<128xf32>
    %31 = vector.shape_cast %30 : vector<128xf32> to vector<1x1x1x128xf32>
    %32 = vector.broadcast %31 : vector<1x1x1x128xf32> to vector<2x4x4x128xf32>
    %33 = arith.mulf %28, %32 : vector<2x4x4x128xf32>
    %34 = arith.addf %27, %33 : vector<2x4x4x128xf32>
    %c0_40 = arith.constant 0 : index
    %c0_41 = arith.constant 0 : index
    %c1 = arith.constant 1 : index
    %c0_42 = arith.constant 0 : index
    %35 = vector.load %arg17[%c0_40, %c0_41, %c1, %c0_42] : memref<2x10x10x128xf32, #tpu.memory_space<vmem>>, vector<2x4x4x128xf32>
    %36 = vector.extract_strided_slice %26 {offsets = [0, 1, 0], sizes = [1, 1, 128], strides = [1, 1, 1]} : vector<7x7x128xf32> to vector<1x1x128xf32>
    %37 = vector.shape_cast %36 : vector<1x1x128xf32> to vector<128xf32>
    %38 = vector.shape_cast %37 : vector<128xf32> to vector<1x1x1x128xf32>
    %39 = vector.broadcast %38 : vector<1x1x1x128xf32> to vector<2x4x4x128xf32>
    %40 = arith.mulf %35, %39 : vector<2x4x4x128xf32>
    %41 = arith.addf %34, %40 : vector<2x4x4x128xf32>
    %c0_43 = arith.constant 0 : index
    %c0_44 = arith.constant 0 : index
    %c2 = arith.constant 2 : index
    %c0_45 = arith.constant 0 : index
    %42 = vector.load %arg17[%c0_43, %c0_44, %c2, %c0_45] : memref<2x10x10x128xf32, #tpu.memory_space<vmem>>, vector<2x4x4x128xf32>
    %43 = vector.extract_strided_slice %26 {offsets = [0, 2, 0], sizes = [1, 1, 128], strides = [1, 1, 1]} : vector<7x7x128xf32> to vector<1x1x128xf32>
    %44 = vector.shape_cast %43 : vector<1x1x128xf32> to vector<128xf32>
    %45 = vector.shape_cast %44 : vector<128xf32> to vector<1x1x1x128xf32>
    %46 = vector.broadcast %45 : vector<1x1x1x128xf32> to vector<2x4x4x128xf32>
    %47 = arith.mulf %42, %46 : vector<2x4x4x128xf32>
    %48 = arith.addf %41, %47 : vector<2x4x4x128xf32>
    %c0_46 = arith.constant 0 : index
    %c0_47 = arith.constant 0 : index
    %c3_48 = arith.constant 3 : index
    %c0_49 = arith.constant 0 : index
    %49 = vector.load %arg17[%c0_46, %c0_47, %c3_48, %c0_49] : memref<2x10x10x128xf32, #tpu.memory_space<vmem>>, vector<2x4x4x128xf32>
    %50 = vector.extract_strided_slice %26 {offsets = [0, 3, 0], sizes = [1, 1, 128], strides = [1, 1, 1]} : vector<7x7x128xf32> to vector<1x1x128xf32>
    %51 = vector.shape_cast %50 : vector<1x1x128xf32> to vector<128xf32>
    %52 = vector.shape_cast %51 : vector<128xf32> to vector<1x1x1x128xf32>
    %53 = vector.broadcast %52 : vector<1x1x1x128xf32> to vector<2x4x4x128xf32>
    %54 = arith.mulf %49, %53 : vector<2x4x4x128xf32>
    %55 = arith.addf %48, %54 : vector<2x4x4x128xf32>
    %c0_50 = arith.constant 0 : index
    %c0_51 = arith.constant 0 : index
    %c4 = arith.constant 4 : index
    %c0_52 = arith.constant 0 : index
    %56 = vector.load %arg17[%c0_50, %c0_51, %c4, %c0_52] : memref<2x10x10x128xf32, #tpu.memory_space<vmem>>, vector<2x4x4x128xf32>
    %57 = vector.extract_strided_slice %26 {offsets = [0, 4, 0], sizes = [1, 1, 128], strides = [1, 1, 1]} : vector<7x7x128xf32> to vector<1x1x128xf32>
    %58 = vector.shape_cast %57 : vector<1x1x128xf32> to vector<128xf32>
    %59 = vector.shape_cast %58 : vector<128xf32> to vector<1x1x1x128xf32>
    %60 = vector.broadcast %59 : vector<1x1x1x128xf32> to vector<2x4x4x128xf32>
    %61 = arith.mulf %56, %60 : vector<2x4x4x128xf32>
    %62 = arith.addf %55, %61 : vector<2x4x4x128xf32>
    %c0_53 = arith.constant 0 : index
    %c0_54 = arith.constant 0 : index
    %c5 = arith.constant 5 : index
    %c0_55 = arith.constant 0 : index
    %63 = vector.load %arg17[%c0_53, %c0_54, %c5, %c0_55] : memref<2x10x10x128xf32, #tpu.memory_space<vmem>>, vector<2x4x4x128xf32>
    %64 = vector.extract_strided_slice %26 {offsets = [0, 5, 0], sizes = [1, 1, 128], strides = [1, 1, 1]} : vector<7x7x128xf32> to vector<1x1x128xf32>
    %65 = vector.shape_cast %64 : vector<1x1x128xf32> to vector<128xf32>
    %66 = vector.shape_cast %65 : vector<128xf32> to vector<1x1x1x128xf32>
    %67 = vector.broadcast %66 : vector<1x1x1x128xf32> to vector<2x4x4x128xf32>
    %68 = arith.mulf %63, %67 : vector<2x4x4x128xf32>
    %69 = arith.addf %62, %68 : vector<2x4x4x128xf32>
    %c0_56 = arith.constant 0 : index
    %c0_57 = arith.constant 0 : index
    %c6 = arith.constant 6 : index
    %c0_58 = arith.constant 0 : index
    %70 = vector.load %arg17[%c0_56, %c0_57, %c6, %c0_58] : memref<2x10x10x128xf32, #tpu.memory_space<vmem>>, vector<2x4x4x128xf32>
    %71 = vector.extract_strided_slice %26 {offsets = [0, 6, 0], sizes = [1, 1, 128], strides = [1, 1, 1]} : vector<7x7x128xf32> to vector<1x1x128xf32>
    %72 = vector.shape_cast %71 : vector<1x1x128xf32> to vector<128xf32>
    %73 = vector.shape_cast %72 : vector<128xf32> to vector<1x1x1x128xf32>
    %74 = vector.broadcast %73 : vector<1x1x1x128xf32> to vector<2x4x4x128xf32>
    %75 = arith.mulf %70, %74 : vector<2x4x4x128xf32>
    %76 = arith.addf %69, %75 : vector<2x4x4x128xf32>
    %c0_59 = arith.constant 0 : index
    %c1_60 = arith.constant 1 : index
    %c0_61 = arith.constant 0 : index
    %c0_62 = arith.constant 0 : index
    %77 = vector.load %arg17[%c0_59, %c1_60, %c0_61, %c0_62] : memref<2x10x10x128xf32, #tpu.memory_space<vmem>>, vector<2x4x4x128xf32>
    %78 = vector.extract_strided_slice %26 {offsets = [1, 0, 0], sizes = [1, 1, 128], strides = [1, 1, 1]} : vector<7x7x128xf32> to vector<1x1x128xf32>
    %79 = vector.shape_cast %78 : vector<1x1x128xf32> to vector<128xf32>
    %80 = vector.shape_cast %79 : vector<128xf32> to vector<1x1x1x128xf32>
    %81 = vector.broadcast %80 : vector<1x1x1x128xf32> to vector<2x4x4x128xf32>
    %82 = arith.mulf %77, %81 : vector<2x4x4x128xf32>
    %83 = arith.addf %76, %82 : vector<2x4x4x128xf32>
    %c0_63 = arith.constant 0 : index
    %c1_64 = arith.constant 1 : index
    %c1_65 = arith.constant 1 : index
    %c0_66 = arith.constant 0 : index
    %84 = vector.load %arg17[%c0_63, %c1_64, %c1_65, %c0_66] : memref<2x10x10x128xf32, #tpu.memory_space<vmem>>, vector<2x4x4x128xf32>
    %85 = vector.extract_strided_slice %26 {offsets = [1, 1, 0], sizes = [1, 1, 128], strides = [1, 1, 1]} : vector<7x7x128xf32> to vector<1x1x128xf32>
    %86 = vector.shape_cast %85 : vector<1x1x128xf32> to vector<128xf32>
    %87 = vector.shape_cast %86 : vector<128xf32> to vector<1x1x1x128xf32>
    %88 = vector.broadcast %87 : vector<1x1x1x128xf32> to vector<2x4x4x128xf32>
    %89 = arith.mulf %84, %88 : vector<2x4x4x128xf32>
    %90 = arith.addf %83, %89 : vector<2x4x4x128xf32>
    %c0_67 = arith.constant 0 : index
    %c1_68 = arith.constant 1 : index
    %c2_69 = arith.constant 2 : index
    %c0_70 = arith.constant 0 : index
    %91 = vector.load %arg17[%c0_67, %c1_68, %c2_69, %c0_70] : memref<2x10x10x128xf32, #tpu.memory_space<vmem>>, vector<2x4x4x128xf32>
    %92 = vector.extract_strided_slice %26 {offsets = [1, 2, 0], sizes = [1, 1, 128], strides = [1, 1, 1]} : vector<7x7x128xf32> to vector<1x1x128xf32>
    %93 = vector.shape_cast %92 : vector<1x1x128xf32> to vector<128xf32>
    %94 = vector.shape_cast %93 : vector<128xf32> to vector<1x1x1x128xf32>
    %95 = vector.broadcast %94 : vector<1x1x1x128xf32> to vector<2x4x4x128xf32>
    %96 = arith.mulf %91, %95 : vector<2x4x4x128xf32>
    %97 = arith.addf %90, %96 : vector<2x4x4x128xf32>
    %c0_71 = arith.constant 0 : index
    %c1_72 = arith.constant 1 : index
    %c3_73 = arith.constant 3 : index
    %c0_74 = arith.constant 0 : index
    %98 = vector.load %arg17[%c0_71, %c1_72, %c3_73, %c0_74] : memref<2x10x10x128xf32, #tpu.memory_space<vmem>>, vector<2x4x4x128xf32>
    %99 = vector.extract_strided_slice %26 {offsets = [1, 3, 0], sizes = [1, 1, 128], strides = [1, 1, 1]} : vector<7x7x128xf32> to vector<1x1x128xf32>
    %100 = vector.shape_cast %99 : vector<1x1x128xf32> to vector<128xf32>
    %101 = vector.shape_cast %100 : vector<128xf32> to vector<1x1x1x128xf32>
    %102 = vector.broadcast %101 : vector<1x1x1x128xf32> to vector<2x4x4x128xf32>
    %103 = arith.mulf %98, %102 : vector<2x4x4x128xf32>
    %104 = arith.addf %97, %103 : vector<2x4x4x128xf32>
    %c0_75 = arith.constant 0 : index
    %c1_76 = arith.constant 1 : index
    %c4_77 = arith.constant 4 : index
    %c0_78 = arith.constant 0 : index
    %105 = vector.load %arg17[%c0_75, %c1_76, %c4_77, %c0_78] : memref<2x10x10x128xf32, #tpu.memory_space<vmem>>, vector<2x4x4x128xf32>
    %106 = vector.extract_strided_slice %26 {offsets = [1, 4, 0], sizes = [1, 1, 128], strides = [1, 1, 1]} : vector<7x7x128xf32> to vector<1x1x128xf32>
    %107 = vector.shape_cast %106 : vector<1x1x128xf32> to vector<128xf32>
    %108 = vector.shape_cast %107 : vector<128xf32> to vector<1x1x1x128xf32>
    %109 = vector.broadcast %108 : vector<1x1x1x128xf32> to vector<2x4x4x128xf32>
    %110 = arith.mulf %105, %109 : vector<2x4x4x128xf32>
    %111 = arith.addf %104, %110 : vector<2x4x4x128xf32>
    %c0_79 = arith.constant 0 : index
    %c1_80 = arith.constant 1 : index
    %c5_81 = arith.constant 5 : index
    %c0_82 = arith.constant 0 : index
    %112 = vector.load %arg17[%c0_79, %c1_80, %c5_81, %c0_82] : memref<2x10x10x128xf32, #tpu.memory_space<vmem>>, vector<2x4x4x128xf32>
    %113 = vector.extract_strided_slice %26 {offsets = [1, 5, 0], sizes = [1, 1, 128], strides = [1, 1, 1]} : vector<7x7x128xf32> to vector<1x1x128xf32>
    %114 = vector.shape_cast %113 : vector<1x1x128xf32> to vector<128xf32>
    %115 = vector.shape_cast %114 : vector<128xf32> to vector<1x1x1x128xf32>
    %116 = vector.broadcast %115 : vector<1x1x1x128xf32> to vector<2x4x4x128xf32>
    %117 = arith.mulf %112, %116 : vector<2x4x4x128xf32>
    %118 = arith.addf %111, %117 : vector<2x4x4x128xf32>
    %c0_83 = arith.constant 0 : index
    %c1_84 = arith.constant 1 : index
    %c6_85 = arith.constant 6 : index
    %c0_86 = arith.constant 0 : index
    %119 = vector.load %arg17[%c0_83, %c1_84, %c6_85, %c0_86] : memref<2x10x10x128xf32, #tpu.memory_space<vmem>>, vector<2x4x4x128xf32>
    %120 = vector.extract_strided_slice %26 {offsets = [1, 6, 0], sizes = [1, 1, 128], strides = [1, 1, 1]} : vector<7x7x128xf32> to vector<1x1x128xf32>
    %121 = vector.shape_cast %120 : vector<1x1x128xf32> to vector<128xf32>
    %122 = vector.shape_cast %121 : vector<128xf32> to vector<1x1x1x128xf32>
    %123 = vector.broadcast %122 : vector<1x1x1x128xf32> to vector<2x4x4x128xf32>
    %124 = arith.mulf %119, %123 : vector<2x4x4x128xf32>
    %125 = arith.addf %118, %124 : vector<2x4x4x128xf32>
    %c0_87 = arith.constant 0 : index
    %c2_88 = arith.constant 2 : index
    %c0_89 = arith.constant 0 : index
    %c0_90 = arith.constant 0 : index
    %126 = vector.load %arg17[%c0_87, %c2_88, %c0_89, %c0_90] : memref<2x10x10x128xf32, #tpu.memory_space<vmem>>, vector<2x4x4x128xf32>
    %127 = vector.extract_strided_slice %26 {offsets = [2, 0, 0], sizes = [1, 1, 128], strides = [1, 1, 1]} : vector<7x7x128xf32> to vector<1x1x128xf32>
    %128 = vector.shape_cast %127 : vector<1x1x128xf32> to vector<128xf32>
    %129 = vector.shape_cast %128 : vector<128xf32> to vector<1x1x1x128xf32>
    %130 = vector.broadcast %129 : vector<1x1x1x128xf32> to vector<2x4x4x128xf32>
    %131 = arith.mulf %126, %130 : vector<2x4x4x128xf32>
    %132 = arith.addf %125, %131 : vector<2x4x4x128xf32>
    %c0_91 = arith.constant 0 : index
    %c2_92 = arith.constant 2 : index
    %c1_93 = arith.constant 1 : index
    %c0_94 = arith.constant 0 : index
    %133 = vector.load %arg17[%c0_91, %c2_92, %c1_93, %c0_94] : memref<2x10x10x128xf32, #tpu.memory_space<vmem>>, vector<2x4x4x128xf32>
    %134 = vector.extract_strided_slice %26 {offsets = [2, 1, 0], sizes = [1, 1, 128], strides = [1, 1, 1]} : vector<7x7x128xf32> to vector<1x1x128xf32>
    %135 = vector.shape_cast %134 : vector<1x1x128xf32> to vector<128xf32>
    %136 = vector.shape_cast %135 : vector<128xf32> to vector<1x1x1x128xf32>
    %137 = vector.broadcast %136 : vector<1x1x1x128xf32> to vector<2x4x4x128xf32>
    %138 = arith.mulf %133, %137 : vector<2x4x4x128xf32>
    %139 = arith.addf %132, %138 : vector<2x4x4x128xf32>
    %c0_95 = arith.constant 0 : index
    %c2_96 = arith.constant 2 : index
    %c2_97 = arith.constant 2 : index
    %c0_98 = arith.constant 0 : index
    %140 = vector.load %arg17[%c0_95, %c2_96, %c2_97, %c0_98] : memref<2x10x10x128xf32, #tpu.memory_space<vmem>>, vector<2x4x4x128xf32>
    %141 = vector.extract_strided_slice %26 {offsets = [2, 2, 0], sizes = [1, 1, 128], strides = [1, 1, 1]} : vector<7x7x128xf32> to vector<1x1x128xf32>
    %142 = vector.shape_cast %141 : vector<1x1x128xf32> to vector<128xf32>
    %143 = vector.shape_cast %142 : vector<128xf32> to vector<1x1x1x128xf32>
    %144 = vector.broadcast %143 : vector<1x1x1x128xf32> to vector<2x4x4x128xf32>
    %145 = arith.mulf %140, %144 : vector<2x4x4x128xf32>
    %146 = arith.addf %139, %145 : vector<2x4x4x128xf32>
    %c0_99 = arith.constant 0 : index
    %c2_100 = arith.constant 2 : index
    %c3_101 = arith.constant 3 : index
    %c0_102 = arith.constant 0 : index
    %147 = vector.load %arg17[%c0_99, %c2_100, %c3_101, %c0_102] : memref<2x10x10x128xf32, #tpu.memory_space<vmem>>, vector<2x4x4x128xf32>
    %148 = vector.extract_strided_slice %26 {offsets = [2, 3, 0], sizes = [1, 1, 128], strides = [1, 1, 1]} : vector<7x7x128xf32> to vector<1x1x128xf32>
    %149 = vector.shape_cast %148 : vector<1x1x128xf32> to vector<128xf32>
    %150 = vector.shape_cast %149 : vector<128xf32> to vector<1x1x1x128xf32>
    %151 = vector.broadcast %150 : vector<1x1x1x128xf32> to vector<2x4x4x128xf32>
    %152 = arith.mulf %147, %151 : vector<2x4x4x128xf32>
    %153 = arith.addf %146, %152 : vector<2x4x4x128xf32>
    %c0_103 = arith.constant 0 : index
    %c2_104 = arith.constant 2 : index
    %c4_105 = arith.constant 4 : index
    %c0_106 = arith.constant 0 : index
    %154 = vector.load %arg17[%c0_103, %c2_104, %c4_105, %c0_106] : memref<2x10x10x128xf32, #tpu.memory_space<vmem>>, vector<2x4x4x128xf32>
    %155 = vector.extract_strided_slice %26 {offsets = [2, 4, 0], sizes = [1, 1, 128], strides = [1, 1, 1]} : vector<7x7x128xf32> to vector<1x1x128xf32>
    %156 = vector.shape_cast %155 : vector<1x1x128xf32> to vector<128xf32>
    %157 = vector.shape_cast %156 : vector<128xf32> to vector<1x1x1x128xf32>
    %158 = vector.broadcast %157 : vector<1x1x1x128xf32> to vector<2x4x4x128xf32>
    %159 = arith.mulf %154, %158 : vector<2x4x4x128xf32>
    %160 = arith.addf %153, %159 : vector<2x4x4x128xf32>
    %c0_107 = arith.constant 0 : index
    %c2_108 = arith.constant 2 : index
    %c5_109 = arith.constant 5 : index
    %c0_110 = arith.constant 0 : index
    %161 = vector.load %arg17[%c0_107, %c2_108, %c5_109, %c0_110] : memref<2x10x10x128xf32, #tpu.memory_space<vmem>>, vector<2x4x4x128xf32>
    %162 = vector.extract_strided_slice %26 {offsets = [2, 5, 0], sizes = [1, 1, 128], strides = [1, 1, 1]} : vector<7x7x128xf32> to vector<1x1x128xf32>
    %163 = vector.shape_cast %162 : vector<1x1x128xf32> to vector<128xf32>
    %164 = vector.shape_cast %163 : vector<128xf32> to vector<1x1x1x128xf32>
    %165 = vector.broadcast %164 : vector<1x1x1x128xf32> to vector<2x4x4x128xf32>
    %166 = arith.mulf %161, %165 : vector<2x4x4x128xf32>
    %167 = arith.addf %160, %166 : vector<2x4x4x128xf32>
    %c0_111 = arith.constant 0 : index
    %c2_112 = arith.constant 2 : index
    %c6_113 = arith.constant 6 : index
    %c0_114 = arith.constant 0 : index
    %168 = vector.load %arg17[%c0_111, %c2_112, %c6_113, %c0_114] : memref<2x10x10x128xf32, #tpu.memory_space<vmem>>, vector<2x4x4x128xf32>
    %169 = vector.extract_strided_slice %26 {offsets = [2, 6, 0], sizes = [1, 1, 128], strides = [1, 1, 1]} : vector<7x7x128xf32> to vector<1x1x128xf32>
    %170 = vector.shape_cast %169 : vector<1x1x128xf32> to vector<128xf32>
    %171 = vector.shape_cast %170 : vector<128xf32> to vector<1x1x1x128xf32>
    %172 = vector.broadcast %171 : vector<1x1x1x128xf32> to vector<2x4x4x128xf32>
    %173 = arith.mulf %168, %172 : vector<2x4x4x128xf32>
    %174 = arith.addf %167, %173 : vector<2x4x4x128xf32>
    %c0_115 = arith.constant 0 : index
    %c3_116 = arith.constant 3 : index
    %c0_117 = arith.constant 0 : index
    %c0_118 = arith.constant 0 : index
    %175 = vector.load %arg17[%c0_115, %c3_116, %c0_117, %c0_118] : memref<2x10x10x128xf32, #tpu.memory_space<vmem>>, vector<2x4x4x128xf32>
    %176 = vector.extract_strided_slice %26 {offsets = [3, 0, 0], sizes = [1, 1, 128], strides = [1, 1, 1]} : vector<7x7x128xf32> to vector<1x1x128xf32>
    %177 = vector.shape_cast %176 : vector<1x1x128xf32> to vector<128xf32>
    %178 = vector.shape_cast %177 : vector<128xf32> to vector<1x1x1x128xf32>
    %179 = vector.broadcast %178 : vector<1x1x1x128xf32> to vector<2x4x4x128xf32>
    %180 = arith.mulf %175, %179 : vector<2x4x4x128xf32>
    %181 = arith.addf %174, %180 : vector<2x4x4x128xf32>
    %c0_119 = arith.constant 0 : index
    %c3_120 = arith.constant 3 : index
    %c1_121 = arith.constant 1 : index
    %c0_122 = arith.constant 0 : index
    %182 = vector.load %arg17[%c0_119, %c3_120, %c1_121, %c0_122] : memref<2x10x10x128xf32, #tpu.memory_space<vmem>>, vector<2x4x4x128xf32>
    %183 = vector.extract_strided_slice %26 {offsets = [3, 1, 0], sizes = [1, 1, 128], strides = [1, 1, 1]} : vector<7x7x128xf32> to vector<1x1x128xf32>
    %184 = vector.shape_cast %183 : vector<1x1x128xf32> to vector<128xf32>
    %185 = vector.shape_cast %184 : vector<128xf32> to vector<1x1x1x128xf32>
    %186 = vector.broadcast %185 : vector<1x1x1x128xf32> to vector<2x4x4x128xf32>
    %187 = arith.mulf %182, %186 : vector<2x4x4x128xf32>
    %188 = arith.addf %181, %187 : vector<2x4x4x128xf32>
    %c0_123 = arith.constant 0 : index
    %c3_124 = arith.constant 3 : index
    %c2_125 = arith.constant 2 : index
    %c0_126 = arith.constant 0 : index
    %189 = vector.load %arg17[%c0_123, %c3_124, %c2_125, %c0_126] : memref<2x10x10x128xf32, #tpu.memory_space<vmem>>, vector<2x4x4x128xf32>
    %190 = vector.extract_strided_slice %26 {offsets = [3, 2, 0], sizes = [1, 1, 128], strides = [1, 1, 1]} : vector<7x7x128xf32> to vector<1x1x128xf32>
    %191 = vector.shape_cast %190 : vector<1x1x128xf32> to vector<128xf32>
    %192 = vector.shape_cast %191 : vector<128xf32> to vector<1x1x1x128xf32>
    %193 = vector.broadcast %192 : vector<1x1x1x128xf32> to vector<2x4x4x128xf32>
    %194 = arith.mulf %189, %193 : vector<2x4x4x128xf32>
    %195 = arith.addf %188, %194 : vector<2x4x4x128xf32>
    %c0_127 = arith.constant 0 : index
    %c3_128 = arith.constant 3 : index
    %c3_129 = arith.constant 3 : index
    %c0_130 = arith.constant 0 : index
    %196 = vector.load %arg17[%c0_127, %c3_128, %c3_129, %c0_130] : memref<2x10x10x128xf32, #tpu.memory_space<vmem>>, vector<2x4x4x128xf32>
    %197 = vector.extract_strided_slice %26 {offsets = [3, 3, 0], sizes = [1, 1, 128], strides = [1, 1, 1]} : vector<7x7x128xf32> to vector<1x1x128xf32>
    %198 = vector.shape_cast %197 : vector<1x1x128xf32> to vector<128xf32>
    %199 = vector.shape_cast %198 : vector<128xf32> to vector<1x1x1x128xf32>
    %200 = vector.broadcast %199 : vector<1x1x1x128xf32> to vector<2x4x4x128xf32>
    %201 = arith.mulf %196, %200 : vector<2x4x4x128xf32>
    %202 = arith.addf %195, %201 : vector<2x4x4x128xf32>
    %c0_131 = arith.constant 0 : index
    %c3_132 = arith.constant 3 : index
    %c4_133 = arith.constant 4 : index
    %c0_134 = arith.constant 0 : index
    %203 = vector.load %arg17[%c0_131, %c3_132, %c4_133, %c0_134] : memref<2x10x10x128xf32, #tpu.memory_space<vmem>>, vector<2x4x4x128xf32>
    %204 = vector.extract_strided_slice %26 {offsets = [3, 4, 0], sizes = [1, 1, 128], strides = [1, 1, 1]} : vector<7x7x128xf32> to vector<1x1x128xf32>
    %205 = vector.shape_cast %204 : vector<1x1x128xf32> to vector<128xf32>
    %206 = vector.shape_cast %205 : vector<128xf32> to vector<1x1x1x128xf32>
    %207 = vector.broadcast %206 : vector<1x1x1x128xf32> to vector<2x4x4x128xf32>
    %208 = arith.mulf %203, %207 : vector<2x4x4x128xf32>
    %209 = arith.addf %202, %208 : vector<2x4x4x128xf32>
    %c0_135 = arith.constant 0 : index
    %c3_136 = arith.constant 3 : index
    %c5_137 = arith.constant 5 : index
    %c0_138 = arith.constant 0 : index
    %210 = vector.load %arg17[%c0_135, %c3_136, %c5_137, %c0_138] : memref<2x10x10x128xf32, #tpu.memory_space<vmem>>, vector<2x4x4x128xf32>
    %211 = vector.extract_strided_slice %26 {offsets = [3, 5, 0], sizes = [1, 1, 128], strides = [1, 1, 1]} : vector<7x7x128xf32> to vector<1x1x128xf32>
    %212 = vector.shape_cast %211 : vector<1x1x128xf32> to vector<128xf32>
    %213 = vector.shape_cast %212 : vector<128xf32> to vector<1x1x1x128xf32>
    %214 = vector.broadcast %213 : vector<1x1x1x128xf32> to vector<2x4x4x128xf32>
    %215 = arith.mulf %210, %214 : vector<2x4x4x128xf32>
    %216 = arith.addf %209, %215 : vector<2x4x4x128xf32>
    %c0_139 = arith.constant 0 : index
    %c3_140 = arith.constant 3 : index
    %c6_141 = arith.constant 6 : index
    %c0_142 = arith.constant 0 : index
    %217 = vector.load %arg17[%c0_139, %c3_140, %c6_141, %c0_142] : memref<2x10x10x128xf32, #tpu.memory_space<vmem>>, vector<2x4x4x128xf32>
    %218 = vector.extract_strided_slice %26 {offsets = [3, 6, 0], sizes = [1, 1, 128], strides = [1, 1, 1]} : vector<7x7x128xf32> to vector<1x1x128xf32>
    %219 = vector.shape_cast %218 : vector<1x1x128xf32> to vector<128xf32>
    %220 = vector.shape_cast %219 : vector<128xf32> to vector<1x1x1x128xf32>
    %221 = vector.broadcast %220 : vector<1x1x1x128xf32> to vector<2x4x4x128xf32>
    %222 = arith.mulf %217, %221 : vector<2x4x4x128xf32>
    %223 = arith.addf %216, %222 : vector<2x4x4x128xf32>
    %c0_143 = arith.constant 0 : index
    %c4_144 = arith.constant 4 : index
    %c0_145 = arith.constant 0 : index
    %c0_146 = arith.constant 0 : index
    %224 = vector.load %arg17[%c0_143, %c4_144, %c0_145, %c0_146] : memref<2x10x10x128xf32, #tpu.memory_space<vmem>>, vector<2x4x4x128xf32>
    %225 = vector.extract_strided_slice %26 {offsets = [4, 0, 0], sizes = [1, 1, 128], strides = [1, 1, 1]} : vector<7x7x128xf32> to vector<1x1x128xf32>
    %226 = vector.shape_cast %225 : vector<1x1x128xf32> to vector<128xf32>
    %227 = vector.shape_cast %226 : vector<128xf32> to vector<1x1x1x128xf32>
    %228 = vector.broadcast %227 : vector<1x1x1x128xf32> to vector<2x4x4x128xf32>
    %229 = arith.mulf %224, %228 : vector<2x4x4x128xf32>
    %230 = arith.addf %223, %229 : vector<2x4x4x128xf32>
    %c0_147 = arith.constant 0 : index
    %c4_148 = arith.constant 4 : index
    %c1_149 = arith.constant 1 : index
    %c0_150 = arith.constant 0 : index
    %231 = vector.load %arg17[%c0_147, %c4_148, %c1_149, %c0_150] : memref<2x10x10x128xf32, #tpu.memory_space<vmem>>, vector<2x4x4x128xf32>
    %232 = vector.extract_strided_slice %26 {offsets = [4, 1, 0], sizes = [1, 1, 128], strides = [1, 1, 1]} : vector<7x7x128xf32> to vector<1x1x128xf32>
    %233 = vector.shape_cast %232 : vector<1x1x128xf32> to vector<128xf32>
    %234 = vector.shape_cast %233 : vector<128xf32> to vector<1x1x1x128xf32>
    %235 = vector.broadcast %234 : vector<1x1x1x128xf32> to vector<2x4x4x128xf32>
    %236 = arith.mulf %231, %235 : vector<2x4x4x128xf32>
    %237 = arith.addf %230, %236 : vector<2x4x4x128xf32>
    %c0_151 = arith.constant 0 : index
    %c4_152 = arith.constant 4 : index
    %c2_153 = arith.constant 2 : index
    %c0_154 = arith.constant 0 : index
    %238 = vector.load %arg17[%c0_151, %c4_152, %c2_153, %c0_154] : memref<2x10x10x128xf32, #tpu.memory_space<vmem>>, vector<2x4x4x128xf32>
    %239 = vector.extract_strided_slice %26 {offsets = [4, 2, 0], sizes = [1, 1, 128], strides = [1, 1, 1]} : vector<7x7x128xf32> to vector<1x1x128xf32>
    %240 = vector.shape_cast %239 : vector<1x1x128xf32> to vector<128xf32>
    %241 = vector.shape_cast %240 : vector<128xf32> to vector<1x1x1x128xf32>
    %242 = vector.broadcast %241 : vector<1x1x1x128xf32> to vector<2x4x4x128xf32>
    %243 = arith.mulf %238, %242 : vector<2x4x4x128xf32>
    %244 = arith.addf %237, %243 : vector<2x4x4x128xf32>
    %c0_155 = arith.constant 0 : index
    %c4_156 = arith.constant 4 : index
    %c3_157 = arith.constant 3 : index
    %c0_158 = arith.constant 0 : index
    %245 = vector.load %arg17[%c0_155, %c4_156, %c3_157, %c0_158] : memref<2x10x10x128xf32, #tpu.memory_space<vmem>>, vector<2x4x4x128xf32>
    %246 = vector.extract_strided_slice %26 {offsets = [4, 3, 0], sizes = [1, 1, 128], strides = [1, 1, 1]} : vector<7x7x128xf32> to vector<1x1x128xf32>
    %247 = vector.shape_cast %246 : vector<1x1x128xf32> to vector<128xf32>
    %248 = vector.shape_cast %247 : vector<128xf32> to vector<1x1x1x128xf32>
    %249 = vector.broadcast %248 : vector<1x1x1x128xf32> to vector<2x4x4x128xf32>
    %250 = arith.mulf %245, %249 : vector<2x4x4x128xf32>
    %251 = arith.addf %244, %250 : vector<2x4x4x128xf32>
    %c0_159 = arith.constant 0 : index
    %c4_160 = arith.constant 4 : index
    %c4_161 = arith.constant 4 : index
    %c0_162 = arith.constant 0 : index
    %252 = vector.load %arg17[%c0_159, %c4_160, %c4_161, %c0_162] : memref<2x10x10x128xf32, #tpu.memory_space<vmem>>, vector<2x4x4x128xf32>
    %253 = vector.extract_strided_slice %26 {offsets = [4, 4, 0], sizes = [1, 1, 128], strides = [1, 1, 1]} : vector<7x7x128xf32> to vector<1x1x128xf32>
    %254 = vector.shape_cast %253 : vector<1x1x128xf32> to vector<128xf32>
    %255 = vector.shape_cast %254 : vector<128xf32> to vector<1x1x1x128xf32>
    %256 = vector.broadcast %255 : vector<1x1x1x128xf32> to vector<2x4x4x128xf32>
    %257 = arith.mulf %252, %256 : vector<2x4x4x128xf32>
    %258 = arith.addf %251, %257 : vector<2x4x4x128xf32>
    %c0_163 = arith.constant 0 : index
    %c4_164 = arith.constant 4 : index
    %c5_165 = arith.constant 5 : index
    %c0_166 = arith.constant 0 : index
    %259 = vector.load %arg17[%c0_163, %c4_164, %c5_165, %c0_166] : memref<2x10x10x128xf32, #tpu.memory_space<vmem>>, vector<2x4x4x128xf32>
    %260 = vector.extract_strided_slice %26 {offsets = [4, 5, 0], sizes = [1, 1, 128], strides = [1, 1, 1]} : vector<7x7x128xf32> to vector<1x1x128xf32>
    %261 = vector.shape_cast %260 : vector<1x1x128xf32> to vector<128xf32>
    %262 = vector.shape_cast %261 : vector<128xf32> to vector<1x1x1x128xf32>
    %263 = vector.broadcast %262 : vector<1x1x1x128xf32> to vector<2x4x4x128xf32>
    %264 = arith.mulf %259, %263 : vector<2x4x4x128xf32>
    %265 = arith.addf %258, %264 : vector<2x4x4x128xf32>
    %c0_167 = arith.constant 0 : index
    %c4_168 = arith.constant 4 : index
    %c6_169 = arith.constant 6 : index
    %c0_170 = arith.constant 0 : index
    %266 = vector.load %arg17[%c0_167, %c4_168, %c6_169, %c0_170] : memref<2x10x10x128xf32, #tpu.memory_space<vmem>>, vector<2x4x4x128xf32>
    %267 = vector.extract_strided_slice %26 {offsets = [4, 6, 0], sizes = [1, 1, 128], strides = [1, 1, 1]} : vector<7x7x128xf32> to vector<1x1x128xf32>
    %268 = vector.shape_cast %267 : vector<1x1x128xf32> to vector<128xf32>
    %269 = vector.shape_cast %268 : vector<128xf32> to vector<1x1x1x128xf32>
    %270 = vector.broadcast %269 : vector<1x1x1x128xf32> to vector<2x4x4x128xf32>
    %271 = arith.mulf %266, %270 : vector<2x4x4x128xf32>
    %272 = arith.addf %265, %271 : vector<2x4x4x128xf32>
    %c0_171 = arith.constant 0 : index
    %c5_172 = arith.constant 5 : index
    %c0_173 = arith.constant 0 : index
    %c0_174 = arith.constant 0 : index
    %273 = vector.load %arg17[%c0_171, %c5_172, %c0_173, %c0_174] : memref<2x10x10x128xf32, #tpu.memory_space<vmem>>, vector<2x4x4x128xf32>
    %274 = vector.extract_strided_slice %26 {offsets = [5, 0, 0], sizes = [1, 1, 128], strides = [1, 1, 1]} : vector<7x7x128xf32> to vector<1x1x128xf32>
    %275 = vector.shape_cast %274 : vector<1x1x128xf32> to vector<128xf32>
    %276 = vector.shape_cast %275 : vector<128xf32> to vector<1x1x1x128xf32>
    %277 = vector.broadcast %276 : vector<1x1x1x128xf32> to vector<2x4x4x128xf32>
    %278 = arith.mulf %273, %277 : vector<2x4x4x128xf32>
    %279 = arith.addf %272, %278 : vector<2x4x4x128xf32>
    %c0_175 = arith.constant 0 : index
    %c5_176 = arith.constant 5 : index
    %c1_177 = arith.constant 1 : index
    %c0_178 = arith.constant 0 : index
    %280 = vector.load %arg17[%c0_175, %c5_176, %c1_177, %c0_178] : memref<2x10x10x128xf32, #tpu.memory_space<vmem>>, vector<2x4x4x128xf32>
    %281 = vector.extract_strided_slice %26 {offsets = [5, 1, 0], sizes = [1, 1, 128], strides = [1, 1, 1]} : vector<7x7x128xf32> to vector<1x1x128xf32>
    %282 = vector.shape_cast %281 : vector<1x1x128xf32> to vector<128xf32>
    %283 = vector.shape_cast %282 : vector<128xf32> to vector<1x1x1x128xf32>
    %284 = vector.broadcast %283 : vector<1x1x1x128xf32> to vector<2x4x4x128xf32>
    %285 = arith.mulf %280, %284 : vector<2x4x4x128xf32>
    %286 = arith.addf %279, %285 : vector<2x4x4x128xf32>
    %c0_179 = arith.constant 0 : index
    %c5_180 = arith.constant 5 : index
    %c2_181 = arith.constant 2 : index
    %c0_182 = arith.constant 0 : index
    %287 = vector.load %arg17[%c0_179, %c5_180, %c2_181, %c0_182] : memref<2x10x10x128xf32, #tpu.memory_space<vmem>>, vector<2x4x4x128xf32>
    %288 = vector.extract_strided_slice %26 {offsets = [5, 2, 0], sizes = [1, 1, 128], strides = [1, 1, 1]} : vector<7x7x128xf32> to vector<1x1x128xf32>
    %289 = vector.shape_cast %288 : vector<1x1x128xf32> to vector<128xf32>
    %290 = vector.shape_cast %289 : vector<128xf32> to vector<1x1x1x128xf32>
    %291 = vector.broadcast %290 : vector<1x1x1x128xf32> to vector<2x4x4x128xf32>
    %292 = arith.mulf %287, %291 : vector<2x4x4x128xf32>
    %293 = arith.addf %286, %292 : vector<2x4x4x128xf32>
    %c0_183 = arith.constant 0 : index
    %c5_184 = arith.constant 5 : index
    %c3_185 = arith.constant 3 : index
    %c0_186 = arith.constant 0 : index
    %294 = vector.load %arg17[%c0_183, %c5_184, %c3_185, %c0_186] : memref<2x10x10x128xf32, #tpu.memory_space<vmem>>, vector<2x4x4x128xf32>
    %295 = vector.extract_strided_slice %26 {offsets = [5, 3, 0], sizes = [1, 1, 128], strides = [1, 1, 1]} : vector<7x7x128xf32> to vector<1x1x128xf32>
    %296 = vector.shape_cast %295 : vector<1x1x128xf32> to vector<128xf32>
    %297 = vector.shape_cast %296 : vector<128xf32> to vector<1x1x1x128xf32>
    %298 = vector.broadcast %297 : vector<1x1x1x128xf32> to vector<2x4x4x128xf32>
    %299 = arith.mulf %294, %298 : vector<2x4x4x128xf32>
    %300 = arith.addf %293, %299 : vector<2x4x4x128xf32>
    %c0_187 = arith.constant 0 : index
    %c5_188 = arith.constant 5 : index
    %c4_189 = arith.constant 4 : index
    %c0_190 = arith.constant 0 : index
    %301 = vector.load %arg17[%c0_187, %c5_188, %c4_189, %c0_190] : memref<2x10x10x128xf32, #tpu.memory_space<vmem>>, vector<2x4x4x128xf32>
    %302 = vector.extract_strided_slice %26 {offsets = [5, 4, 0], sizes = [1, 1, 128], strides = [1, 1, 1]} : vector<7x7x128xf32> to vector<1x1x128xf32>
    %303 = vector.shape_cast %302 : vector<1x1x128xf32> to vector<128xf32>
    %304 = vector.shape_cast %303 : vector<128xf32> to vector<1x1x1x128xf32>
    %305 = vector.broadcast %304 : vector<1x1x1x128xf32> to vector<2x4x4x128xf32>
    %306 = arith.mulf %301, %305 : vector<2x4x4x128xf32>
    %307 = arith.addf %300, %306 : vector<2x4x4x128xf32>
    %c0_191 = arith.constant 0 : index
    %c5_192 = arith.constant 5 : index
    %c5_193 = arith.constant 5 : index
    %c0_194 = arith.constant 0 : index
    %308 = vector.load %arg17[%c0_191, %c5_192, %c5_193, %c0_194] : memref<2x10x10x128xf32, #tpu.memory_space<vmem>>, vector<2x4x4x128xf32>
    %309 = vector.extract_strided_slice %26 {offsets = [5, 5, 0], sizes = [1, 1, 128], strides = [1, 1, 1]} : vector<7x7x128xf32> to vector<1x1x128xf32>
    %310 = vector.shape_cast %309 : vector<1x1x128xf32> to vector<128xf32>
    %311 = vector.shape_cast %310 : vector<128xf32> to vector<1x1x1x128xf32>
    %312 = vector.broadcast %311 : vector<1x1x1x128xf32> to vector<2x4x4x128xf32>
    %313 = arith.mulf %308, %312 : vector<2x4x4x128xf32>
    %314 = arith.addf %307, %313 : vector<2x4x4x128xf32>
    %c0_195 = arith.constant 0 : index
    %c5_196 = arith.constant 5 : index
    %c6_197 = arith.constant 6 : index
    %c0_198 = arith.constant 0 : index
    %315 = vector.load %arg17[%c0_195, %c5_196, %c6_197, %c0_198] : memref<2x10x10x128xf32, #tpu.memory_space<vmem>>, vector<2x4x4x128xf32>
    %316 = vector.extract_strided_slice %26 {offsets = [5, 6, 0], sizes = [1, 1, 128], strides = [1, 1, 1]} : vector<7x7x128xf32> to vector<1x1x128xf32>
    %317 = vector.shape_cast %316 : vector<1x1x128xf32> to vector<128xf32>
    %318 = vector.shape_cast %317 : vector<128xf32> to vector<1x1x1x128xf32>
    %319 = vector.broadcast %318 : vector<1x1x1x128xf32> to vector<2x4x4x128xf32>
    %320 = arith.mulf %315, %319 : vector<2x4x4x128xf32>
    %321 = arith.addf %314, %320 : vector<2x4x4x128xf32>
    %c0_199 = arith.constant 0 : index
    %c6_200 = arith.constant 6 : index
    %c0_201 = arith.constant 0 : index
    %c0_202 = arith.constant 0 : index
    %322 = vector.load %arg17[%c0_199, %c6_200, %c0_201, %c0_202] : memref<2x10x10x128xf32, #tpu.memory_space<vmem>>, vector<2x4x4x128xf32>
    %323 = vector.extract_strided_slice %26 {offsets = [6, 0, 0], sizes = [1, 1, 128], strides = [1, 1, 1]} : vector<7x7x128xf32> to vector<1x1x128xf32>
    %324 = vector.shape_cast %323 : vector<1x1x128xf32> to vector<128xf32>
    %325 = vector.shape_cast %324 : vector<128xf32> to vector<1x1x1x128xf32>
    %326 = vector.broadcast %325 : vector<1x1x1x128xf32> to vector<2x4x4x128xf32>
    %327 = arith.mulf %322, %326 : vector<2x4x4x128xf32>
    %328 = arith.addf %321, %327 : vector<2x4x4x128xf32>
    %c0_203 = arith.constant 0 : index
    %c6_204 = arith.constant 6 : index
    %c1_205 = arith.constant 1 : index
    %c0_206 = arith.constant 0 : index
    %329 = vector.load %arg17[%c0_203, %c6_204, %c1_205, %c0_206] : memref<2x10x10x128xf32, #tpu.memory_space<vmem>>, vector<2x4x4x128xf32>
    %330 = vector.extract_strided_slice %26 {offsets = [6, 1, 0], sizes = [1, 1, 128], strides = [1, 1, 1]} : vector<7x7x128xf32> to vector<1x1x128xf32>
    %331 = vector.shape_cast %330 : vector<1x1x128xf32> to vector<128xf32>
    %332 = vector.shape_cast %331 : vector<128xf32> to vector<1x1x1x128xf32>
    %333 = vector.broadcast %332 : vector<1x1x1x128xf32> to vector<2x4x4x128xf32>
    %334 = arith.mulf %329, %333 : vector<2x4x4x128xf32>
    %335 = arith.addf %328, %334 : vector<2x4x4x128xf32>
    %c0_207 = arith.constant 0 : index
    %c6_208 = arith.constant 6 : index
    %c2_209 = arith.constant 2 : index
    %c0_210 = arith.constant 0 : index
    %336 = vector.load %arg17[%c0_207, %c6_208, %c2_209, %c0_210] : memref<2x10x10x128xf32, #tpu.memory_space<vmem>>, vector<2x4x4x128xf32>
    %337 = vector.extract_strided_slice %26 {offsets = [6, 2, 0], sizes = [1, 1, 128], strides = [1, 1, 1]} : vector<7x7x128xf32> to vector<1x1x128xf32>
    %338 = vector.shape_cast %337 : vector<1x1x128xf32> to vector<128xf32>
    %339 = vector.shape_cast %338 : vector<128xf32> to vector<1x1x1x128xf32>
    %340 = vector.broadcast %339 : vector<1x1x1x128xf32> to vector<2x4x4x128xf32>
    %341 = arith.mulf %336, %340 : vector<2x4x4x128xf32>
    %342 = arith.addf %335, %341 : vector<2x4x4x128xf32>
    %c0_211 = arith.constant 0 : index
    %c6_212 = arith.constant 6 : index
    %c3_213 = arith.constant 3 : index
    %c0_214 = arith.constant 0 : index
    %343 = vector.load %arg17[%c0_211, %c6_212, %c3_213, %c0_214] : memref<2x10x10x128xf32, #tpu.memory_space<vmem>>, vector<2x4x4x128xf32>
    %344 = vector.extract_strided_slice %26 {offsets = [6, 3, 0], sizes = [1, 1, 128], strides = [1, 1, 1]} : vector<7x7x128xf32> to vector<1x1x128xf32>
    %345 = vector.shape_cast %344 : vector<1x1x128xf32> to vector<128xf32>
    %346 = vector.shape_cast %345 : vector<128xf32> to vector<1x1x1x128xf32>
    %347 = vector.broadcast %346 : vector<1x1x1x128xf32> to vector<2x4x4x128xf32>
    %348 = arith.mulf %343, %347 : vector<2x4x4x128xf32>
    %349 = arith.addf %342, %348 : vector<2x4x4x128xf32>
    %c0_215 = arith.constant 0 : index
    %c6_216 = arith.constant 6 : index
    %c4_217 = arith.constant 4 : index
    %c0_218 = arith.constant 0 : index
    %350 = vector.load %arg17[%c0_215, %c6_216, %c4_217, %c0_218] : memref<2x10x10x128xf32, #tpu.memory_space<vmem>>, vector<2x4x4x128xf32>
    %351 = vector.extract_strided_slice %26 {offsets = [6, 4, 0], sizes = [1, 1, 128], strides = [1, 1, 1]} : vector<7x7x128xf32> to vector<1x1x128xf32>
    %352 = vector.shape_cast %351 : vector<1x1x128xf32> to vector<128xf32>
    %353 = vector.shape_cast %352 : vector<128xf32> to vector<1x1x1x128xf32>
    %354 = vector.broadcast %353 : vector<1x1x1x128xf32> to vector<2x4x4x128xf32>
    %355 = arith.mulf %350, %354 : vector<2x4x4x128xf32>
    %356 = arith.addf %349, %355 : vector<2x4x4x128xf32>
    %c0_219 = arith.constant 0 : index
    %c6_220 = arith.constant 6 : index
    %c5_221 = arith.constant 5 : index
    %c0_222 = arith.constant 0 : index
    %357 = vector.load %arg17[%c0_219, %c6_220, %c5_221, %c0_222] : memref<2x10x10x128xf32, #tpu.memory_space<vmem>>, vector<2x4x4x128xf32>
    %358 = vector.extract_strided_slice %26 {offsets = [6, 5, 0], sizes = [1, 1, 128], strides = [1, 1, 1]} : vector<7x7x128xf32> to vector<1x1x128xf32>
    %359 = vector.shape_cast %358 : vector<1x1x128xf32> to vector<128xf32>
    %360 = vector.shape_cast %359 : vector<128xf32> to vector<1x1x1x128xf32>
    %361 = vector.broadcast %360 : vector<1x1x1x128xf32> to vector<2x4x4x128xf32>
    %362 = arith.mulf %357, %361 : vector<2x4x4x128xf32>
    %363 = arith.addf %356, %362 : vector<2x4x4x128xf32>
    %c0_223 = arith.constant 0 : index
    %c6_224 = arith.constant 6 : index
    %c6_225 = arith.constant 6 : index
    %c0_226 = arith.constant 0 : index
    %364 = vector.load %arg17[%c0_223, %c6_224, %c6_225, %c0_226] : memref<2x10x10x128xf32, #tpu.memory_space<vmem>>, vector<2x4x4x128xf32>
    %365 = vector.extract_strided_slice %26 {offsets = [6, 6, 0], sizes = [1, 1, 128], strides = [1, 1, 1]} : vector<7x7x128xf32> to vector<1x1x128xf32>
    %366 = vector.shape_cast %365 : vector<1x1x128xf32> to vector<128xf32>
    %367 = vector.shape_cast %366 : vector<128xf32> to vector<1x1x1x128xf32>
    %368 = vector.broadcast %367 : vector<1x1x1x128xf32> to vector<2x4x4x128xf32>
    %369 = arith.mulf %364, %368 : vector<2x4x4x128xf32>
    %370 = arith.addf %363, %369 : vector<2x4x4x128xf32>
    %371 = vector.shape_cast %370 : vector<2x4x4x128xf32> to vector<32x128xf32>
    %c0_227 = arith.constant 0 : index
    %c0_228 = arith.constant 0 : index
    %372 = vector.load %arg7[%c0_227, %c0_228] : memref<1x128xf32, #tpu.memory_space<vmem>>, vector<1x128xf32>
    %373 = vector.broadcast %372 : vector<1x128xf32> to vector<32x128xf32>
    %374 = arith.addf %371, %373 : vector<32x128xf32>
    %cst_229 = arith.constant dense<0.000000e+00> : vector<32xf32>
    %375 = vector.multi_reduction <add>, %374, %cst_229 [1] : vector<32x128xf32> to vector<32xf32>
    %376 = vector.shape_cast %375 : vector<32xf32> to vector<32x1xf32>
    %cst_230 = arith.constant 1.280000e+02 : f32
    %377 = vector.broadcast %cst_230 : f32 to vector<32x1xf32>
    %378 = arith.divf %376, %377 : vector<32x1xf32>
    %379 = vector.broadcast %378 : vector<32x1xf32> to vector<32x128xf32>
    %380 = arith.subf %374, %379 : vector<32x128xf32>
    %381 = arith.mulf %380, %380 : vector<32x128xf32>
    %cst_231 = arith.constant dense<0.000000e+00> : vector<32xf32>
    %382 = vector.multi_reduction <add>, %381, %cst_231 [1] : vector<32x128xf32> to vector<32xf32>
    %383 = vector.shape_cast %382 : vector<32xf32> to vector<32x1xf32>
    %cst_232 = arith.constant 1.280000e+02 : f32
    %384 = vector.broadcast %cst_232 : f32 to vector<32x1xf32>
    %385 = arith.divf %383, %384 : vector<32x1xf32>
    %386 = vector.broadcast %378 : vector<32x1xf32> to vector<32x128xf32>
    %387 = arith.subf %374, %386 : vector<32x128xf32>
    %cst_233 = arith.constant 9.99999974E-6 : f32
    %388 = vector.broadcast %cst_233 : f32 to vector<32x1xf32>
    %389 = arith.addf %385, %388 : vector<32x1xf32>
    %390 = math.rsqrt %389 : vector<32x1xf32>
    %391 = vector.broadcast %390 : vector<32x1xf32> to vector<32x128xf32>
    %392 = arith.mulf %387, %391 : vector<32x128xf32>
    %c0_234 = arith.constant 0 : index
    %c0_235 = arith.constant 0 : index
    %393 = vector.load %arg8[%c0_234, %c0_235] : memref<1x128xf32, #tpu.memory_space<vmem>>, vector<1x128xf32>
    %394 = vector.broadcast %393 : vector<1x128xf32> to vector<32x128xf32>
    %395 = arith.mulf %392, %394 : vector<32x128xf32>
    %c0_236 = arith.constant 0 : index
    %c0_237 = arith.constant 0 : index
    %396 = vector.load %arg9[%c0_236, %c0_237] : memref<1x128xf32, #tpu.memory_space<vmem>>, vector<1x128xf32>
    %397 = vector.broadcast %396 : vector<1x128xf32> to vector<32x128xf32>
    %398 = arith.addf %395, %397 : vector<32x128xf32>
    %399 = arith.truncf %398 : vector<32x128xf32> to vector<32x128xbf16>
    %c0_238 = arith.constant 0 : index
    %c0_239 = arith.constant 0 : index
    %400 = vector.load %arg10[%c0_238, %c0_239] : memref<128x512xbf16, #tpu.memory_space<vmem>>, vector<128x512xbf16>
    %cst_240 = arith.constant dense<0.000000e+00> : vector<32x512xf32>
    %401 = tpu.matmul %399, %400, %cst_240 {dimension_numbers = #tpu.dot_dimension_numbers<[1], [0], [0], [1], [0, 0, 1, 1], [], []>} : vector<32x128xbf16>, vector<128x512xbf16>, vector<32x512xf32> -> vector<32x512xf32>
    %c0_241 = arith.constant 0 : index
    %c0_242 = arith.constant 0 : index
    %402 = vector.load %arg11[%c0_241, %c0_242] : memref<1x512xf32, #tpu.memory_space<vmem>>, vector<1x512xf32>
    %403 = vector.broadcast %402 : vector<1x512xf32> to vector<32x512xf32>
    %404 = arith.addf %401, %403 : vector<32x512xf32>
    %cst_243 = arith.constant 5.000000e-01 : f32
    %405 = vector.broadcast %cst_243 : f32 to vector<32x512xf32>
    %406 = arith.mulf %405, %404 : vector<32x512xf32>
    %cst_244 = arith.constant 0.707106769 : f32
    %407 = vector.broadcast %cst_244 : f32 to vector<32x512xf32>
    %408 = arith.mulf %404, %407 : vector<32x512xf32>
    %cst_245 = arith.constant 0.000000e+00 : f32
    %409 = vector.broadcast %cst_245 : f32 to vector<32x512xf32>
    %410 = arith.cmpf oge, %408, %409 : vector<32x512xf32>
    %cst_246 = arith.constant 1.000000e+00 : f32
    %cst_247 = arith.constant -1.000000e+00 : f32
    %411 = vector.broadcast %cst_246 : f32 to vector<32x512xf32>
    %412 = vector.broadcast %cst_247 : f32 to vector<32x512xf32>
    %413 = arith.select %410, %411, %412 : vector<32x512xi1>, vector<32x512xf32>
    %414 = math.absf %408 : vector<32x512xf32>
    %cst_248 = arith.constant 0.327591091 : f32
    %415 = vector.broadcast %cst_248 : f32 to vector<32x512xf32>
    %416 = arith.mulf %415, %414 : vector<32x512xf32>
    %cst_249 = arith.constant 1.000000e+00 : f32
    %417 = vector.broadcast %cst_249 : f32 to vector<32x512xf32>
    %418 = arith.addf %417, %416 : vector<32x512xf32>
    %cst_250 = arith.constant 1.000000e+00 : f32
    %419 = vector.broadcast %cst_250 : f32 to vector<32x512xf32>
    %420 = arith.divf %419, %418 : vector<32x512xf32>
    %cst_251 = arith.constant 1.06140542 : f32
    %421 = vector.broadcast %cst_251 : f32 to vector<32x512xf32>
    %422 = arith.mulf %421, %420 : vector<32x512xf32>
    %cst_252 = arith.constant -1.45315206 : f32
    %423 = vector.broadcast %cst_252 : f32 to vector<32x512xf32>
    %424 = arith.addf %422, %423 : vector<32x512xf32>
    %425 = arith.mulf %424, %420 : vector<32x512xf32>
    %cst_253 = arith.constant 1.42141378 : f32
    %426 = vector.broadcast %cst_253 : f32 to vector<32x512xf32>
    %427 = arith.addf %425, %426 : vector<32x512xf32>
    %428 = arith.mulf %427, %420 : vector<32x512xf32>
    %cst_254 = arith.constant -0.284496725 : f32
    %429 = vector.broadcast %cst_254 : f32 to vector<32x512xf32>
    %430 = arith.addf %428, %429 : vector<32x512xf32>
    %431 = arith.mulf %430, %420 : vector<32x512xf32>
    %cst_255 = arith.constant 0.254829586 : f32
    %432 = vector.broadcast %cst_255 : f32 to vector<32x512xf32>
    %433 = arith.addf %431, %432 : vector<32x512xf32>
    %434 = arith.mulf %433, %420 : vector<32x512xf32>
    %cst_256 = arith.constant 0.000000e+00 : f32
    %435 = vector.broadcast %cst_256 : f32 to vector<32x512xf32>
    %436 = arith.subf %435, %414 : vector<32x512xf32>
    %437 = arith.mulf %436, %414 : vector<32x512xf32>
    %438 = math.exp %437 : vector<32x512xf32>
    %439 = arith.mulf %434, %438 : vector<32x512xf32>
    %cst_257 = arith.constant 1.000000e+00 : f32
    %440 = vector.broadcast %cst_257 : f32 to vector<32x512xf32>
    %441 = arith.subf %440, %439 : vector<32x512xf32>
    %442 = arith.mulf %413, %441 : vector<32x512xf32>
    %cst_258 = arith.constant 1.000000e+00 : f32
    %443 = vector.broadcast %cst_258 : f32 to vector<32x512xf32>
    %444 = arith.addf %443, %442 : vector<32x512xf32>
    %445 = arith.mulf %406, %444 : vector<32x512xf32>
    %446 = arith.truncf %445 : vector<32x512xf32> to vector<32x512xbf16>
    %c0_259 = arith.constant 0 : index
    %c0_260 = arith.constant 0 : index
    %447 = vector.load %arg12[%c0_259, %c0_260] : memref<512x128xbf16, #tpu.memory_space<vmem>>, vector<512x128xbf16>
    %cst_261 = arith.constant dense<0.000000e+00> : vector<32x128xf32>
    %448 = tpu.matmul %446, %447, %cst_261 {dimension_numbers = #tpu.dot_dimension_numbers<[1], [0], [0], [1], [0, 0, 1, 1], [], []>} : vector<32x512xbf16>, vector<512x128xbf16>, vector<32x128xf32> -> vector<32x128xf32>
    %c0_262 = arith.constant 0 : index
    %c0_263 = arith.constant 0 : index
    %449 = vector.load %arg13[%c0_262, %c0_263] : memref<1x128xf32, #tpu.memory_space<vmem>>, vector<1x128xf32>
    %450 = vector.broadcast %449 : vector<1x128xf32> to vector<32x128xf32>
    %451 = arith.addf %448, %450 : vector<32x128xf32>
    %452 = arith.addf %17, %451 : vector<32x128xf32>
    %453 = arith.truncf %452 : vector<32x128xf32> to vector<32x128xbf16>
    %c0_264 = arith.constant 0 : index
    %c0_265 = arith.constant 0 : index
    %454 = vector.load %arg14[%c0_264, %c0_265] : memref<128x768xbf16, #tpu.memory_space<vmem>>, vector<128x768xbf16>
    %cst_266 = arith.constant dense<0.000000e+00> : vector<32x768xf32>
    %455 = tpu.matmul %453, %454, %cst_266 {dimension_numbers = #tpu.dot_dimension_numbers<[1], [0], [0], [1], [0, 0, 1, 1], [], []>} : vector<32x128xbf16>, vector<128x768xbf16>, vector<32x768xf32> -> vector<32x768xf32>
    %c0_267 = arith.constant 0 : index
    %c0_268 = arith.constant 0 : index
    %456 = vector.load %arg15[%c0_267, %c0_268] : memref<1x768xf32, #tpu.memory_space<vmem>>, vector<1x768xf32>
    %457 = vector.broadcast %456 : vector<1x768xf32> to vector<32x768xf32>
    %458 = arith.addf %455, %457 : vector<32x768xf32>
    %459 = vector.shape_cast %458 : vector<32x768xf32> to vector<2x16x768xf32>
    %c0_269 = arith.constant 0 : index
    %c0_270 = arith.constant 0 : index
    %c0_271 = arith.constant 0 : index
    %460 = vector.load %arg16[%c0_269, %c0_270, %c0_271] : memref<2x16x768xf32, #tpu.memory_space<vmem>>, vector<2x16x768xf32>
    tpu.vector_store %arg16[%c0_269, %c0_270, %c0_271], %459 {strides = array<i32>} : memref<2x16x768xf32, #tpu.memory_space<vmem>>, vector<2x16x768xf32>,
    return
  }
  func.func @transform_0(%arg0: i32) -> (i32, i32, i32) {
    %c0_i32 = arith.constant 0 : i32
    %c0_i32_0 = arith.constant 0 : i32
    %c0_i32_1 = arith.constant 0 : i32
    return %arg0, %c0_i32, %c0_i32_0 : i32, i32, i32
  }
  func.func @transform_1(%arg0: i32) -> (i32, i32, i32) {
    %c0_i32 = arith.constant 0 : i32
    %c0_i32_0 = arith.constant 0 : i32
    %c0_i32_1 = arith.constant 0 : i32
    return %arg0, %c0_i32, %c0_i32_0 : i32, i32, i32
  }
  func.func @transform_2(%arg0: i32) -> (i32, i32) {
    %c0_i32 = arith.constant 0 : i32
    %c0_i32_0 = arith.constant 0 : i32
    %c0_i32_1 = arith.constant 0 : i32
    return %c0_i32, %c0_i32_0 : i32, i32
  }
  func.func @transform_3(%arg0: i32) -> (i32, i32) {
    %c0_i32 = arith.constant 0 : i32
    %c0_i32_0 = arith.constant 0 : i32
    %c0_i32_1 = arith.constant 0 : i32
    return %c0_i32, %c0_i32_0 : i32, i32
  }
  func.func @transform_4(%arg0: i32) -> (i32, i32) {
    %c0_i32 = arith.constant 0 : i32
    %c0_i32_0 = arith.constant 0 : i32
    %c0_i32_1 = arith.constant 0 : i32
    return %c0_i32, %c0_i32_0 : i32, i32
  }
  func.func @transform_5(%arg0: i32) -> (i32, i32, i32) {
    %c0_i32 = arith.constant 0 : i32
    %c0_i32_0 = arith.constant 0 : i32
    %c0_i32_1 = arith.constant 0 : i32
    %c0_i32_2 = arith.constant 0 : i32
    return %c0_i32, %c0_i32_0, %c0_i32_1 : i32, i32, i32
  }
  func.func @transform_6(%arg0: i32) -> (i32, i32) {
    %c0_i32 = arith.constant 0 : i32
    %c0_i32_0 = arith.constant 0 : i32
    %c0_i32_1 = arith.constant 0 : i32
    return %c0_i32, %c0_i32_0 : i32, i32
  }
  func.func @transform_7(%arg0: i32) -> (i32, i32) {
    %c0_i32 = arith.constant 0 : i32
    %c0_i32_0 = arith.constant 0 : i32
    %c0_i32_1 = arith.constant 0 : i32
    return %c0_i32, %c0_i32_0 : i32, i32
  }
  func.func @transform_8(%arg0: i32) -> (i32, i32) {
    %c0_i32 = arith.constant 0 : i32
    %c0_i32_0 = arith.constant 0 : i32
    %c0_i32_1 = arith.constant 0 : i32
    return %c0_i32, %c0_i32_0 : i32, i32
  }
  func.func @transform_9(%arg0: i32) -> (i32, i32) {
    %c0_i32 = arith.constant 0 : i32
    %c0_i32_0 = arith.constant 0 : i32
    %c0_i32_1 = arith.constant 0 : i32
    return %c0_i32, %c0_i32_0 : i32, i32
  }
  func.func @transform_10(%arg0: i32) -> (i32, i32) {
    %c0_i32 = arith.constant 0 : i32
    %c0_i32_0 = arith.constant 0 : i32
    %c0_i32_1 = arith.constant 0 : i32
    return %c0_i32, %c0_i32_0 : i32, i32
  }
  func.func @transform_11(%arg0: i32) -> (i32, i32) {
    %c0_i32 = arith.constant 0 : i32
    %c0_i32_0 = arith.constant 0 : i32
    %c0_i32_1 = arith.constant 0 : i32
    return %c0_i32, %c0_i32_0 : i32, i32
  }
  func.func @transform_12(%arg0: i32) -> (i32, i32) {
    %c0_i32 = arith.constant 0 : i32
    %c0_i32_0 = arith.constant 0 : i32
    %c0_i32_1 = arith.constant 0 : i32
    return %c0_i32, %c0_i32_0 : i32, i32
  }
  func.func @transform_13(%arg0: i32) -> (i32, i32) {
    %c0_i32 = arith.constant 0 : i32
    %c0_i32_0 = arith.constant 0 : i32
    %c0_i32_1 = arith.constant 0 : i32
    return %c0_i32, %c0_i32_0 : i32, i32
  }
  func.func @transform_14(%arg0: i32) -> (i32, i32) {
    %c0_i32 = arith.constant 0 : i32
    %c0_i32_0 = arith.constant 0 : i32
    %c0_i32_1 = arith.constant 0 : i32
    return %c0_i32, %c0_i32_0 : i32, i32
  }
  func.func @transform_15(%arg0: i32) -> (i32, i32, i32) {
    %c0_i32 = arith.constant 0 : i32
    %c0_i32_0 = arith.constant 0 : i32
    %c0_i32_1 = arith.constant 0 : i32
    return %arg0, %c0_i32, %c0_i32_0 : i32, i32, i32
  }
}

</mosaic_0001>

<bundles_post_ra>
// kernel: tpu_custom_call.1
= control target key start
LH: loop header
LB: loop body
LE: loop exit
PB: predicated region body
PF: predicated region fallthrough
CT: control target
= control target key end

     0   :  { %20 = vsyncpa [#allocation4], 0  ;;  %s6674_s0 = inlined_call_operand.hbm [shape: bf16[2,16,768], index: 0, kind: input, shape index: {}]   ;;  %s6675_s1 = inlined_call_operand.vmem [shape: f32[2,16,1], index: 1, kind: input, shape index: {}]   ;;  %s6676_s2 = inlined_call_operand.hbm [shape: bf16[768,128], index: 2, kind: input, shape index: {}]   ;;  %s6677_s3 = inlined_call_operand.vmem [shape: f32[1,128], index: 3, kind: input, shape index: {}]   ;;  %s6678_s4 = inlined_call_operand.vmem [shape: f32[1,128], index: 4, kind: input, shape index: {}]   ;;  %s6679_s5 = inlined_call_operand.hbm [shape: f32[7,7,128], index: 5, kind: input, shape index: {}]   ;;  %s6680_s6 = inlined_call_operand.vmem [shape: f32[1,128], index: 6, kind: input, shape index: {}]   ;;  %s6681_s7 = inlined_call_operand.vmem [shape: f32[1,128], index: 7, kind: input, shape index: {}]   ;;  %s6682_s8 = inlined_call_operand.vmem [shape: f32[1,128], index: 8, kind: input, shape index: {}]   ;;  %s6683_s9 = inlined_call_operand.hbm [shape: bf16[128,512], index: 9, kind: input, shape index: {}]   ;;  %s6684_s10 = inlined_call_operand.vmem [shape: f32[1,512], index: 10, kind: input, shape index: {}]   ;;  %s6685_s11 = inlined_call_operand.hbm [shape: bf16[512,128], index: 11, kind: input, shape index: {}]   ;;  %s6686_s12 = inlined_call_operand.vmem [shape: f32[1,128], index: 12, kind: input, shape index: {}]   ;;  %s6687_s13 = inlined_call_operand.hbm [shape: bf16[128,768], index: 13, kind: input, shape index: {}]   ;;  %s6688_s14 = inlined_call_operand.vmem [shape: f32[1,768], index: 14, kind: input, shape index: {}]   ;;  %s6689_s15 = inlined_call_operand.hbm [shape: f32[2,16,768], index: 15, kind: output, shape index: {}]  }
   0x1   :  { %21 = vsyncpa [#allocation7], 0 }
   0x2   :  { %22 = vsyncpa [#allocation10], 0 }
   0x3   :  { %23 = vsyncpa [#allocation13], 0 }
   0x4   :  { %24 = vsyncpa [#allocation5], 0  ;;  %s5022_s18 = smov [#allocation6]   ;;  %s4858_s22 = scalar_lea.hbm %s6676_s2, 6144 }
   0x5   :  { %s44_s19 = sshll.u32 %s5022_s18, 4  ;;  %p4859_p0 = scmp.ne.s32.totalorder %s6676_s2, %s4858_s22  ;;  %s45_s19 = int_to_ptr.vmem [resolvable:$true] %s44_s19 }
   0x6   :  { %p4862_p1 = scmp.lt.u32.totalorder %s4858_s22, %s6676_s2 }
   0x8   :  { %p4864_p2 = pnand %p4862_p1, %p4859_p0 }
   0xa   :  { %4867 = shalt.err (!%p4864_p2)
}
   0xb   :  { %s4868_s27 = scalar_lea.vmem %s45_s19, 6144  ;;  %p4873_p4 = scmp.lt.s32.totalorder %s45_s19, %s45_s19 }
   0xc   :  { %p4869_p3 = scmp.ne.s32.totalorder %s45_s19, %s4868_s27  ;;  %p4874_p5 = scmp.lt.s32.totalorder %s4868_s27, %s4868_s27 }
   0xe   :  { %p4875_p6 = por %p4874_p5, %p4873_p4 }
  0x10   :  { %p4876_p7 = pnand %p4875_p6, %p4869_p3 }
  0x12   :  { %4879 = shalt.err (!%p4876_p7)
}
  0x13   :  { %s6690_s28 = smov 64   ;;  %s5024_s29 = smov 4  }
  0x14   :  { %50 = dma.hbm_to_vmem [thread:$0]  %s6676_s2, 6144, %s45_s19, [#allocation7], %s6690_s28, %s6690_s28, %s5024_s29  }
  0x15   :  { %s5025_s17 = smov [#allocation9]   ;;  %s4880_s22 = scalar_lea.hbm %s6683_s9, 4096 }
  0x16   :  { %s78_s18 = sshll.u32 %s5025_s17, 4  ;;  %p4881_p8 = scmp.ne.s32.totalorder %s6683_s9, %s4880_s22  ;;  %s79_s18 = int_to_ptr.vmem [resolvable:$true] %s78_s18 }
  0x17   :  { %p4884_p9 = scmp.lt.u32.totalorder %s4880_s22, %s6683_s9 }
  0x19   :  { %p4886_p10 = pnand %p4884_p9, %p4881_p8 }
  0x1b   :  { %4889 = shalt.err (!%p4886_p10)
}
  0x1c   :  { %s4890_s27 = scalar_lea.vmem %s79_s18, 4096  ;;  %p4895_p12 = scmp.lt.s32.totalorder %s79_s18, %s79_s18 }
  0x1d   :  { %p4891_p11 = scmp.ne.s32.totalorder %s79_s18, %s4890_s27  ;;  %p4896_p13 = scmp.lt.s32.totalorder %s4890_s27, %s4890_s27 }
  0x1f   :  { %p4897_p0 = por %p4896_p13, %p4895_p12 }
  0x21   :  { %p4898_p1 = pnand %p4897_p0, %p4891_p11 }
  0x23   :  { %4901 = shalt.err (!%p4898_p1)
}
  0x24   :  { %s5026_s2 = smov 256   ;;  %s5027_s19 = smov 16  }
  0x25   :  { %84 = dma.hbm_to_vmem [thread:$0]  %s6683_s9, 4096, %s79_s18, [#allocation10], %s5026_s2, %s5026_s2, %s5027_s19  }
  0x26   :  { %s5028_s17 = smov [#allocation3]   ;;  %s4902_s23 = scalar_lea.hbm %s6674_s0, 1536 }
  0x27   :  { %s30_s20 = sshll.u32 %s5028_s17, 4  ;;  %p4903_p2 = scmp.ne.s32.totalorder %s6674_s0, %s4902_s23  ;;  %s31_s20 = int_to_ptr.vmem [resolvable:$true] %s30_s20 }
  0x28   :  { %p4906_p3 = scmp.lt.u32.totalorder %s4902_s23, %s6674_s0 }
  0x2a   :  { %p4908_p4 = pnand %p4906_p3, %p4903_p2 }
  0x2c   :  { %4911 = shalt.err (!%p4908_p4)
}
  0x2d   :  { %s4912_s28 = scalar_lea.vmem %s31_s20, 1536  ;;  %p4917_p6 = scmp.lt.s32.totalorder %s31_s20, %s31_s20 }
  0x2e   :  { %p4913_p5 = scmp.ne.s32.totalorder %s31_s20, %s4912_s28  ;;  %p4918_p7 = scmp.lt.s32.totalorder %s4912_s28, %s4912_s28 }
  0x30   :  { %p4919_p8 = por %p4918_p7, %p4917_p6 }
  0x32   :  { %p4920_p9 = pnand %p4919_p8, %p4913_p5 }
  0x34   :  { %4923 = shalt.err (!%p4920_p9)
}
  0x35   :  { %s6691_s9 = smov 384   ;;  %s5030_s18 = smov 24  }
  0x36   :  { %36 = dma.hbm_to_vmem [thread:$0]  %s6674_s0, 1536, %s31_s20, [#allocation4], %s6691_s9, %s6691_s9, %s5030_s18  }
  0x37   :  { %s5031_s30 = smov [#allocation8]   ;;  %s4924_s22 = scalar_lea.hbm %s6679_s5, 896 }
  0x38   :  { %s60_s16 = sshll.u32 %s5031_s30, 4  ;;  %p4925_p10 = scmp.ne.s32.totalorder %s6679_s5, %s4924_s22  ;;  %s61_s16 = int_to_ptr.vmem [resolvable:$true] %s60_s16 }
  0x39   :  { %p4928_p11 = scmp.lt.u32.totalorder %s4924_s22, %s6679_s5 }
  0x3b   :  { %p4930_p12 = pnand %p4928_p11, %p4925_p10 }
  0x3d   :  { %4933 = shalt.err (!%p4930_p12)
}
  0x3e   :  { %s4934_s26 = scalar_lea.vmem %s61_s16, 896  ;;  %p4939_p0 = scmp.lt.s32.totalorder %s61_s16, %s61_s16 }
  0x3f   :  { %p4935_p13 = scmp.ne.s32.totalorder %s61_s16, %s4934_s26  ;;  %p4940_p1 = scmp.lt.s32.totalorder %s4934_s26, %s4934_s26 }
  0x41   :  { %p4941_p2 = por %p4940_p1, %p4939_p0 }
  0x43   :  { %p4942_p3 = pnand %p4941_p2, %p4935_p13 }
  0x45   :  { %4945 = shalt.err (!%p4942_p3)
}
  0x46   :  { %s5032_s0 = smov 128   ;;  %s5033_s20 = smov 8  }
  0x47   :  { %66 = dma.hbm_to_vmem [thread:$0]  %s6679_s5, 896, %s61_s16, [#allocation7], %s5032_s0, %s5032_s0, %s5033_s20  }
  0x48   :  { %s5034_s19 = smov [#allocation11]   ;;  %s5035_s17 = smov [#allocation12]  }
  0x49   :  { %s92_s30 = sshll.u32 %s5034_s19, 4  ;;  %s106_s21 = sshll.u32 %s5035_s17, 4  ;;  %s93_s30 = int_to_ptr.vmem [resolvable:$true] %s92_s30  ;;  %s5178_s21 = int_to_ptr.vmem [resolvable:$true] %s106_s21 }
  0x4a   :  { %s4946_s23 = scalar_lea.hbm %s6685_s11, 4096 }
  0x4b   :  { %p4947_p4 = scmp.ne.s32.totalorder %s6685_s11, %s4946_s23  ;;  %p4950_p5 = scmp.lt.u32.totalorder %s4946_s23, %s6685_s11 }
  0x4d   :  { %p4952_p6 = pnand %p4950_p5, %p4947_p4 }
  0x4f   :  { %4955 = shalt.err (!%p4952_p6)
}
  0x50   :  { %s4956_s5 = scalar_lea.vmem %s93_s30, 4096  ;;  %p4961_p8 = scmp.lt.s32.totalorder %s93_s30, %s93_s30 }
  0x51   :  { %p4957_p7 = scmp.ne.s32.totalorder %s93_s30, %s4956_s5  ;;  %p4962_p9 = scmp.lt.s32.totalorder %s4956_s5, %s4956_s5 }
  0x53   :  { %p4963_p10 = por %p4962_p9, %p4961_p8 }
  0x55   :  { %p4964_p11 = pnand %p4963_p10, %p4957_p7 }
  0x57   :  { %4967 = shalt.err (!%p4964_p11)
}
  0x58   :  { %s6757_s16 = smov 64   ;;  %s4968_s9 = scalar_lea.hbm %s6687_s13, 6144 }
  0x59   :  { %98 = dma.hbm_to_vmem [thread:$0]  %s6685_s11, 4096, %s93_s30, [#allocation10], %s6757_s16, %s6757_s16, %s5024_s29  }
  0x5a   :  { %p4969_p12 = scmp.ne.s32.totalorder %s6687_s13, %s4968_s9  ;;  %p4972_p13 = scmp.lt.u32.totalorder %s4968_s9, %s6687_s13 }
  0x5c   :  { %p4974_p0 = pnand %p4972_p13, %p4969_p12 }
  0x5e   :  { %4977 = shalt.err (!%p4974_p0)
}
  0x5f   :  { %s4978_s23 = scalar_lea.vmem %s5178_s21, 6144  ;;  %p4983_p2 = scmp.lt.s32.totalorder %s5178_s21, %s5178_s21 }
  0x60   :  { %p4979_p1 = scmp.ne.s32.totalorder %s5178_s21, %s4978_s23  ;;  %p4984_p3 = scmp.lt.s32.totalorder %s4978_s23, %s4978_s23 }
  0x62   :  { %p4985_p4 = por %p4984_p3, %p4983_p2 }
  0x64   :  { %p4986_p5 = pnand %p4985_p4, %p4979_p1 }
  0x66   :  { %4989 = shalt.err (!%p4986_p5)
}
  0x67   :  { %s6758_s11 = smov 384  }
  0x68   :  { %112 = dma.hbm_to_vmem [thread:$0]  %s6687_s13, 6144, %s5178_s21, [#allocation13], %s6758_s11, %s6758_s11, %s5030_s18  }
  0x69   :  { %5012 = dma.done.wait [#allocation4], 1536  }
  0x6a   :  { %5013 = vsyncadd [#allocation4], 4294965760 }
  0x6b   :  { %5014 = dma.done.wait [#allocation7], 7040  }
  0x6c   :  { %5015 = vsyncadd [#allocation7], 4294960256 }
  0x6d   :  { %5016 = dma.done.wait [#allocation10], 8192  }
  0x6e   :  { %5017 = vsyncadd [#allocation10], 4294959104 }
  0x6f   :  { %5018 = dma.done.wait [#allocation13], 6144  }
  0x70   :  { %5019 = vsyncadd [#allocation13], 4294961152  ;;  %v6692_v0 = vmov 0   ;;  %v4567_v1 = vld [vmem:[#allocation6 + $0x40] sm:$0xff]   ;;  %v4571_v5 = vld [vmem:[#allocation6 + $0x48] sm:$0xff]  }
  0x71   :  { %4565 = vset.pattern.permute.xlu0 %v6692_v0  ;;  %4566 = vset.pattern.permute.xlu1 %v6692_v0  ;;  %v4568_v2 = vld [vmem:[#allocation6] sm:$0xff]   ;;  %v4572_v6 = vld [vmem:[#allocation6 + $0x8] sm:$0xff]   ;;  %v4575_v9 = vld [vmem:[#allocation6 + $0x50] sm:$0xff]  }
  0x72   :  { %4403 = vmatprep.subr.bf16.mxu0 %v4567_v1  ;;  %v4569_v3 = vld [vmem:[#allocation6 + $0xc0] sm:$0xff]   ;;  %v4573_v7 = vld [vmem:[#allocation6 + $0xc8] sm:$0xff]   ;;  %v4576_v10 = vld [vmem:[#allocation6 + $0x10] sm:$0xff]  }
  0x73   :  { %4404 = vmatpush3.bf16.msra.mxu0 %v4568_v2  ;;  %v4570_v4 = vld [vmem:[#allocation6 + $0x80] sm:$0xff]   ;;  %4431 = vmatprep.subr.bf16.mxu1 %v4569_v3  ;;  %v4574_v8 = vld [vmem:[#allocation6 + $0x88] sm:$0xff]   ;;  %v4577_v11 = vld [vmem:[#allocation6 + $0xd0] sm:$0xff]  }
  0x74   :  { %4432 = vmatpush3.bf16.msra.mxu1 %v4570_v4  ;;  %4405 = vmatprep.subr.bf16.mxu0 %v4571_v5  ;;  %v4578_v12 = vld [vmem:[#allocation6 + $0x90] sm:$0xff]   ;;  %v4579_v13 = vld [vmem:[#allocation6 + $0x58] sm:$0xff]   ;;  %v4583_v17 = vld [vmem:[#allocation6 + $0x60] sm:$0xff]  }
  0x75   :  { %4433 = vmatprep.subr.bf16.mxu1 %v4573_v7  ;;  %v4580_v14 = vld [vmem:[#allocation6 + $0x18] sm:$0xff]   ;;  %v4584_v18 = vld [vmem:[#allocation6 + $0x20] sm:$0xff]   ;;  %v4587_v21 = vld [vmem:[#allocation6 + $0x68] sm:$0xff]   ;;  %v912_v7 = vlaneseq }
  0x76   :  { %v4581_v15 = vld [vmem:[#allocation6 + $0xd8] sm:$0xff]   ;;  %v4585_v19 = vld [vmem:[#allocation6 + $0xe0] sm:$0xff]   ;;  %v4588_v22 = vld [vmem:[#allocation6 + $0x28] sm:$0xff]  }
  0x77   :  { %4406 = vmatpush3.bf16.msra.mxu0 %v4572_v6  ;;  %v4582_v16 = vld [vmem:[#allocation6 + $0x98] sm:$0xff]   ;;  %v4586_v20 = vld [vmem:[#allocation6 + $0xa0] sm:$0xff]   ;;  %v4589_v23 = vld [vmem:[#allocation6 + $0xe8] sm:$0xff]   ;;  %v5037_v6 = vmov 0.0  }
  0x78   :  { %4434 = vmatpush3.bf16.msra.mxu1 %v4574_v8  ;;  %4407 = vmatprep.subr.bf16.mxu0 %v4575_v9  ;;  %v4590_v24 = vld [vmem:[#allocation6 + $0xa8] sm:$0xff]   ;;  %v4591_v25 = vld [vmem:[#allocation6 + $0x70] sm:$0xff]   ;;  %v4595_v29 = vld [vmem:[#allocation6 + $0x78] sm:$0xff]   ;;  %823 = vst [vmem:[#allocation2] sm:$0xff] %v5037_v6  ;;  %v5295_v8 = vshrl.u32 %v912_v7, 7 }
  0x79   :  { %4435 = vmatprep.subr.bf16.mxu1 %v4577_v11  ;;  %v4592_v26 = vld [vmem:[#allocation6 + $0x30] sm:$0xff]   ;;  %v4596_v30 = vld [vmem:[#allocation6 + $0x38] sm:$0xff]   ;;  %v4602_v35 = vld [vmem:[#allocation6 + $0x140] sm:$0xff]   ;;  %824 = vst [vmem:[#allocation2 + $0x8] sm:$0x3] %v5037_v6 }
  0x7a   :  { %v4593_v27 = vld [vmem:[#allocation6 + $0xf0] sm:$0xff]   ;;  %v4597_v31 = vld [vmem:[#allocation6 + $0xf8] sm:$0xff]   ;;  %v4603_v36 = vld [vmem:[#allocation3 + $0x8] ss:$24 sps:$4 sm:$0xff]   ;;  %825 = vst [vmem:[#allocation2 + $0x10] sm:$0xff] %v5037_v6  ;;  %v5298_v9 = vsub.s32 0, %v5295_v8 }
  0x7b   :  { %4408 = vmatpush3.bf16.msra.mxu0 %v4576_v10  ;;  %v4594_v28 = vld [vmem:[#allocation6 + $0xb0] sm:$0xff]   ;;  %v4598_v32 = vld [vmem:[#allocation3] ss:$24 sps:$4 sm:$0xff]   ;;  %v4600_v33 = vld [vmem:[#allocation3 + $0x4] ss:$24 sps:$4 sm:$0xff]   ;;  %827 = vst [vmem:[#allocation2 + $0x20] sm:$0xff] %v5037_v6 }
  0x7c   :  { %4436 = vmatpush3.bf16.msra.mxu1 %v4578_v12  ;;  %4409 = vmatprep.subr.bf16.mxu0 %v4579_v13  ;;  %v4601_v34 = vld [vmem:[#allocation6 + $0xb8] sm:$0xff]   ;;  %v4605_v37 = vld [vmem:[#allocation3 + $0xc] ss:$24 sps:$4 sm:$0xff]   ;;  %v4609_v41 = vld [vmem:[#allocation6 + $0x150] sm:$0xff]   ;;  %826 = vst [vmem:[#allocation2 + $0x18] sm:$0x3] %v5037_v6 }
  0x7d   :  { %4437 = vmatprep.subr.bf16.mxu1 %v4581_v15  ;;  %629 = vmatprep.mubr.bf16.mxu0 %v4600_v33  ;;  %v4606_v38 = vld [vmem:[#allocation6 + $0x100] sm:$0xff]   ;;  %v4607_v39 = vld [vmem:[#allocation6 + $0x148] sm:$0xff]   ;;  %v4610_v42 = vld [vmem:[#allocation6 + $0x110] sm:$0xff]   ;;  %828 = vst [vmem:[#allocation2 + $0x28] sm:$0x3] %v5037_v6  ;;  %v5301_v10 = vsub.s32 1, %v5295_v8 }
  0x7e   :  { %678 = vmatprep.mubr.bf16.mxu1 %v4605_v37  ;;  %v4608_v40 = vld [vmem:[#allocation6 + $0x108] sm:$0xff]   ;;  %v4611_v43 = vld [vmem:[#allocation6 + $0x158] sm:$0xff]   ;;  %v4613_v47 = vld [vmem:[#allocation6 + $0x160] sm:$0xff]   ;;  %851 = vst [vmem:[#allocation2 + $0x30] sm:$0x7] %v5037_v6  ;;  %v5304_v12 = vsub.s32 2, %v5295_v8 }
  0x7f   :  { %4410 = vmatpush3.bf16.msra.mxu0 %v4580_v14  ;;  %v4615_v44 = vld [vmem:[#allocation3 + $0x34] ss:$24 sps:$4 sm:$0xff]   ;;  %v4612_v45 = vld [vmem:[#allocation6 + $0x118] sm:$0xff]   ;;  %v4618_v46 = vld [vmem:[#allocation3 + $0x30] ss:$24 sps:$4 sm:$0xff]   ;;  %829 = vst [vmem:[#allocation2 + $0xa0] sm:$0xff] %v5037_v6 }
  0x80   :  { %4438 = vmatpush3.bf16.msra.mxu1 %v4582_v16  ;;  %4411 = vmatprep.subr.bf16.mxu0 %v4583_v17  ;;  %v4620_v48 = vld [vmem:[#allocation3 + $0x3c] ss:$24 sps:$4 sm:$0xff]   ;;  %v4622_v49 = vld [vmem:[#allocation3 + $0x38] ss:$24 sps:$4 sm:$0xff]   ;;  %v4614_v50 = vld [vmem:[#allocation6 + $0x120] sm:$0xff]   ;;  %831 = vst [vmem:[#allocation2 + $0xb0] sm:$0xff] %v5037_v6 }
  0x81   :  { %4439 = vmatprep.subr.bf16.mxu1 %v4585_v19  ;;  %v4617_v51 = vld [vmem:[#allocation6 + $0x168] sm:$0xff]   ;;  %v4623_v54 = vld [vmem:[#allocation6 + $0x170] sm:$0xff]   ;;  %v744_v56 = vld [vmem:[%s6675_s1] sm:$0xff]  ;;  %852 = vst [vmem:[#allocation2 + $0x40] sm:$0x7] %v5037_v6  ;;  %v5313_v15 = vsub.s32 3, %v5295_v8 }
  0x82   :  { %v4619_v52 = vld [vmem:[#allocation6 + $0x128] sm:$0xff]   ;;  %v4624_v55 = vld [vmem:[#allocation6 + $0x130] sm:$0xff]   ;;  %v4625_v58 = vld [vmem:[#allocation6 + $0x178] sm:$0xff]   ;;  %v748_v59 = vsub.f32 1.0, %v744_v56  ;;  %871 = vst [vmem:[#allocation2 + $0x37] sm:$0x7] %v5037_v6 }
  0x83   :  { %4412 = vmatpush3.bf16.msra.mxu0 %v4584_v18  ;;  %v4629_v53 = vld [vmem:[#allocation3 + $0x14] ss:$24 sps:$4 sm:$0xff]   ;;  %v4626_v62 = vld [vmem:[#allocation6 + $0x138] sm:$0xff]   ;;  %v4627_v1 = vld [vmem:[#allocation3 + $0x10] ss:$24 sps:$4 sm:$0xff]   ;;  %833 = vst [vmem:[#allocation2 + $0xc0] sm:$0xff] %v5037_v6 }
  0x84   :  { %4440 = vmatpush3.bf16.msra.mxu1 %v4586_v20  ;;  %4413 = vmatprep.subr.bf16.mxu0 %v4587_v21  ;;  %v746_v57 = vld [vmem:[%s6675_s1 + $0x10] sm:$0xff]  ;;  %v745_v61 = vld [vmem:[%s6675_s1 + $0x8] sm:$0xff]  ;;  %v747_v63 = vld [vmem:[%s6675_s1 + $0x18] sm:$0xff]  ;;  %872 = vst [vmem:[#allocation2 + $0x47] sm:$0x7] %v5037_v6  ;;  %v5319_v19 = vsub.s32 4, %v5295_v8 }
  0x85   :  { %4441 = vmatprep.subr.bf16.mxu1 %v4589_v23  ;;  %795 = vperm.xlu1 %4566, %v746_v57   ;;  %v750_v60 = vsub.f32 1.0, %v746_v57  ;;  %v749_v2 = vsub.f32 1.0, %v745_v61  ;;  %v4630_v3 = vld [vmem:[#allocation3 + $0x44] ss:$24 sps:$4 sm:$0xff]   ;;  %v751_v4 = vsub.f32 1.0, %v747_v63  ;;  %836 = vst [vmem:[#allocation2 + $0x70] sm:$0xff] %v5037_v6 }
  0x86   :  { %754 = vperm.xlu0 %4565, %v748_v59   ;;  %v4632_v5 = vld [vmem:[#allocation3 + $0x40] ss:$24 sps:$4 sm:$0xff]   ;;  %830 = vst [vmem:[#allocation2 + $0xa8] sm:$0x3] %v5037_v6  ;;  %832 = vst [vmem:[#allocation2 + $0xb8] sm:$0x3] %v5037_v6 }
  0x87   :  { %4414 = vmatpush3.bf16.msra.mxu0 %v4588_v22  ;;  %834 = vst [vmem:[#allocation2 + $0xc8] sm:$0x3] %v5037_v6  ;;  %837 = vst [vmem:[#allocation2 + $0x78] sm:$0x3] %v5037_v6  ;;  %v897_v11 = vld [vmem:[#allocation8] sm:$0x7f] }
  0x88   :  { %4442 = vmatpush3.bf16.msra.mxu1 %v4590_v24  ;;  %4415 = vmatprep.subr.bf16.mxu0 %v4591_v25  ;;  %838 = vst [vmem:[#allocation2 + $0x80] sm:$0xff] %v5037_v6  ;;  %839 = vst [vmem:[#allocation2 + $0x88] sm:$0x3] %v5037_v6  ;;  %v5307_v13 = vrot.slane %v897_v11, %v5298_v9  ;;  %v5310_v14 = vrot.slane %v897_v11, %v5301_v10  ;;  %v5327_v24 = vsub.s32 5, %v5295_v8 }
  0x89   :  { %4443 = vmatprep.subr.bf16.mxu1 %v4593_v27  ;;  %764 = vperm.xlu1 %4566, %v750_v60   ;;  %840 = vst [vmem:[#allocation2 + $0x90] sm:$0xff] %v5037_v6  ;;  %841 = vst [vmem:[#allocation2 + $0x98] sm:$0x3] %v5037_v6  ;;  %v5316_v18 = vrot.slane %v897_v11, %v5304_v12  ;;  %v5324_v23 = vrot.slane %v897_v11, %v5313_v15 }
  0x8a   :  { %785 = vperm.xlu0 %4565, %v744_v56   ;;  %842 = vst [vmem:[#allocation2 + $0x110] sm:$0xff] %v5037_v6  ;;  %843 = vst [vmem:[#allocation2 + $0x118] sm:$0x3] %v5037_v6  ;;  %v994_v27 = vld [vmem:[#allocation2 + $0xc3] sm:$0xf] }
  0x8b   :  { %4416 = vmatpush3.bf16.msra.mxu0 %v4592_v26  ;;  %844 = vst [vmem:[#allocation2 + $0x120] sm:$0xff] %v5037_v6  ;;  %845 = vst [vmem:[#allocation2 + $0x128] sm:$0x3] %v5037_v6 }
  0x8c   :  { %4444 = vmatpush3.bf16.msra.mxu1 %v4594_v28  ;;  %4417 = vmatprep.subr.bf16.mxu0 %v4595_v29  ;;  %846 = vst [vmem:[#allocation2 + $0x130] sm:$0xff] %v5037_v6  ;;  %847 = vst [vmem:[#allocation2 + $0x138] sm:$0x3] %v5037_v6  ;;  %v5331_v28 = vrot.slane %v897_v11, %v5319_v19  ;;  %v5334_v29 = vsub.s32 6, %v5295_v8 }
  0x8d   :  { %4445 = vmatprep.subr.bf16.mxu1 %v4597_v31  ;;  %790 = vperm.xlu1 %4566, %v745_v61   ;;  %853 = vst [vmem:[#allocation2 + $0x50] sm:$0x7] %v5037_v6  ;;  %854 = vst [vmem:[#allocation2 + $0x60] sm:$0x7] %v5037_v6  ;;  %v1006_v31 = vmul.f32 %v5324_v23, %v994_v27 }
  0x8e   :  { %759 = vperm.xlu0 %4565, %v749_v2   ;;  %861 = vst [vmem:[#allocation2 + $0xd0] sm:$0x7] %v5037_v6  ;;  %862 = vst [vmem:[#allocation2 + $0xe0] sm:$0x7] %v5037_v6 }
  0x8f   :  { %4418 = vmatpush3.bf16.msra.mxu0 %v4596_v30  ;;  %863 = vst [vmem:[#allocation2 + $0xf0] sm:$0x7] %v5037_v6  ;;  %864 = vst [vmem:[#allocation2 + $0x100] sm:$0x7] %v5037_v6 }
  0x90   :  { %4446 = vmatpush3.bf16.msra.mxu1 %v4601_v34  ;;  %4459 = vmatprep.subr.bf16.mxu0 %v4602_v35  ;;  %873 = vst [vmem:[#allocation2 + $0x57] sm:$0x7] %v5037_v6  ;;  %874 = vst [vmem:[#allocation2 + $0x67] sm:$0x7] %v5037_v6  ;;  %v5338_v35 = vrot.slane %v897_v11, %v5327_v24 }
  0x91   :  { %800 = vperm.xlu1 %4566, %v747_v63   ;;  %881 = vst [vmem:[#allocation2 + $0xd7] sm:$0x7] %v5037_v6  ;;  %882 = vst [vmem:[#allocation2 + $0xe7] sm:$0x7] %v5037_v6 }
  0x92   :  { %630 = vmatmul.mubr.bf16.vlgmr.msra.gmra.mrb[0].mxu0 %v4598_v32  ;;  %769 = vperm.xlu0 %4565, %v751_v4   ;;  %883 = vst [vmem:[#allocation2 + $0xf7] sm:$0x7] %v5037_v6  ;;  %884 = vst [vmem:[#allocation2 + $0x107] sm:$0x7] %v5037_v6 }
  0x93   :  { %4460 = vmatpush3.bf16.msra.mxu0 %v4606_v38  ;;  %679 = vmatmul.mubr.bf16.vlgmr.msra.gmra.mrb[0].mxu1 %v4603_v36  ;;  %848 = vst [vmem:[#allocation2] sm:$0x7] %v5037_v6  ;;  %849 = vst [vmem:[#allocation2 + $0x10] sm:$0x7] %v5037_v6 }
  0x94   :  { %4461 = vmatprep.subr.bf16.mxu0 %v4607_v39  ;;  %637 = vmatprep.mubr.bf16.mxu0 %v4615_v44  ;;  %850 = vst [vmem:[#allocation2 + $0x20] sm:$0x7] %v5037_v6  ;;  %868 = vst [vmem:[#allocation2 + $0x7] sm:$0x7] %v5037_v6  ;;  %v5342_v39 = vrot.slane %v897_v11, %v5334_v29  ;;  %v5358_v11 = vld [vmem:[#allocation8 + $0x8] sm:$0x7f] }
  0x95   :  { %686 = vmatprep.mubr.bf16.mxu1 %v4620_v48  ;;  %869 = vst [vmem:[#allocation2 + $0x17] sm:$0x7] %v5037_v6  ;;  %870 = vst [vmem:[#allocation2 + $0x27] sm:$0x7] %v5037_v6 }
  0x96   :  { %855 = vst [vmem:[#allocation2 + $0x70] sm:$0x7] %v5037_v6  ;;  %856 = vst [vmem:[#allocation2 + $0x80] sm:$0x7] %v5037_v6 }
  0x97   :  { %4462 = vmatpush3.bf16.msra.mxu0 %v4608_v40  ;;  %857 = vst [vmem:[#allocation2 + $0x90] sm:$0x7] %v5037_v6  ;;  %858 = vst [vmem:[#allocation2 + $0xa0] sm:$0x7] %v5037_v6 }
  0x98   :  { %4463 = vmatprep.subr.bf16.mxu0 %v4609_v41  ;;  %859 = vst [vmem:[#allocation2 + $0xb0] sm:$0x7] %v5037_v6  ;;  %860 = vst [vmem:[#allocation2 + $0xc0] sm:$0x7] %v5037_v6 }
  0x99   :  { %865 = vst [vmem:[#allocation2 + $0x110] sm:$0x7] %v5037_v6  ;;  %866 = vst [vmem:[#allocation2 + $0x120] sm:$0x7] %v5037_v6 }
  0x9a   :  { %638 = vmatmul.mubr.bf16.gmra.mrb[4].mxu0 %v4618_v46  ;;  %867 = vst [vmem:[#allocation2 + $0x130] sm:$0x7] %v5037_v6  ;;  %875 = vst [vmem:[#allocation2 + $0x77] sm:$0x7] %v5037_v6  ;;  %v904_v33 = vld [vmem:[#allocation2] sm:$0xf] }
  0x9b   :  { %4464 = vmatpush3.bf16.msra.mxu0 %v4610_v42  ;;  %687 = vmatmul.mubr.bf16.gmra.mrb[4].mxu1 %v4622_v49  ;;  %876 = vst [vmem:[#allocation2 + $0x87] sm:$0x7] %v5037_v6  ;;  %877 = vst [vmem:[#allocation2 + $0x97] sm:$0x7] %v5037_v6  ;;  %v932_v34 = vld [vmem:[#allocation2 + $0x1] sm:$0xf]  ;;  %v916_v42 = vmul.f32 %v5307_v13, %v904_v33 }
  0x9c   :  { %4465 = vmatprep.subr.bf16.mxu0 %v4611_v43  ;;  %2821 = vmatprep.mubr.bf16.mxu1 %v6692_v0  ;;  %878 = vst [vmem:[#allocation2 + $0xa7] sm:$0x7] %v5037_v6  ;;  %879 = vst [vmem:[#allocation2 + $0xb7] sm:$0x7] %v5037_v6  ;;  %v944_v43 = vmul.f32 %v5310_v14, %v932_v34  ;;  %v1016_v59 = vld [vmem:[#allocation2 + $0x4] sm:$0xf] }
  0x9d   :  { %727 = vmatprep.mubr.bf16.mxu0 %v4629_v53  ;;  %880 = vst [vmem:[#allocation2 + $0xc7] sm:$0x7] %v5037_v6  ;;  %885 = vst [vmem:[#allocation2 + $0x117] sm:$0x7] %v5037_v6  ;;  %v988_v53 = vld [vmem:[#allocation2 + $0x3] sm:$0xf]  ;;  %v1028_v63 = vmul.f32 %v5331_v28, %v1016_v59 }
  0x9e   :  { %886 = vst [vmem:[#allocation2 + $0x127] sm:$0x7] %v5037_v6  ;;  %887 = vst [vmem:[#allocation2 + $0x137] sm:$0x7] %v5037_v6  ;;  %v952_v49 = vadd.f32 %v944_v43, %v916_v42  ;;  %v1000_v57 = vmul.f32 %v5324_v23, %v988_v53  ;;  %v1044_v2 = vld [vmem:[#allocation2 + $0x5] sm:$0xf] }
  0x9f   :  { %4466 = vmatpush3.bf16.msra.mxu0 %v4612_v45  ;;  %6759 = vst [vmem:[#allocation20_spill] sm:$0xff] %v5295_v8  ;;  %6760 = vst [vmem:[#allocation21_spill] sm:$0xff] %v5298_v9  ;;  %v910_v16 = vld [vmem:[#allocation2 + $0xc0] sm:$0xf]  ;;  %v1056_v6 = vmul.f32 %v5338_v35, %v1044_v2  ;;  %v1101_v27 = vld [vmem:[#allocation2 + $0x10] sm:$0xf] }
  0xa0   :  { %4467 = vmatprep.subr.bf16.mxu0 %v4613_v47  ;;  %6761 = vst [vmem:[#allocation22_spill] sm:$0xff] %v5301_v10  ;;  %6762 = vst [vmem:[#allocation23_spill] sm:$0xff] %v5304_v12  ;;  %v938_v17 = vld [vmem:[#allocation2 + $0xc1] sm:$0xf]  ;;  %v922_v20 = vmul.f32 %v5307_v13, %v910_v16  ;;  %v1072_v16 = vld [vmem:[#allocation2 + $0x6] sm:$0xf] }
  0xa1   :  { %6763 = vst [vmem:[#allocation24_spill] sm:$0xff] %v5313_v15  ;;  %6764 = vst [vmem:[#allocation25_spill] sm:$0xff] %v5319_v19  ;;  %v950_v21 = vmul.f32 %v5310_v14, %v938_v17  ;;  %v966_v22 = vld [vmem:[#allocation2 + $0xc2] sm:$0xf]  ;;  %v1129_v42 = vld [vmem:[#allocation2 + $0x11] sm:$0xf] }
  0xa2   :  { %6765 = vst [vmem:[#allocation26_spill] sm:$0xff] %v5327_v24  ;;  %v978_v26 = vmul.f32 %v5316_v18, %v966_v22  ;;  %v960_v45 = vld [vmem:[#allocation2 + $0x2] sm:$0xf]  ;;  %v1084_v22 = vmul.f32 %v5342_v39, %v1072_v16  ;;  %v961_v43 = vld [vmem:[#allocation2 + $0x12] sm:$0xf] }
  0xa3   :  { %4468 = vmatpush3.bf16.msra.mxu0 %v4614_v50  ;;  %v958_v25 = vadd.f32 %v950_v21, %v922_v20  ;;  %v972_v50 = vmul.f32 %v5316_v18, %v960_v45  ;;  %v1020_v7 = vld [vmem:[#allocation2 + $0xa4] sm:$0xf]  ;;  %v1157_v53 = vld [vmem:[#allocation2 + $0x12] sm:$0xf] }
  0xa4   :  { %4469 = vmatprep.subr.bf16.mxu0 %v4617_v51  ;;  %v1022_v32 = vld [vmem:[#allocation2 + $0xc4] sm:$0xf]  ;;  %v908_v51 = vld [vmem:[#allocation2 + $0xa0] sm:$0xf]  ;;  %v1032_v20 = vmul.f32 %v5331_v28, %v1020_v7  ;;  %v1185_v2 = vld [vmem:[#allocation2 + $0x13] sm:$0xf] }
  0xa5   :  { %v986_v30 = vadd.f32 %v978_v26, %v958_v25  ;;  %v1034_v37 = vmul.f32 %v5331_v28, %v1022_v32  ;;  %v1050_v38 = vld [vmem:[#allocation2 + $0xc5] sm:$0xf]  ;;  %v980_v56 = vadd.f32 %v972_v50, %v952_v49  ;;  %v5364_v25 = vrot.slane %v5358_v11, %v5298_v9  ;;  %v1105_v50 = vld [vmem:[#allocation2 + $0xb0] sm:$0xf] }
  0xa6   :  { %v1062_v41 = vmul.f32 %v5338_v35, %v1050_v38  ;;  %v1078_v44 = vld [vmem:[#allocation2 + $0xc6] sm:$0xf]  ;;  %v5378_v49 = vrot.slane %v5358_v11, %v5304_v12 }
  0xa7   :  { %4470 = vmatpush3.bf16.msra.mxu0 %v4619_v52  ;;  %v1014_v36 = vadd.f32 %v1006_v31, %v986_v30  ;;  %v1090_v47 = vmul.f32 %v5342_v39, %v1078_v44  ;;  %v936_v52 = vld [vmem:[#allocation2 + $0xa1] sm:$0xf]  ;;  %v1048_v26 = vld [vmem:[#allocation2 + $0xa5] sm:$0xf]  ;;  %v905_v30 = vld [vmem:[#allocation2 + $0x10] sm:$0xf] }
  0xa8   :  { %4471 = vmatprep.subr.bf16.mxu0 %v4623_v54  ;;  %v920_v54 = vmul.f32 %v5307_v13, %v908_v51  ;;  %v933_v31 = vld [vmem:[#allocation2 + $0x11] sm:$0xf]  ;;  %v1060_v33 = vmul.f32 %v5338_v35, %v1048_v26  ;;  %v1076_v38 = vld [vmem:[#allocation2 + $0xa6] sm:$0xf] }
  0xa9   :  { %v1042_v40 = vadd.f32 %v1034_v37, %v1014_v36  ;;  %v1113_v36 = vmul.f32 %v5364_v25, %v1101_v27  ;;  %v5370_v37 = vrot.slane %v5358_v11, %v5301_v10  ;;  %v1088_v45 = vmul.f32 %v5342_v39, %v1076_v38 }
  0xab   :  { %4472 = vmatpush3.bf16.msra.mxu0 %v4624_v55  ;;  %v1070_v46 = vadd.f32 %v1062_v41, %v1042_v40  ;;  %v948_v55 = vmul.f32 %v5310_v14, %v936_v52  ;;  %v917_v40 = vmul.f32 %v5307_v13, %v905_v30  ;;  %v945_v41 = vmul.f32 %v5310_v14, %v933_v31  ;;  %v1213_v30 = vld [vmem:[#allocation2 + $0x14] sm:$0xf] }
  0xac   :  { %4473 = vmatprep.subr.bf16.mxu0 %v4625_v58  ;;  %v964_v58 = vld [vmem:[#allocation2 + $0xa2] sm:$0xf]  ;;  %v973_v52 = vmul.f32 %v5316_v18, %v961_v43  ;;  %v1045_v31 = vld [vmem:[#allocation2 + $0x15] sm:$0xf] }
  0xad   :  { %v5348_v48 = vadd.f32 %v1090_v47, %v1070_v46  ;;  %v956_v60 = vadd.f32 %v948_v55, %v920_v54  ;;  %v976_v61 = vmul.f32 %v5316_v18, %v964_v58  ;;  %v1141_v47 = vmul.f32 %v5370_v37, %v1129_v42  ;;  %v989_v54 = vld [vmem:[#allocation2 + $0x13] sm:$0xf] }
  0xae   :  { %v953_v51 = vadd.f32 %v945_v41, %v917_v40  ;;  %v909_v55 = vld [vmem:[#allocation2 + $0xb0] sm:$0xf]  ;;  %v1117_v58 = vmul.f32 %v5364_v25, %v1105_v50  ;;  %v5402_v42 = vrot.slane %v5358_v11, %v5327_v24  ;;  %v1073_v50 = vld [vmem:[#allocation2 + $0x16] sm:$0xf] }
  0xaf   :  { %4474 = vmatpush3.bf16.msra.mxu0 %v4626_v62  ;;  %6766 = vst [vmem:[#allocation27_spill] sm:$0xff] %v5348_v48  ;;  %v1008_v62 = vadd.f32 %v1000_v57, %v980_v56  ;;  %v937_v56 = vld [vmem:[#allocation2 + $0xb1] sm:$0xf]  ;;  %v1442_v48 = vld [vmem:[#allocation2 + $0xc5] sm:$0xf] }
  0xb0   :  { %6767 = vst [vmem:[#allocation28_spill] sm:$0xff] %v5402_v42  ;;  %v1189_v43 = vld [vmem:[#allocation2 + $0xb3] sm:$0xf] }
  0xb2   :  { %728 = vmatmul.mubr.bf16.vlgmr.msra.gmra.mrb[8].mxu0 %v4627_v1  ;;  %v992_v1 = vld [vmem:[#allocation2 + $0xa3] sm:$0xf] }
  0xb3   :  { %735 = vmatprep.mubr.bf16.mxu0 %v4630_v3  ;;  %v984_v3 = vadd.f32 %v976_v61, %v956_v60  ;;  %v1004_v4 = vmul.f32 %v5324_v23, %v992_v1  ;;  %v1169_v60 = vmul.f32 %v5378_v49, %v1157_v53  ;;  %v5385_v61 = vrot.slane %v5358_v11, %v5313_v15  ;;  %v5409_v53 = vld [vmem:[%s6677_s3] ss:$0 sm:$0xff] }
  0xb4   :  { %v1001_v1 = vmul.f32 %v5324_v23, %v989_v54 }
  0xb5   :  { %v1012_v17 = vadd.f32 %v1004_v4, %v984_v3  ;;  %v1017_v3 = vld [vmem:[#allocation2 + $0x14] sm:$0xf]  ;;  %v921_v4 = vmul.f32 %v5307_v13, %v909_v55 }
  0xb6   :  { %v1029_v27 = vmul.f32 %v5331_v28, %v1017_v3  ;;  %v1021_v55 = vld [vmem:[#allocation2 + $0xb4] sm:$0xf] }
  0xb7   :  { %v1040_v32 = vadd.f32 %v1032_v20, %v1012_v17  ;;  %v1197_v20 = vmul.f32 %v5385_v61, %v1185_v2 }
  0xb9   :  { %v1068_v44 = vadd.f32 %v1060_v33, %v1040_v32 }
  0xba   :  { %736 = vmatmul.mubr.bf16.gmra.mrb[12].mxu0 %v4632_v5  ;;  %v1036_v5 = vadd.f32 %v1028_v63, %v1008_v62  ;;  %v1133_v62 = vld [vmem:[#allocation2 + $0xb1] sm:$0xf]  ;;  %v981_v63 = vadd.f32 %v973_v52, %v953_v51 }
  0xbb   :  { %2874 = vmatprep.mubr.bf16.mxu0 %v6692_v0  ;;  %v1096_v57 = vadd.f32 %v1088_v45, %v1068_v44  ;;  %v1145_v16 = vmul.f32 %v5370_v37, %v1133_v62  ;;  %v1057_v45 = vmul.f32 %v5338_v35, %v1045_v31  ;;  %v1049_v31 = vld [vmem:[#allocation2 + $0xb5] sm:$0xf] }
  0xbc   :  { %v1064_v21 = vadd.f32 %v1056_v6, %v1036_v5  ;;  %v949_v5 = vmul.f32 %v5310_v14, %v937_v56  ;;  %v965_v6 = vld [vmem:[#allocation2 + $0xb2] sm:$0xf]  ;;  %v1009_v26 = vadd.f32 %v1001_v1, %v981_v63  ;;  %v5415_v63 = vrot.slane %v5358_v11, %v5334_v29 }
  0xbd   :  { %v1125_v7 = vadd.f32 %v1117_v58, %v1096_v57  ;;  %v977_v33 = vmul.f32 %v5316_v18, %v965_v6  ;;  %v1201_v57 = vmul.f32 %v5385_v61, %v1189_v43  ;;  %v1217_v1 = vld [vmem:[#allocation2 + $0xb4] sm:$0xf]  ;;  %v1085_v6 = vmul.f32 %v5342_v39, %v1073_v50  ;;  %v934_v50 = vld [vmem:[#allocation2 + $0x21] sm:$0xf] }
  0xbe   :  { %v1092_v34 = vadd.f32 %v1084_v22, %v1064_v21  ;;  %v5394_v21 = vrot.slane %v5358_v11, %v5319_v19  ;;  %v1161_v22 = vld [vmem:[#allocation2 + $0xb2] sm:$0xf]  ;;  %v957_v32 = vadd.f32 %v949_v5, %v921_v4  ;;  %v1037_v44 = vadd.f32 %v1029_v27, %v1009_v26  ;;  %6768 = vst [vmem:[#allocation29_spill] sm:$0xff] %v5415_v63  ;;  %v1102_v11 = vld [vmem:[#allocation2 + $0x20] sm:$0xf] }
  0xbf   :  { %v1173_v38 = vmul.f32 %v5378_v49, %v1161_v22  ;;  %v5417_v4 = vld [vmem:[#allocation8 + $0x10] sm:$0x7f]  ;;  %v1033_v26 = vmul.f32 %v5331_v28, %v1021_v55  ;;  %v1061_v55 = vmul.f32 %v5338_v35, %v1049_v31 }
  0xc0   :  { %v1121_v46 = vadd.f32 %v1113_v36, %v1092_v34  ;;  %v993_v34 = vld [vmem:[#allocation2 + $0xb3] sm:$0xf]  ;;  %v1153_v36 = vadd.f32 %v1145_v16, %v1125_v7  ;;  %v1225_v41 = vmul.f32 %v5394_v21, %v1213_v30  ;;  %v985_v51 = vadd.f32 %v977_v33, %v957_v32 }
  0xc1   :  { %v1005_v52 = vmul.f32 %v5324_v23, %v993_v34  ;;  %v1065_v5 = vadd.f32 %v1057_v45, %v1037_v44  ;;  %v1269_v7 = vld [vmem:[#allocation2 + $0x16] sm:$0xf]  ;;  %v1229_v33 = vmul.f32 %v5394_v21, %v1217_v1 }
  0xc2   :  { %v1149_v59 = vadd.f32 %v1141_v47, %v1121_v46  ;;  %v1241_v46 = vld [vmem:[#allocation2 + $0x15] sm:$0xf]  ;;  %v1181_v56 = vadd.f32 %v1173_v38, %v1153_v36 }
  0xc3   :  { %v1253_v62 = vmul.f32 %v5402_v42, %v1241_v46  ;;  %v1013_v22 = vadd.f32 %v1005_v52, %v985_v51  ;;  %v1245_v43 = vld [vmem:[#allocation2 + $0xb5] sm:$0xf]  ;;  %v1298_v46 = vld [vmem:[#allocation2 + $0x20] sm:$0xf]  ;;  %v1093_v51 = vadd.f32 %v1085_v6, %v1065_v5  ;;  %v1114_v52 = vmul.f32 %v5364_v25, %v1102_v11 }
  0xc4   :  { %v1177_v17 = vadd.f32 %v1169_v60, %v1149_v59  ;;  %v1209_v32 = vadd.f32 %v1201_v57, %v1181_v56  ;;  %v1130_v57 = vld [vmem:[#allocation2 + $0x21] sm:$0xf]  ;;  %v946_v6 = vmul.f32 %v5310_v14, %v934_v50 }
  0xc5   :  { %v1106_v11 = vld [vmem:[#allocation2 + $0xc0] sm:$0xf] }
  0xc6   :  { %v1205_v40 = vadd.f32 %v1197_v20, %v1177_v17  ;;  %v1354_v50 = vld [vmem:[#allocation2 + $0x22] sm:$0xf] }
  0xc8   :  { %v1233_v60 = vadd.f32 %v1225_v41, %v1205_v40  ;;  %v1281_v40 = vmul.f32 %v5415_v63, %v1269_v7  ;;  %v5427_v41 = vrot.slane %v5417_v4, %v5298_v9  ;;  %v1326_v7 = vld [vmem:[#allocation2 + $0x21] sm:$0xf] }
  0xca   :  { %v1261_v38 = vadd.f32 %v1253_v62, %v1233_v60  ;;  %v1257_v60 = vmul.f32 %v5402_v42, %v1245_v43  ;;  %v1310_v1 = vmul.f32 %v5427_v41, %v1298_v46 }
  0xcc   :  { %v1289_v62 = vadd.f32 %v1281_v40, %v1261_v38  ;;  %v5449_v38 = vrot.slane %v5417_v4, %v5304_v12  ;;  %v1302_v40 = vld [vmem:[#allocation2 + $0xc0] sm:$0xf] }
  0xce   :  { %v1366_v0 = vmul.f32 %v5449_v38, %v1354_v50 }
 0x165   :  { %v4419_v47 = vpop.f32.mrb[0].mxu0 }
 0x166   :  { %v4420_v54 = vpop.f32.mrb[1].mxu0  ;;  %v4447_v2 = vpop.f32.mrb[0].mxu1 }
 0x167   :  { %v4421_v58 = vadd.f32 %v4420_v54, %v4419_v47  ;;  %v4422_v59 = vpop.f32.mrb[2].mxu0  ;;  %v4448_v20 = vpop.f32.mrb[1].mxu1  ;;  %v906_v47 = vld [vmem:[#allocation2 + $0x20] sm:$0xf]  ;;  %v1041_v54 = vadd.f32 %v1033_v26, %v1013_v22 }
 0x168   :  { %v4423_v3 = vpop.f32.mrb[3].mxu0  ;;  %v4449_v27 = vadd.f32 %v4448_v20, %v4447_v2  ;;  %v4450_v30 = vpop.f32.mrb[2].mxu1  ;;  %v5439_v2 = vrot.slane %v5417_v4, %v5301_v10  ;;  %v918_v5 = vmul.f32 %v5307_v13, %v906_v47  ;;  %v1142_v20 = vmul.f32 %v5370_v37, %v1130_v57 }
 0x169   :  { %v632_v16 = vadd.f32 %v4421_v58, %v5409_v53  ;;  %v4424_v17 = vadd.f32 %v4423_v3, %v4422_v59  ;;  %v4451_v36 = vpop.f32.mrb[3].mxu1  ;;  %v1077_v58 = vld [vmem:[#allocation2 + $0xb6] sm:$0xf]  ;;  %v1237_v59 = vadd.f32 %v1229_v33, %v1209_v32  ;;  %v1069_v22 = vadd.f32 %v1061_v55, %v1041_v54  ;;  %v990_v54 = vld [vmem:[#allocation2 + $0x23] sm:$0xf] }
 0x16a   :  { %v4452_v45 = vadd.f32 %v4451_v36, %v4450_v30  ;;  %v1273_v3 = vld [vmem:[#allocation2 + $0xb6] sm:$0xf]  ;;  %v1089_v26 = vmul.f32 %v5342_v39, %v1077_v58  ;;  %v1158_v30 = vld [vmem:[#allocation2 + $0x22] sm:$0xf]  ;;  %v1338_v36 = vmul.f32 %v5439_v2, %v1326_v7  ;;  %v954_v46 = vadd.f32 %v946_v6, %v918_v5 }
 0x16b   :  { %v635_v34 = vadd.f32 %v4424_v17, %v5409_v53  ;;  %v5429_v44 = vadd.f32 %v4449_v27, %v632_v16  ;;  %v962_v16 = vld [vmem:[#allocation2 + $0x22] sm:$0xf]  ;;  %v1122_v17 = vadd.f32 %v1114_v52, %v1093_v51  ;;  %v1265_v31 = vadd.f32 %v1257_v60, %v1237_v59 }
 0x16c   :  { %v1285_v32 = vmul.f32 %v5415_v63, %v1273_v3  ;;  %v974_v47 = vmul.f32 %v5316_v18, %v962_v16  ;;  %v1170_v57 = vmul.f32 %v5378_v49, %v1158_v30  ;;  %v1097_v58 = vadd.f32 %v1089_v26, %v1069_v22  ;;  %v1134_v3 = vld [vmem:[#allocation2 + $0xc1] sm:$0xf] }
 0x16d   :  { %v5433_v56 = vadd.f32 %v4452_v45, %v635_v34  ;;  %v4425_v27 = vpop.f32.mrb[4].mxu0  ;;  %v1318_v34 = vadd.f32 %v1310_v1, %v1289_v62  ;;  %v1150_v55 = vadd.f32 %v1142_v20, %v1122_v17  ;;  %v1118_v59 = vmul.f32 %v5364_v25, %v1106_v11  ;;  %v1330_v20 = vld [vmem:[#allocation2 + $0xc1] sm:$0xf] }
 0x16e   :  { %v4426_v33 = vpop.f32.mrb[5].mxu0  ;;  %v4453_v51 = vpop.f32.mrb[4].mxu1  ;;  %v1293_v7 = vadd.f32 %v1285_v32, %v1265_v31  ;;  %v1314_v5 = vmul.f32 %v5427_v41, %v1302_v40  ;;  %v5459_v17 = vrot.slane %v5417_v4, %v5313_v15  ;;  %v982_v30 = vadd.f32 %v974_v47, %v954_v46  ;;  %v1382_v31 = vld [vmem:[#allocation2 + $0x23] sm:$0xf] }
 0x16f   :  { %v4427_v43 = vadd.f32 %v4426_v33, %v4425_v27  ;;  %v4428_v45 = vpop.f32.mrb[6].mxu0  ;;  %v4454_v1 = vpop.f32.mrb[5].mxu1  ;;  %v1186_v27 = vld [vmem:[#allocation2 + $0x23] sm:$0xf]  ;;  %v1346_v33 = vadd.f32 %v1338_v36, %v1318_v34  ;;  %v1002_v11 = vmul.f32 %v5324_v23, %v990_v54  ;;  %v1146_v34 = vmul.f32 %v5370_v37, %v1134_v3 }
 0x170   :  { %v4429_v52 = vpop.f32.mrb[7].mxu0  ;;  %v4455_v6 = vadd.f32 %v4454_v1, %v4453_v51  ;;  %v4456_v16 = vpop.f32.mrb[6].mxu1  ;;  %6769 = vst [vmem:[#allocation30_spill] sm:$0xff] %v5459_v17  ;;  %v1018_v36 = vld [vmem:[#allocation2 + $0x24] sm:$0xf]  ;;  %v1198_v50 = vmul.f32 %v5385_v61, %v1186_v27  ;;  %v1342_v1 = vmul.f32 %v5439_v2, %v1330_v20  ;;  %v1394_v54 = vmul.f32 %v5459_v17, %v1382_v31 }
 0x171   :  { %v640_v60 = vadd.f32 %v4427_v43, %v5409_v53  ;;  %v4430_v62 = vadd.f32 %v4429_v52, %v4428_v45  ;;  %v4457_v26 = vpop.f32.mrb[7].mxu1  ;;  %v1126_v43 = vadd.f32 %v1118_v59, %v1097_v58  ;;  %v1178_v45 = vadd.f32 %v1170_v57, %v1150_v55  ;;  %v1162_v51 = vld [vmem:[#allocation2 + $0xc2] sm:$0xf] }
 0x172   :  { %v4458_v40 = vadd.f32 %v4457_v26, %v4456_v16  ;;  %v1322_v52 = vadd.f32 %v1314_v5, %v1293_v7  ;;  %v1214_v46 = vld [vmem:[#allocation2 + $0x24] sm:$0xf]  ;;  %v1374_v47 = vadd.f32 %v1366_v0, %v1346_v33  ;;  %v1010_v55 = vadd.f32 %v1002_v11, %v982_v30 }
 0x173   :  { %v643_v22 = vadd.f32 %v4430_v62, %v5409_v53  ;;  %v5463_v32 = vadd.f32 %v4455_v6, %v640_v60  ;;  %v5473_v60 = vrot.slane %v5417_v4, %v5319_v19  ;;  %v1358_v58 = vld [vmem:[#allocation2 + $0xc2] sm:$0xf]  ;;  %v5475_v62 = vpop.permute.xlu1 %795  ;;  %v1030_v57 = vmul.f32 %v5331_v28, %v1018_v36 }
 0x174   :  { %v1410_v59 = vld [vmem:[#allocation2 + $0x24] sm:$0xf]  ;;  %v1154_v3 = vadd.f32 %v1146_v34, %v1126_v43  ;;  %v1174_v7 = vmul.f32 %v5378_v49, %v1162_v51  ;;  %v1206_v6 = vadd.f32 %v1198_v50, %v1178_v45  ;;  %v1226_v0 = vmul.f32 %v5394_v21, %v1214_v46  ;;  %v755_v45 = vpop.permute.xlu0 %754 }
 0x175   :  { %v5468_v53 = vadd.f32 %v4458_v40, %v643_v22  ;;  %v1046_v5 = vld [vmem:[#allocation2 + $0x25] sm:$0xf]  ;;  %v1350_v27 = vadd.f32 %v1342_v1, %v1322_v52  ;;  %v1370_v33 = vmul.f32 %v5449_v38, %v1358_v58  ;;  %v1402_v22 = vadd.f32 %v1394_v54, %v1374_v47 }
 0x176   :  { %v1190_v16 = vld [vmem:[#allocation2 + $0xc3] sm:$0xf]  ;;  %v1422_v26 = vmul.f32 %v5473_v60, %v1410_v59  ;;  %v5484_v30 = vrot.slane %v5417_v4, %v5327_v24  ;;  %v1038_v40 = vadd.f32 %v1030_v57, %v1010_v55  ;;  %v1058_v43 = vmul.f32 %v5338_v35, %v1046_v5 }
 0x177   :  { %v1242_v20 = vld [vmem:[#allocation2 + $0x25] sm:$0xf]  ;;  %v1182_v34 = vadd.f32 %v1174_v7, %v1154_v3  ;;  %v1202_v36 = vmul.f32 %v5385_v61, %v1190_v16  ;;  %v1234_v51 = vadd.f32 %v1226_v0, %v1206_v6  ;;  %v1378_v46 = vadd.f32 %v1370_v33, %v1350_v27  ;;  %v5495_v57 = vpop.permute.xlu1 %764 }
 0x178   :  { %6770 = vst [vmem:[#allocation31_spill] sm:$0xff] %v5484_v30  ;;  %v1386_v11 = vld [vmem:[#allocation2 + $0xc3] sm:$0xf]  ;;  %v1254_v52 = vmul.f32 %v5402_v42, %v1242_v20  ;;  %v1430_v58 = vadd.f32 %v1422_v26, %v1402_v22  ;;  %v5493_v55 = vrot.slane %v5417_v4, %v5334_v29  ;;  %v1066_v5 = vadd.f32 %v1058_v43, %v1038_v40  ;;  %v900_v4 = vld [vmem:[#allocation8 + $0x18] sm:$0x7f] }
 0x179   :  { %v1438_v31 = vld [vmem:[#allocation2 + $0x25] sm:$0xf]  ;;  %v1398_v47 = vmul.f32 %v5459_v17, %v1386_v11  ;;  %v1210_v0 = vadd.f32 %v1202_v36, %v1182_v34  ;;  %v786_v17 = vpop.permute.xlu0 %785  ;;  %v4286_v43 = vld [vmem:[%s6678_s4] ss:$0 sm:$0xff] }
 0x17a   :  { %v1074_v50 = vld [vmem:[#allocation2 + $0x26] sm:$0xf]  ;;  %v1450_v59 = vmul.f32 %v5484_v30, %v1438_v31  ;;  %6771 = vst [vmem:[#allocation32_spill] sm:$0xff] %v5493_v55  ;;  %v1262_v27 = vadd.f32 %v1254_v52, %v1234_v51 }
 0x17b   :  { %v1218_v1 = vld [vmem:[#allocation2 + $0xc4] sm:$0xf]  ;;  %v1086_v6 = vmul.f32 %v5342_v39, %v1074_v50  ;;  %v1406_v22 = vadd.f32 %v1398_v47, %v1378_v46  ;;  %v791_v51 = vpop.permute.xlu1 %790  ;;  %v5511_v47 = vrot.slane %v900_v4, %v5298_v9 }
 0x17c   :  { %v1270_v54 = vld [vmem:[#allocation2 + $0x26] sm:$0xf]  ;;  %v1230_v16 = vmul.f32 %v5394_v21, %v1218_v1  ;;  %v1458_v31 = vadd.f32 %v1450_v59, %v1430_v58 }
 0x17d   :  { %v1414_v3 = vld [vmem:[#allocation2 + $0xc4] sm:$0xf]  ;;  %v1282_v33 = vmul.f32 %v5415_v63, %v1270_v54  ;;  %v5505_v36 = vadd.f32 %v1086_v6, %v1066_v5  ;;  %v5518_v5 = vrot.slane %v900_v4, %v5301_v10 }
 0x17e   :  { %v1466_v7 = vld [vmem:[#allocation2 + $0x26] sm:$0xf]  ;;  %v1426_v26 = vmul.f32 %v5473_v60, %v1414_v3  ;;  %v1238_v52 = vadd.f32 %v1230_v16, %v1210_v0  ;;  %v1454_v3 = vmul.f32 %v5484_v30, %v1442_v48  ;;  %v803_v16 = vmul.f32 %v4286_v43, %v786_v17 }
 0x17f   :  { %v1246_v20 = vld [vmem:[#allocation2 + $0xc5] sm:$0xf]  ;;  %v1478_v8 = vmul.f32 %v5493_v55, %v1466_v7  ;;  %v5508_v46 = vadd.f32 %v1282_v33, %v1262_v27  ;;  %v5521_v27 = vrot.slane %v900_v4, %v5304_v12  ;;  %v5524_v33 = vrot.slane %v900_v4, %v5313_v15 }
 0x180   :  { %v1258_v1 = vmul.f32 %v5402_v42, %v1246_v20  ;;  %v1274_v58 = vld [vmem:[#allocation2 + $0xc6] sm:$0xf]  ;;  %v1434_v59 = vadd.f32 %v1426_v26, %v1406_v22  ;;  %v804_v20 = vmul.f32 %v4286_v43, %v791_v51  ;;  %v5532_v17 = vrot.slane %v900_v4, %v5327_v24 }
 0x181   :  { %v1470_v0 = vld [vmem:[#allocation2 + $0xc6] sm:$0xf]  ;;  %6772 = vst [vmem:[#allocation33_spill] sm:$0xff] %v5521_v27 }
 0x182   :  { %v901_v26 = vld [vmem:[#allocation8 + $0x20] sm:$0x7f] }
 0x185   :  { %v4475_v11 = vpop.f32.mrb[8].mxu0 }
 0x186   :  { %v4476_v40 = vpop.f32.mrb[9].mxu0 }
 0x187   :  { %v4477_v34 = vadd.f32 %v4476_v40, %v4475_v11  ;;  %v4478_v50 = vpop.f32.mrb[10].mxu0  ;;  %v5515_v11 = vadd.f32 %v1478_v8, %v1458_v31  ;;  %v1286_v8 = vmul.f32 %v5415_v63, %v1274_v58  ;;  %v760_v31 = vpop.permute.xlu0 %759  ;;  %v5529_v40 = vrot.slane %v900_v4, %v5319_v19 }
 0x188   :  { %v4479_v54 = vpop.f32.mrb[11].mxu0  ;;  %v5542_v58 = vrot.slane %v901_v26, %v5298_v9 }
 0x189   :  { %v730_v7 = vadd.f32 %v4477_v34, %v5429_v44  ;;  %v4480_v6 = vadd.f32 %v4479_v54, %v4478_v50  ;;  %v1266_v44 = vadd.f32 %v1258_v1, %v1238_v52  ;;  %v1462_v34 = vadd.f32 %v1454_v3, %v1434_v59  ;;  %v801_v1 = vpop.permute.xlu1 %800 }
 0x18a   :  { %v1482_v50 = vmul.f32 %v5493_v55, %v1470_v0  ;;  %v805_v54 = vmul.f32 %v4286_v43, %v5475_v62  ;;  %6774 = vst [vmem:[#allocation35_spill] sm:$0xff] %v5542_v58  ;;  %v5548_v59 = vrot.slane %v901_v26, %v5304_v12  ;;  %v5551_v3 = vrot.slane %v901_v26, %v5313_v15 }
 0x18b   :  { %v772_v22 = vmul.f32 %v755_v45, %v730_v7  ;;  %v733_v48 = vadd.f32 %v4480_v6, %v5433_v56  ;;  %v5539_v45 = vrot.slane %v900_v4, %v5334_v29  ;;  %v5545_v7 = vrot.slane %v901_v26, %v5301_v10 }
 0x18c   :  { %6776 = vst [vmem:[#allocation37_spill] sm:$0xff] %v5548_v59  ;;  %6777 = vst [vmem:[#allocation38_spill] sm:$0xff] %v5551_v3  ;;  %v806_v59 = vmul.f32 %v4286_v43, %v801_v1  ;;  %v5563_v58 = vrot.slane %v901_v26, %v5319_v19  ;;  %v5566_v3 = vrot.slane %v901_v26, %v5327_v24 }
 0x18d   :  { %v5536_v51 = vadd.f32 %v803_v16, %v772_v22  ;;  %v773_v56 = vmul.f32 %v760_v31, %v733_v48  ;;  %v4481_v52 = vpop.f32.mrb[12].mxu0  ;;  %6775 = vst [vmem:[#allocation36_spill] sm:$0xff] %v5545_v7  ;;  %v5558_v16 = vadd.f32 %v1286_v8, %v1266_v44  ;;  %v902_v48 = vld [vmem:[#allocation8 + $0x28] sm:$0x7f]  ;;  %v5560_v31 = vadd.f32 %v1482_v50, %v1462_v34 }
 0x18e   :  { %v4482_v62 = vpop.f32.mrb[13].mxu0  ;;  %6781 = vst [vmem:[#allocation42_spill] sm:$0xff] %v5563_v58  ;;  %6782 = vst [vmem:[#allocation43_spill] sm:$0xff] %v5566_v3  ;;  %v5573_v34 = vrot.slane %v901_v26, %v5334_v29  ;;  %v5576_v43 = vrot.slane %v902_v48, %v5298_v9  ;;  %v5579_v50 = vrot.slane %v902_v48, %v5301_v10 }
 0x18f   :  { %6773 = vst [vmem:[#allocation34_spill] sm:$0xff] %v5536_v51  ;;  %v815_v4 = vcombine.high %v5536_v51, %v5536_v51  ;;  %889 = vst [vmem:[#allocation2 + $0x33] sm:$0xf] %v5536_v51  ;;  %v5556_v6 = vadd.f32 %v804_v20, %v773_v56  ;;  %v4483_v0 = vadd.f32 %v4482_v62, %v4481_v52  ;;  %v4484_v22 = vpop.f32.mrb[14].mxu0  ;;  %v903_v56 = vld [vmem:[#allocation8 + $0x30] sm:$0x7f] }
 0x190   :  { %6779 = vst [vmem:[#allocation40_spill] sm:$0xff] %v5558_v16  ;;  %6780 = vst [vmem:[#allocation41_spill] sm:$0xff] %v5560_v31  ;;  %v4485_v7 = vpop.f32.mrb[15].mxu0  ;;  %v5582_v52 = vrot.slane %v902_v48, %v5304_v12  ;;  %v5585_v1 = vrot.slane %v902_v48, %v5313_v15  ;;  %v5590_v26 = vrot.slane %v902_v48, %v5319_v19 }
 0x191   :  { %6778 = vst [vmem:[#allocation39_spill] sm:$0xff] %v5556_v6  ;;  %890 = vst [vmem:[#allocation2 + $0x43] sm:$0xf] %v815_v4  ;;  %v816_v20 = vcombine.high %v5556_v6, %v5556_v6  ;;  %v738_v44 = vadd.f32 %v4483_v0, %v5463_v32  ;;  %v4486_v8 = vadd.f32 %v4485_v7, %v4484_v22  ;;  %v2086_v4 = vld [vmem:[#allocation2 + $0x70] sm:$0xf]  ;;  %v770_v22 = vpop.permute.xlu0 %769 }
 0x192   :  { %891 = vst [vmem:[#allocation2 + $0x53] sm:$0xf] %v5556_v6  ;;  %6783 = vst [vmem:[#allocation44_spill] sm:$0xff] %v5573_v34  ;;  %v5593_v62 = vrot.slane %v902_v48, %v5327_v24  ;;  %v2114_v0 = vld [vmem:[#allocation2 + $0x71] sm:$0xf]  ;;  %v5596_v6 = vrot.slane %v902_v48, %v5334_v29  ;;  %v5599_v51 = vrot.slane %v903_v56, %v5298_v9 }
 0x193   :  { %6784 = vst [vmem:[#allocation45_spill] sm:$0xff] %v5576_v43  ;;  %6785 = vst [vmem:[#allocation46_spill] sm:$0xff] %v5579_v50  ;;  %v774_v32 = vmul.f32 %v5495_v57, %v738_v44  ;;  %v741_v7 = vadd.f32 %v4486_v8, %v5468_v53  ;;  %v2142_v57 = vld [vmem:[#allocation2 + $0x72] sm:$0xf]  ;;  %v5605_v53 = vrot.slane %v903_v56, %v5304_v12 }
 0x194   :  { %6786 = vst [vmem:[#allocation47_spill] sm:$0xff] %v5582_v52  ;;  %6787 = vst [vmem:[#allocation48_spill] sm:$0xff] %v5585_v1  ;;  %v2170_v44 = vld [vmem:[#allocation2 + $0x73] sm:$0xf]  ;;  %v5613_v48 = vrot.slane %v903_v56, %v5319_v19  ;;  %v5616_v43 = vmul.f32 %v5599_v51, %v2086_v4 }
 0x195   :  { %892 = vst [vmem:[#allocation2 + $0x63] sm:$0xf] %v816_v20  ;;  %6788 = vst [vmem:[#allocation49_spill] sm:$0xff] %v5590_v26  ;;  %v5602_v20 = vrot.slane %v903_v56, %v5301_v10  ;;  %v5607_v8 = vadd.f32 %v805_v54, %v774_v32  ;;  %v5610_v26 = vrot.slane %v903_v56, %v5313_v15  ;;  %v2198_v1 = vld [vmem:[#allocation2 + $0x74] sm:$0xf] }
 0x196   :  { %6789 = vst [vmem:[#allocation50_spill] sm:$0xff] %v5593_v62  ;;  %6790 = vst [vmem:[#allocation51_spill] sm:$0xff] %v5596_v6  ;;  %v775_v62 = vmul.f32 %v770_v22, %v741_v7  ;;  %v2226_v9 = vld [vmem:[#allocation2 + $0x75] sm:$0xf]  ;;  %v907_v52 = vld [vmem:[#allocation2 + $0x30] sm:$0xf]  ;;  %v5622_v54 = vrot.slane %v903_v56, %v5327_v24  ;;  %v5625_v32 = vrot.slane %v903_v56, %v5334_v29 }
 0x197   :  { %6791 = vst [vmem:[#allocation52_spill] sm:$0xff] %v5599_v51  ;;  %6792 = vst [vmem:[#allocation53_spill] sm:$0xff] %v5602_v20  ;;  %v2254_v6 = vld [vmem:[#allocation2 + $0x76] sm:$0xf]  ;;  %v935_v10 = vld [vmem:[#allocation2 + $0x31] sm:$0xf]  ;;  %v5619_v12 = vmul.f32 %v5602_v20, %v2114_v0  ;;  %v919_v7 = vmul.f32 %v5307_v13, %v907_v52  ;;  %v817_v19 = vcombine.high %v5607_v8, %v5607_v8 }
 0x198   :  { %6793 = vst [vmem:[#allocation54_spill] sm:$0xff] %v5605_v53  ;;  %6794 = vst [vmem:[#allocation55_spill] sm:$0xff] %v5607_v8  ;;  %v963_v50 = vld [vmem:[#allocation2 + $0x32] sm:$0xf]  ;;  %v947_v22 = vmul.f32 %v5310_v14, %v935_v10  ;;  %v5633_v4 = vmul.f32 %v5605_v53, %v2142_v57  ;;  %v4287_v0 = vld [vmem:[%s6680_s6] ss:$0 sm:$0xff]  ;;  %v5638_v52 = vadd.f32 %v806_v59, %v775_v62 }
 0x199   :  { %6795 = vst [vmem:[#allocation56_spill] sm:$0xff] %v5610_v26  ;;  %6796 = vst [vmem:[#allocation57_spill] sm:$0xff] %v5613_v48  ;;  %v2090_v24 = vld [vmem:[#allocation2 + $0x110] sm:$0xf]  ;;  %v5641_v10 = vmul.f32 %v5610_v26, %v2170_v44  ;;  %v5647_v57 = vmul.f32 %v5622_v54, %v2226_v9  ;;  %v975_v34 = vmul.f32 %v5316_v18, %v963_v50  ;;  %v1019_v3 = vld [vmem:[#allocation2 + $0x34] sm:$0xf] }
 0x19a   :  { %6797 = vst [vmem:[#allocation58_spill] sm:$0xff] %v5616_v43  ;;  %6798 = vst [vmem:[#allocation59_spill] sm:$0xff] %v5619_v12  ;;  %v2118_v15 = vld [vmem:[#allocation2 + $0x111] sm:$0xf]  ;;  %v5644_v43 = vmul.f32 %v5613_v48, %v2198_v1  ;;  %v5652_v59 = vmul.f32 %v5625_v32, %v2254_v6  ;;  %v1047_v44 = vld [vmem:[#allocation2 + $0x35] sm:$0xf]  ;;  %v818_v1 = vcombine.high %v5638_v52, %v5638_v52 }
 0x19b   :  { %6799 = vst [vmem:[#allocation60_spill] sm:$0xff] %v5622_v54  ;;  %6800 = vst [vmem:[#allocation61_spill] sm:$0xff] %v5625_v32  ;;  %v2146_v29 = vld [vmem:[#allocation2 + $0x112] sm:$0xf]  ;;  %v5657_v9 = vcombine.high %v4287_v0, %v4287_v0  ;;  %v5660_v50 = vmul.f32 %v5599_v51, %v2090_v24  ;;  %v1160_v0 = vld [vmem:[#allocation2 + $0x42] sm:$0xf] }
 0x19c   :  { %893 = vst [vmem:[#allocation2 + $0xd3] sm:$0xf] %v5607_v8  ;;  %6801 = vst [vmem:[#allocation62_spill] sm:$0xff] %v5633_v4  ;;  %v991_v56 = vld [vmem:[#allocation2 + $0x33] sm:$0xf]  ;;  %v955_v4 = vadd.f32 %v947_v22, %v919_v7  ;;  %v5670_v24 = vmul.f32 %v5605_v53, %v2146_v29 }
 0x19d   :  { %v1103_v12 = vld [vmem:[#allocation2 + $0x30] sm:$0xf]  ;;  %6802 = vst [vmem:[#allocation63_spill] sm:$0xff] %v5638_v52  ;;  %6803 = vst [vmem:[#allocation64_spill] sm:$0xff] %v5641_v10  ;;  %v2202_v62 = vld [vmem:[#allocation2 + $0x114] sm:$0xf]  ;;  %v1003_v6 = vmul.f32 %v5324_v23, %v991_v56 }
 0x19e   :  { %6804 = vst [vmem:[#allocation65_spill] sm:$0xff] %v5644_v43  ;;  %6805 = vst [vmem:[#allocation66_spill] sm:$0xff] %v5647_v57  ;;  %v2174_v8 = vld [vmem:[#allocation2 + $0x113] sm:$0xf]  ;;  %v1115_v58 = vmul.f32 %v5364_v25, %v1103_v12  ;;  %v5663_v12 = vmul.f32 %v5602_v20, %v2118_v15  ;;  %v1104_v22 = vld [vmem:[#allocation2 + $0x40] sm:$0xf] }
 0x19f   :  { %v1131_v31 = vld [vmem:[#allocation2 + $0x31] sm:$0xf]  ;;  %894 = vst [vmem:[#allocation2 + $0xe3] sm:$0xf] %v817_v19  ;;  %6806 = vst [vmem:[#allocation67_spill] sm:$0xff] %v5652_v59  ;;  %v983_v19 = vadd.f32 %v975_v34, %v955_v4  ;;  %v5673_v15 = vmul.f32 %v5610_v26, %v2174_v8  ;;  %v5676_v34 = vmul.f32 %v5613_v48, %v2202_v62 }
 0x1a0   :  { %v1159_v10 = vld [vmem:[#allocation2 + $0x32] sm:$0xf]  ;;  %895 = vst [vmem:[#allocation2 + $0xf3] sm:$0xf] %v5638_v52  ;;  %6807 = vst [vmem:[#allocation68_spill] sm:$0xff] %v5657_v9  ;;  %v1123_v59 = vadd.f32 %v1115_v58, %v5505_v36  ;;  %v1143_v43 = vmul.f32 %v5370_v37, %v1131_v31  ;;  %v1031_v52 = vmul.f32 %v5331_v28, %v1019_v3 }
 0x1a1   :  { %6808 = vst [vmem:[#allocation69_spill] sm:$0xff] %v5660_v50  ;;  %6809 = vst [vmem:[#allocation70_spill] sm:$0xff] %v5663_v12  ;;  %v1075_v7 = vld [vmem:[#allocation2 + $0x36] sm:$0xf]  ;;  %v1132_v57 = vld [vmem:[#allocation2 + $0x41] sm:$0xf]  ;;  %v1011_v4 = vadd.f32 %v1003_v6, %v983_v19  ;;  %v1059_v36 = vmul.f32 %v5338_v35, %v1047_v44  ;;  %v1171_v31 = vmul.f32 %v5378_v49, %v1159_v10 }
 0x1a2   :  { %v1187_v9 = vld [vmem:[#allocation2 + $0x33] sm:$0xf]  ;;  %v1188_v32 = vld [vmem:[#allocation2 + $0x43] sm:$0xf]  ;;  %896 = vst [vmem:[#allocation2 + $0x103] sm:$0xf] %v818_v1  ;;  %v1151_v58 = vadd.f32 %v1143_v43, %v1123_v59  ;;  %v1087_v1 = vmul.f32 %v5342_v39, %v1075_v7  ;;  %v1116_v29 = vmul.f32 %v5364_v25, %v1104_v22  ;;  %v1172_v19 = vmul.f32 %v5378_v49, %v1160_v0 }
 0x1a3   :  { %6810 = vst [vmem:[#allocation71_spill] sm:$0xff] %v5670_v24  ;;  %6811 = vst [vmem:[#allocation72_spill] sm:$0xff] %v5673_v15  ;;  %v1215_v3 = vld [vmem:[#allocation2 + $0x34] sm:$0xf]  ;;  %v1299_v56 = vld [vmem:[#allocation2 + $0x30] sm:$0xf]  ;;  %v1144_v24 = vmul.f32 %v5370_v37, %v1132_v57  ;;  %v1199_v43 = vmul.f32 %v5385_v61, %v1187_v9  ;;  %v5687_v50 = vmul.f32 %v5385_v61, %v1188_v32 }
 0x1a4   :  { %6812 = vst [vmem:[#allocation73_spill] sm:$0xff] %v5676_v34  ;;  %v1327_v12 = vld [vmem:[#allocation2 + $0x31] sm:$0xf]  ;;  %v1216_v8 = vld [vmem:[#allocation2 + $0x44] sm:$0xf]  ;;  %v1311_v62 = vmul.f32 %v5427_v41, %v1299_v56  ;;  %v1039_v34 = vadd.f32 %v1031_v52, %v1011_v4  ;;  %v1179_v44 = vadd.f32 %v1171_v31, %v1151_v58  ;;  %v1227_v7 = vmul.f32 %v5394_v21, %v1215_v3 }
 0x1a5   :  { %v1243_v15 = vld [vmem:[#allocation2 + $0x35] sm:$0xf]  ;;  %v1244_v10 = vld [vmem:[#allocation2 + $0x45] sm:$0xf]  ;;  %v1300_v57 = vld [vmem:[#allocation2 + $0x40] sm:$0xf]  ;;  %v1339_v56 = vmul.f32 %v5439_v2, %v1327_v12  ;;  %v5693_v0 = vmul.f32 %v5394_v21, %v1216_v8 }
 0x1a6   :  { %v1271_v59 = vld [vmem:[#allocation2 + $0x36] sm:$0xf]  ;;  %v1355_v6 = vld [vmem:[#allocation2 + $0x32] sm:$0xf]  ;;  %v1272_v22 = vld [vmem:[#allocation2 + $0x46] sm:$0xf]  ;;  %v1319_v54 = vadd.f32 %v1311_v62, %v5508_v46  ;;  %v1067_v52 = vadd.f32 %v1059_v36, %v1039_v34  ;;  %v1207_v4 = vadd.f32 %v1199_v43, %v1179_v44  ;;  %v1255_v9 = vmul.f32 %v5402_v42, %v1243_v15 }
 0x1a7   :  { %v1328_v58 = vld [vmem:[#allocation2 + $0x41] sm:$0xf]  ;;  %v1383_v31 = vld [vmem:[#allocation2 + $0x33] sm:$0xf]  ;;  %v5697_v32 = vmul.f32 %v5402_v42, %v1244_v10  ;;  %v1283_v3 = vmul.f32 %v5415_v63, %v1271_v59  ;;  %v1367_v46 = vmul.f32 %v5449_v38, %v1355_v6  ;;  %v1312_v36 = vmul.f32 %v5427_v41, %v1300_v57  ;;  %v6813_v10 = vld [vmem:[#allocation30_spill] sm:$0xff] }
 0x1a8   :  { %v1494_v48 = vld [vmem:[#allocation2 + $0x30] sm:$0xf]  ;;  %v1347_v26 = vadd.f32 %v1339_v56, %v1319_v54  ;;  %v1095_v12 = vadd.f32 %v1087_v1, %v1067_v52  ;;  %v1235_v34 = vadd.f32 %v1227_v7, %v1207_v4  ;;  %v1356_v8 = vld [vmem:[#allocation2 + $0x42] sm:$0xf]  ;;  %v1411_v43 = vld [vmem:[#allocation2 + $0x34] sm:$0xf]  ;;  %v1340_v53 = vmul.f32 %v5439_v2, %v1328_v58 }
 0x1a9   :  { %v1522_v62 = vld [vmem:[#allocation2 + $0x31] sm:$0xf]  ;;  %v1384_v44 = vld [vmem:[#allocation2 + $0x43] sm:$0xf]  ;;  %v1506_v15 = vmul.f32 %v5511_v47, %v1494_v48  ;;  %v1395_v51 = vmul.f32 %v6813_v10, %v1383_v31  ;;  %v5706_v54 = vmul.f32 %v5415_v63, %v1272_v22  ;;  %v1439_v7 = vld [vmem:[#allocation2 + $0x35] sm:$0xf]  ;;  %v1368_v48 = vmul.f32 %v5449_v38, %v1356_v8 }
 0x1aa   :  { %v1375_v20 = vadd.f32 %v1367_v46, %v1347_v26  ;;  %v1550_v16 = vld [vmem:[#allocation2 + $0x32] sm:$0xf]  ;;  %v1124_v59 = vadd.f32 %v1116_v29, %v1095_v12  ;;  %v1263_v6 = vadd.f32 %v1255_v9, %v1235_v34  ;;  %v1412_v1 = vld [vmem:[#allocation2 + $0x44] sm:$0xf]  ;;  %v1534_v52 = vmul.f32 %v5518_v5, %v1522_v62  ;;  %v1467_v63 = vld [vmem:[#allocation2 + $0x36] sm:$0xf] }
 0x1ab   :  { %v1440_v56 = vld [vmem:[#allocation2 + $0x45] sm:$0xf]  ;;  %v1514_v57 = vadd.f32 %v1506_v15, %v5515_v11  ;;  %v1396_v4 = vmul.f32 %v6813_v10, %v1384_v44  ;;  %v1423_v58 = vmul.f32 %v5473_v60, %v1411_v43  ;;  %v1578_v31 = vld [vmem:[#allocation2 + $0x33] sm:$0xf]  ;;  %v1495_v29 = vld [vmem:[#allocation2 + $0x40] sm:$0xf]  ;;  %v1562_v34 = vmul.f32 %v5521_v27, %v1550_v16 }
 0x1ac   :  { %v1403_v26 = vadd.f32 %v1395_v51, %v1375_v20  ;;  %v1152_v46 = vadd.f32 %v1144_v24, %v1124_v59  ;;  %v1291_v22 = vadd.f32 %v1283_v3, %v1263_v6  ;;  %v1523_v9 = vld [vmem:[#allocation2 + $0x41] sm:$0xf]  ;;  %v1424_v11 = vmul.f32 %v5473_v60, %v1412_v1  ;;  %v1606_v51 = vld [vmem:[#allocation2 + $0x34] sm:$0xf]  ;;  %v1468_v42 = vld [vmem:[#allocation2 + $0x46] sm:$0xf] }
 0x1ad   :  { %v1542_v12 = vadd.f32 %v1534_v52, %v1514_v57  ;;  %v1451_v62 = vmul.f32 %v5484_v30, %v1439_v7  ;;  %v5717_v8 = vmul.f32 %v5484_v30, %v1440_v56  ;;  %v1551_v43 = vld [vmem:[#allocation2 + $0x42] sm:$0xf]  ;;  %v1590_v59 = vmul.f32 %v5524_v33, %v1578_v31  ;;  %v1634_v7 = vld [vmem:[#allocation2 + $0x35] sm:$0xf] }
 0x1ae   :  { %v1431_v15 = vadd.f32 %v1423_v58, %v1403_v26  ;;  %v1180_v20 = vadd.f32 %v1172_v19, %v1152_v46  ;;  %v1320_v44 = vadd.f32 %v1312_v36, %v1291_v22  ;;  %v1579_v3 = vld [vmem:[#allocation2 + $0x43] sm:$0xf]  ;;  %v1479_v16 = vmul.f32 %v5493_v55, %v1467_v63  ;;  %v1662_v46 = vld [vmem:[#allocation2 + $0x36] sm:$0xf] }
 0x1af   :  { %v1570_v24 = vadd.f32 %v1562_v34, %v1542_v12  ;;  %v1607_v6 = vld [vmem:[#allocation2 + $0x44] sm:$0xf]  ;;  %v1507_v1 = vmul.f32 %v5511_v47, %v1495_v29  ;;  %v1535_v52 = vmul.f32 %v5518_v5, %v1523_v9  ;;  %v1618_v19 = vmul.f32 %v5529_v40, %v1606_v51  ;;  %v1691_v22 = vld [vmem:[#allocation2 + $0x40] sm:$0xf]  ;;  %v1301_v29 = vld [vmem:[#allocation2 + $0x50] sm:$0xf] }
 0x1b0   :  { %v1459_v57 = vadd.f32 %v1451_v62, %v1431_v15  ;;  %v1208_v56 = vadd.f32 %v5687_v50, %v1180_v20  ;;  %v1348_v26 = vadd.f32 %v1340_v53, %v1320_v44  ;;  %v1635_v36 = vld [vmem:[#allocation2 + $0x45] sm:$0xf]  ;;  %v1563_v31 = vmul.f32 %v5521_v27, %v1551_v43  ;;  %v1329_v15 = vld [vmem:[#allocation2 + $0x51] sm:$0xf] }
 0x1b1   :  { %v1598_v58 = vadd.f32 %v1590_v59, %v1570_v24  ;;  %v1591_v34 = vmul.f32 %v5524_v33, %v1579_v3  ;;  %v1619_v63 = vmul.f32 %v5529_v40, %v1607_v6  ;;  %v1646_v50 = vmul.f32 %v5532_v17, %v1634_v7  ;;  %v1357_v20 = vld [vmem:[#allocation2 + $0x52] sm:$0xf] }
 0x1b2   :  { %v1487_v12 = vadd.f32 %v1479_v16, %v1459_v57  ;;  %v1376_v9 = vadd.f32 %v1368_v48, %v1348_v26  ;;  %v1236_v53 = vadd.f32 %v5693_v0, %v1208_v56  ;;  %v1385_v51 = vld [vmem:[#allocation2 + $0x53] sm:$0xf]  ;;  %v1647_v59 = vmul.f32 %v5532_v17, %v1635_v36 }
 0x1b3   :  { %v1626_v62 = vadd.f32 %v1618_v19, %v1598_v58  ;;  %v1413_v44 = vld [vmem:[#allocation2 + $0x54] sm:$0xf]  ;;  %v1674_v43 = vmul.f32 %v5539_v45, %v1662_v46  ;;  %v1313_v7 = vmul.f32 %v5427_v41, %v1301_v29  ;;  %v1341_v0 = vmul.f32 %v5439_v2, %v1329_v15  ;;  %v1496_v26 = vld [vmem:[#allocation2 + $0x50] sm:$0xf]  ;;  %v1497_v46 = vld [vmem:[#allocation2 + $0x60] sm:$0xf] }
 0x1b4   :  { %v1515_v24 = vadd.f32 %v1507_v1, %v1487_v12  ;;  %v6814_v57 = vld [vmem:[#allocation35_spill] sm:$0xff]  ;;  %v1404_v16 = vadd.f32 %v1396_v4, %v1376_v9  ;;  %v1264_v48 = vadd.f32 %v5697_v32, %v1236_v53  ;;  %v1369_v1 = vmul.f32 %v5449_v38, %v1357_v20  ;;  %v1525_v15 = vld [vmem:[#allocation2 + $0x61] sm:$0xf] }
 0x1b5   :  { %v5733_v3 = vmul.f32 %v6814_v57, %v1691_v22  ;;  %v1441_v6 = vld [vmem:[#allocation2 + $0x55] sm:$0xf]  ;;  %v1397_v19 = vmul.f32 %v6813_v10, %v1385_v51  ;;  %v5741_v36 = vmul.f32 %v5473_v60, %v1413_v44  ;;  %v1524_v22 = vld [vmem:[#allocation2 + $0x51] sm:$0xf]  ;;  %v1654_v4 = vadd.f32 %v1646_v50, %v1626_v62  ;;  %v1553_v53 = vld [vmem:[#allocation2 + $0x62] sm:$0xf] }
 0x1b6   :  { %v1469_v56 = vld [vmem:[#allocation2 + $0x56] sm:$0xf]  ;;  %v1543_v58 = vadd.f32 %v1535_v52, %v1515_v24  ;;  %v1292_v12 = vadd.f32 %v5706_v54, %v1264_v48  ;;  %v1432_v32 = vadd.f32 %v1424_v11, %v1404_v16  ;;  %v5745_v29 = vmul.f32 %v5484_v30, %v1441_v6  ;;  %v1552_v9 = vld [vmem:[#allocation2 + $0x52] sm:$0xf]  ;;  %v1581_v50 = vld [vmem:[#allocation2 + $0x63] sm:$0xf] }
 0x1b7   :  { %6815 = vst [vmem:[#allocation30_spill] sm:$0xff] %v5733_v3  ;;  %v1480_v20 = vmul.f32 %v5493_v55, %v1468_v42  ;;  %v5749_v51 = vmul.f32 %v5493_v55, %v1469_v56  ;;  %v1508_v44 = vmul.f32 %v5511_v47, %v1496_v26  ;;  %v1580_v24 = vld [vmem:[#allocation2 + $0x53] sm:$0xf]  ;;  %v5754_v54 = vmul.f32 %v5511_v47, %v1497_v46 }
 0x1b8   :  { %v1571_v52 = vadd.f32 %v1563_v31, %v1543_v58  ;;  %v1321_v3 = vadd.f32 %v1313_v7, %v1292_v12  ;;  %v1460_v62 = vadd.f32 %v5717_v8, %v1432_v32  ;;  %v1536_v11 = vmul.f32 %v5518_v5, %v1524_v22  ;;  %v911_v6 = vld [vmem:[#allocation2 + $0xd0] sm:$0xf]  ;;  %v1608_v7 = vld [vmem:[#allocation2 + $0x54] sm:$0xf]  ;;  %v1663_v8 = vld [vmem:[#allocation2 + $0x46] sm:$0xf] }
 0x1b9   :  { %v939_v16 = vld [vmem:[#allocation2 + $0xd1] sm:$0xf]  ;;  %v5758_v42 = vmul.f32 %v5518_v5, %v1525_v15  ;;  %v1564_v48 = vmul.f32 %v5521_v27, %v1552_v9  ;;  %v5762_v56 = vmul.f32 %v5521_v27, %v1553_v53  ;;  %v1636_v26 = vld [vmem:[#allocation2 + $0x55] sm:$0xf]  ;;  %v5764_v58 = vadd.f32 %v1674_v43, %v1654_v4  ;;  %v1693_v4 = vld [vmem:[#allocation2 + $0x60] sm:$0xf] }
 0x1ba   :  { %v1599_v31 = vadd.f32 %v1591_v34, %v1571_v52  ;;  %v1349_v46 = vadd.f32 %v1341_v0, %v1321_v3  ;;  %v1488_v12 = vadd.f32 %v1480_v20, %v1460_v62  ;;  %v1592_v22 = vmul.f32 %v5524_v33, %v1580_v24  ;;  %v967_v32 = vld [vmem:[#allocation2 + $0xd2] sm:$0xf]  ;;  %v1664_v52 = vld [vmem:[#allocation2 + $0x56] sm:$0xf] }
 0x1bb   :  { %v5768_v34 = vmul.f32 %v5524_v33, %v1581_v50  ;;  %v923_v9 = vmul.f32 %v5307_v13, %v911_v6  ;;  %v951_v53 = vmul.f32 %v5310_v14, %v939_v16  ;;  %v1107_v55 = vld [vmem:[#allocation2 + $0xd0] sm:$0xf]  ;;  %v1620_v43 = vmul.f32 %v5529_v40, %v1608_v7  ;;  %v1023_v16 = vld [vmem:[#allocation2 + $0xd4] sm:$0xf] }
 0x1bc   :  { %v1627_v15 = vadd.f32 %v1619_v63, %v1599_v31  ;;  %v1377_v27 = vadd.f32 %v1369_v1, %v1349_v46  ;;  %v1516_v30 = vadd.f32 %v1508_v44, %v1488_v12  ;;  %v5774_v3 = vmul.f32 %v5532_v17, %v1636_v26  ;;  %v1692_v0 = vld [vmem:[#allocation2 + $0x50] sm:$0xf] }
 0x1bd   :  { %v995_v20 = vld [vmem:[#allocation2 + $0xd3] sm:$0xf]  ;;  %v1675_v62 = vmul.f32 %v5539_v45, %v1663_v8  ;;  %v959_v63 = vadd.f32 %v951_v53, %v923_v9  ;;  %v979_v50 = vmul.f32 %v5316_v18, %v967_v32  ;;  %v5779_v1 = vmul.f32 %v5539_v45, %v1664_v52  ;;  %v6817_v52 = vld [vmem:[#allocation36_spill] sm:$0xff]  ;;  %v1749_v53 = vld [vmem:[#allocation2 + $0x62] sm:$0xf] }
 0x1be   :  { %v1655_v24 = vadd.f32 %v1647_v59, %v1627_v15  ;;  %v1135_v13 = vld [vmem:[#allocation2 + $0xd1] sm:$0xf]  ;;  %v1405_v6 = vadd.f32 %v1397_v19, %v1377_v27  ;;  %v1544_v14 = vadd.f32 %v1536_v11, %v1516_v30  ;;  %v1119_v31 = vmul.f32 %v5364_v25, %v1107_v55  ;;  %v1721_v30 = vld [vmem:[#allocation2 + $0x61] sm:$0xf]  ;;  %v1051_v11 = vld [vmem:[#allocation2 + $0xd5] sm:$0xf] }
 0x1bf   :  { %v1720_v44 = vld [vmem:[#allocation2 + $0x51] sm:$0xf]  ;;  %v1704_v7 = vmul.f32 %v6814_v57, %v1692_v0  ;;  %v5784_v26 = vmul.f32 %v6814_v57, %v1693_v4  ;;  %v987_v59 = vadd.f32 %v979_v50, %v959_v63  ;;  %v1007_v8 = vmul.f32 %v5324_v23, %v995_v20 }
 0x1c0   :  { %v1163_v46 = vld [vmem:[#allocation2 + $0xd2] sm:$0xf]  ;;  %v1433_v18 = vadd.f32 %v5741_v36, %v1405_v6  ;;  %v1572_v27 = vadd.f32 %v1564_v48, %v1544_v14  ;;  %v1147_v15 = vmul.f32 %v5370_v37, %v1135_v13  ;;  %v1683_v55 = vadd.f32 %v1675_v62, %v1655_v24  ;;  %v1079_v36 = vld [vmem:[#allocation2 + $0xd6] sm:$0xf]  ;;  %v6818_v14 = vld [vmem:[#allocation37_spill] sm:$0xff] }
 0x1c1   :  { %v1748_v19 = vld [vmem:[#allocation2 + $0x52] sm:$0xf]  ;;  %v1732_v9 = vmul.f32 %v6817_v52, %v1720_v44  ;;  %v1015_v0 = vadd.f32 %v1007_v8, %v987_v59  ;;  %v1035_v4 = vmul.f32 %v5331_v28, %v1023_v16  ;;  %v1175_v50 = vmul.f32 %v5378_v49, %v1163_v46  ;;  %v1136_v59 = vld [vmem:[#allocation2 + $0xe1] sm:$0xf] }
 0x1c2   :  { %v6816_v12 = vld [vmem:[#allocation27_spill] sm:$0xff]  ;;  %v1461_v23 = vadd.f32 %v5745_v29, %v1433_v18  ;;  %v1600_v20 = vadd.f32 %v1592_v22, %v1572_v27  ;;  %v5795_v6 = vmul.f32 %v6817_v52, %v1721_v30  ;;  %v5798_v13 = vmul.f32 %v6818_v14, %v1748_v19  ;;  %v1108_v22 = vld [vmem:[#allocation2 + $0xe0] sm:$0xf] }
 0x1c3   :  { %v1127_v32 = vadd.f32 %v1119_v31, %v6816_v12  ;;  %v1191_v63 = vld [vmem:[#allocation2 + $0xd3] sm:$0xf]  ;;  %v1043_v62 = vadd.f32 %v1035_v4, %v1015_v0  ;;  %v1063_v44 = vmul.f32 %v5338_v35, %v1051_v11  ;;  %v5803_v29 = vmul.f32 %v6818_v14, %v1749_v53  ;;  %v6819_v35 = vld [vmem:[#allocation38_spill] sm:$0xff] }
 0x1c4   :  { %v1776_v24 = vld [vmem:[#allocation2 + $0x53] sm:$0xf]  ;;  %v1489_v16 = vadd.f32 %v5749_v51, %v1461_v23  ;;  %v1203_v46 = vmul.f32 %v5385_v61, %v1191_v63  ;;  %v1628_v18 = vadd.f32 %v1620_v43, %v1600_v20  ;;  %v1712_v27 = vadd.f32 %v1704_v7, %v1683_v55  ;;  %v1192_v63 = vld [vmem:[#allocation2 + $0xe3] sm:$0xf] }
 0x1c5   :  { %v1155_v48 = vadd.f32 %v1147_v15, %v1127_v32  ;;  %v1219_v31 = vld [vmem:[#allocation2 + $0xd4] sm:$0xf]  ;;  %v1303_v28 = vld [vmem:[#allocation2 + $0xd0] sm:$0xf]  ;;  %v1071_v30 = vadd.f32 %v1063_v44, %v1043_v62  ;;  %v1091_v19 = vmul.f32 %v5342_v39, %v1079_v36  ;;  %v5808_v11 = vmul.f32 %v6819_v35, %v1776_v24  ;;  %v1164_v15 = vld [vmem:[#allocation2 + $0xe2] sm:$0xf] }
 0x1c6   :  { %v1247_v12 = vld [vmem:[#allocation2 + $0xd5] sm:$0xf]  ;;  %v1331_v32 = vld [vmem:[#allocation2 + $0xd1] sm:$0xf]  ;;  %v1231_v53 = vmul.f32 %v5394_v21, %v1219_v31  ;;  %v1315_v0 = vmul.f32 %v5427_v41, %v1303_v28  ;;  %v1517_v4 = vadd.f32 %v5754_v54, %v1489_v16  ;;  %v1120_v43 = vmul.f32 %v5364_v25, %v1108_v22  ;;  %v1220_v20 = vld [vmem:[#allocation2 + $0xe4] sm:$0xf] }
 0x1c7   :  { %v1183_v8 = vadd.f32 %v1175_v50, %v1155_v48  ;;  %v1099_v23 = vadd.f32 %v1091_v19, %v1071_v30  ;;  %v1148_v7 = vmul.f32 %v5370_v37, %v1136_v59  ;;  %v1275_v55 = vld [vmem:[#allocation2 + $0xd6] sm:$0xf]  ;;  %v1359_v39 = vld [vmem:[#allocation2 + $0xd2] sm:$0xf]  ;;  %v1343_v44 = vmul.f32 %v5439_v2, %v1331_v32  ;;  %v1304_v16 = vld [vmem:[#allocation2 + $0xe0] sm:$0xf] }
 0x1c8   :  { %v6820_v48 = vld [vmem:[#allocation28_spill] sm:$0xff]  ;;  %v1656_v31 = vadd.f32 %v5774_v3, %v1628_v18  ;;  %v5819_v28 = vadd.f32 %v1732_v9, %v1712_v27  ;;  %v1176_v25 = vmul.f32 %v5378_v49, %v1164_v15  ;;  %v1387_v37 = vld [vmem:[#allocation2 + $0xd3] sm:$0xf]  ;;  %v1248_v22 = vld [vmem:[#allocation2 + $0xe5] sm:$0xf]  ;;  %v1371_v19 = vmul.f32 %v5449_v38, %v1359_v39 }
 0x1c9   :  { %v1211_v51 = vadd.f32 %v1203_v46, %v1183_v8  ;;  %v1259_v50 = vmul.f32 %v6820_v48, %v1247_v12  ;;  %v6821_v24 = vld [vmem:[#allocation40_spill] sm:$0xff]  ;;  %v1128_v54 = vadd.f32 %v1120_v43, %v1099_v23  ;;  %v6822_v8 = vld [vmem:[#allocation29_spill] sm:$0xff]  ;;  %v1498_v12 = vld [vmem:[#allocation2 + $0xd0] sm:$0xf]  ;;  %v1204_v3 = vmul.f32 %v5385_v61, %v1192_v63 }
 0x1ca   :  { %v1323_v62 = vadd.f32 %v1315_v0, %v6821_v24  ;;  %v1287_v46 = vmul.f32 %v6822_v8, %v1275_v55  ;;  %v1232_v9 = vmul.f32 %v5394_v21, %v1220_v20  ;;  %v1332_v18 = vld [vmem:[#allocation2 + $0xe1] sm:$0xf]  ;;  %v1415_v27 = vld [vmem:[#allocation2 + $0xd4] sm:$0xf]  ;;  %v1316_v15 = vmul.f32 %v5427_v41, %v1304_v16 }
 0x1cb   :  { %v1239_v36 = vadd.f32 %v1231_v53, %v1211_v51  ;;  %v1545_v51 = vadd.f32 %v5758_v42, %v1517_v4  ;;  %v1156_v32 = vadd.f32 %v1148_v7, %v1128_v54  ;;  %v1399_v0 = vmul.f32 %v6813_v10, %v1387_v37  ;;  %v1526_v23 = vld [vmem:[#allocation2 + $0xd1] sm:$0xf]  ;;  %v1360_v42 = vld [vmem:[#allocation2 + $0xe2] sm:$0xf]  ;;  %v1443_v4 = vld [vmem:[#allocation2 + $0xd5] sm:$0xf] }
 0x1cc   :  { %v1351_v30 = vadd.f32 %v1343_v44, %v1323_v62  ;;  %v1684_v43 = vadd.f32 %v5779_v1, %v1656_v31  ;;  %v1260_v39 = vmul.f32 %v6820_v48, %v1248_v22  ;;  %v1510_v61 = vmul.f32 %v5511_v47, %v1498_v12  ;;  %v1388_v63 = vld [vmem:[#allocation2 + $0xe3] sm:$0xf]  ;;  %v1471_v1 = vld [vmem:[#allocation2 + $0xd6] sm:$0xf] }
 0x1cd   :  { %v1267_v59 = vadd.f32 %v1259_v50, %v1239_v36  ;;  %v1184_v55 = vadd.f32 %v1176_v25, %v1156_v32  ;;  %v1344_v21 = vmul.f32 %v5439_v2, %v1332_v18  ;;  %v1427_v36 = vmul.f32 %v5473_v60, %v1415_v27  ;;  %v1554_v50 = vld [vmem:[#allocation2 + $0xd2] sm:$0xf]  ;;  %v1416_v44 = vld [vmem:[#allocation2 + $0xe4] sm:$0xf]  ;;  %v1499_v12 = vld [vmem:[#allocation2 + $0xe0] sm:$0xf] }
 0x1ce   :  { %v1379_v53 = vadd.f32 %v1371_v19, %v1351_v30  ;;  %v1573_v24 = vadd.f32 %v5762_v56, %v1545_v51  ;;  %v6823_v31 = vld [vmem:[#allocation41_spill] sm:$0xff]  ;;  %v1538_v48 = vmul.f32 %v5518_v5, %v1526_v23  ;;  %v1372_v16 = vmul.f32 %v5449_v38, %v1360_v42  ;;  %v6824_v22 = vld [vmem:[#allocation31_spill] sm:$0xff] }
 0x1cf   :  { %v1295_v49 = vadd.f32 %v1287_v46, %v1267_v59  ;;  %v1212_v62 = vadd.f32 %v1204_v3, %v1184_v55  ;;  %v1518_v54 = vadd.f32 %v1510_v61, %v6823_v31  ;;  %v1455_v59 = vmul.f32 %v6824_v22, %v1443_v4  ;;  %v1582_v46 = vld [vmem:[#allocation2 + $0xd3] sm:$0xf]  ;;  %v1444_v56 = vld [vmem:[#allocation2 + $0xe5] sm:$0xf] }
 0x1d0   :  { %v1407_v20 = vadd.f32 %v1399_v0, %v1379_v53  ;;  %v5840_v30 = vadd.f32 %v5784_v26, %v1684_v43  ;;  %v1400_v19 = vmul.f32 %v6813_v10, %v1388_v63  ;;  %v6825_v32 = vld [vmem:[#allocation33_spill] sm:$0xff]  ;;  %v6826_v53 = vld [vmem:[#allocation32_spill] sm:$0xff]  ;;  %v1610_v23 = vld [vmem:[#allocation2 + $0xd4] sm:$0xf]  ;;  %v5847_v55 = vadd.f32 %v5768_v34, %v1573_v24 }
 0x1d1   :  { %v1324_v7 = vadd.f32 %v1316_v15, %v1295_v49  ;;  %v1546_v51 = vadd.f32 %v1538_v48, %v1518_v54  ;;  %v1566_v3 = vmul.f32 %v6825_v32, %v1554_v50  ;;  %v1276_v18 = vld [vmem:[#allocation2 + $0xe6] sm:$0xf]  ;;  %v1428_v49 = vmul.f32 %v5473_v60, %v1416_v44  ;;  %v1527_v26 = vld [vmem:[#allocation2 + $0xe1] sm:$0xf]  ;;  %v1305_v50 = vld [vmem:[#allocation2 + $0xf0] sm:$0xf] }
 0x1d2   :  { %v1435_v37 = vadd.f32 %v1427_v36, %v1407_v20  ;;  %v1483_v0 = vmul.f32 %v6826_v53, %v1471_v1  ;;  %v1555_v43 = vld [vmem:[#allocation2 + $0xe2] sm:$0xf]  ;;  %v1594_v4 = vmul.f32 %v5524_v33, %v1582_v46  ;;  %v1240_v61 = vadd.f32 %v1232_v9, %v1212_v62  ;;  %v1472_v44 = vld [vmem:[#allocation2 + $0xe6] sm:$0xf]  ;;  %v1638_v62 = vld [vmem:[#allocation2 + $0xd5] sm:$0xf] }
 0x1d3   :  { %v1352_v25 = vadd.f32 %v1344_v21, %v1324_v7  ;;  %v1574_v42 = vadd.f32 %v1566_v3, %v1546_v51  ;;  %v1456_v21 = vmul.f32 %v6824_v22, %v1444_v56  ;;  %v1511_v20 = vmul.f32 %v5511_v47, %v1499_v12  ;;  %v1583_v36 = vld [vmem:[#allocation2 + $0xe3] sm:$0xf]  ;;  %v1666_v56 = vld [vmem:[#allocation2 + $0xd6] sm:$0xf]  ;;  %v1500_v3 = vld [vmem:[#allocation2 + $0xf0] sm:$0xf] }
 0x1d4   :  { %v1463_v15 = vadd.f32 %v1455_v59, %v1435_v37  ;;  %v1611_v31 = vld [vmem:[#allocation2 + $0xe4] sm:$0xf]  ;;  %v1622_v34 = vmul.f32 %v5529_v40, %v1610_v23  ;;  %v1268_v24 = vadd.f32 %v1260_v39, %v1240_v61  ;;  %v1288_v54 = vmul.f32 %v6822_v8, %v1276_v18  ;;  %v1333_v37 = vld [vmem:[#allocation2 + $0xf1] sm:$0xf]  ;;  %v1695_v18 = vld [vmem:[#allocation2 + $0xe0] sm:$0xf] }
 0x1d5   :  { %v1380_v27 = vadd.f32 %v1372_v16, %v1352_v25  ;;  %v1602_v1 = vadd.f32 %v1594_v4, %v1574_v42  ;;  %v1539_v25 = vmul.f32 %v5518_v5, %v1527_v26  ;;  %v1567_v9 = vmul.f32 %v6825_v32, %v1555_v43  ;;  %v1639_v16 = vld [vmem:[#allocation2 + $0xe5] sm:$0xf]  ;;  %v1389_v42 = vld [vmem:[#allocation2 + $0xf3] sm:$0xf] }
 0x1d6   :  { %v1491_v63 = vadd.f32 %v1483_v0, %v1463_v15  ;;  %v1595_v46 = vmul.f32 %v5524_v33, %v1583_v36  ;;  %v1296_v12 = vadd.f32 %v1288_v54, %v1268_v24  ;;  %v1317_v51 = vmul.f32 %v5427_v41, %v1305_v50  ;;  %v1528_v4 = vld [vmem:[#allocation2 + $0xf1] sm:$0xf] }
 0x1d7   :  { %v1408_v7 = vadd.f32 %v1400_v19, %v1380_v27  ;;  %v1630_v19 = vadd.f32 %v1622_v34, %v1602_v1  ;;  %v1623_v8 = vmul.f32 %v5529_v40, %v1611_v31  ;;  %v1361_v27 = vld [vmem:[#allocation2 + $0xf2] sm:$0xf]  ;;  %v1484_v0 = vmul.f32 %v6826_v53, %v1472_v44  ;;  %v1501_v34 = vld [vmem:[#allocation2 + $0x100] sm:$0xf] }
 0x1d8   :  { %v1519_v48 = vadd.f32 %v1511_v20, %v1491_v63  ;;  %v1650_v23 = vmul.f32 %v5532_v17, %v1638_v62  ;;  %v1325_v26 = vadd.f32 %v1317_v51, %v1296_v12  ;;  %v1345_v43 = vmul.f32 %v5439_v2, %v1333_v37  ;;  %v1445_v63 = vld [vmem:[#allocation2 + $0xf5] sm:$0xf]  ;;  %v1557_v62 = vld [vmem:[#allocation2 + $0x102] sm:$0xf]  ;;  %v1667_v51 = vld [vmem:[#allocation2 + $0xe6] sm:$0xf] }
 0x1d9   :  { %v1436_v59 = vadd.f32 %v1428_v49, %v1408_v7  ;;  %v1651_v49 = vmul.f32 %v5532_v17, %v1639_v16  ;;  %v1678_v41 = vmul.f32 %v5539_v45, %v1666_v56  ;;  %v1417_v7 = vld [vmem:[#allocation2 + $0xf4] sm:$0xf]  ;;  %v5866_v44 = vmul.f32 %v6814_v57, %v1695_v18  ;;  %v1585_v12 = vld [vmem:[#allocation2 + $0x103] sm:$0xf] }
 0x1da   :  { %v1547_v39 = vadd.f32 %v1539_v25, %v1519_v48  ;;  %v1473_v20 = vld [vmem:[#allocation2 + $0xf6] sm:$0xf]  ;;  %v1658_v50 = vadd.f32 %v1650_v23, %v1630_v19  ;;  %v1353_v1 = vadd.f32 %v1345_v43, %v1325_v26  ;;  %v1373_v31 = vmul.f32 %v5449_v38, %v1361_v27  ;;  %v1556_v2 = vld [vmem:[#allocation2 + $0xf2] sm:$0xf]  ;;  %v1529_v25 = vld [vmem:[#allocation2 + $0x101] sm:$0xf] }
 0x1db   :  { %v1464_v15 = vadd.f32 %v1456_v21, %v1436_v59  ;;  %v1512_v21 = vmul.f32 %v5511_v47, %v1500_v3  ;;  %v1401_v54 = vmul.f32 %v6813_v10, %v1389_v42  ;;  %v1429_v37 = vmul.f32 %v5473_v60, %v1417_v7  ;;  %v1584_v56 = vld [vmem:[#allocation2 + $0xf3] sm:$0xf]  ;;  %v1719_v38 = vld [vmem:[#allocation2 + $0x41] sm:$0xf] }
 0x1dc   :  { %v1575_v61 = vadd.f32 %v1567_v9, %v1547_v39  ;;  %v1540_v9 = vmul.f32 %v5518_v5, %v1528_v4  ;;  %v1381_v16 = vadd.f32 %v1373_v31, %v1353_v1  ;;  %v1457_v59 = vmul.f32 %v6824_v22, %v1445_v63  ;;  %v1612_v22 = vld [vmem:[#allocation2 + $0xf4] sm:$0xf]  ;;  %v1747_v43 = vld [vmem:[#allocation2 + $0x42] sm:$0xf] }
 0x1dd   :  { %v1492_v36 = vadd.f32 %v1484_v0, %v1464_v15  ;;  %v1485_v19 = vmul.f32 %v6826_v53, %v1473_v20  ;;  %v1568_v10 = vmul.f32 %v6825_v32, %v1556_v2  ;;  %v5876_v18 = vadd.f32 %v1678_v41, %v1658_v50  ;;  %v1640_v53 = vld [vmem:[#allocation2 + $0xf5] sm:$0xf]  ;;  %v1697_v1 = vld [vmem:[#allocation2 + $0x100] sm:$0xf] }
 0x1de   :  { %v1603_v24 = vadd.f32 %v1595_v46, %v1575_v61  ;;  %v1513_v46 = vmul.f32 %v5511_v47, %v1501_v34  ;;  %v1409_v27 = vadd.f32 %v1401_v54, %v1381_v16  ;;  %v1541_v15 = vmul.f32 %v5518_v5, %v1529_v25  ;;  %v1804_v42 = vld [vmem:[#allocation2 + $0x54] sm:$0xf]  ;;  %v6827_v5 = vld [vmem:[#allocation30_spill] sm:$0xff] }
 0x1df   :  { %v1520_v48 = vadd.f32 %v1512_v21, %v1492_v36  ;;  %v5880_v60 = vmul.f32 %v6825_v32, %v1557_v62  ;;  %v1596_v23 = vmul.f32 %v5524_v33, %v1584_v56  ;;  %v5884_v26 = vmul.f32 %v5524_v33, %v1585_v12  ;;  %v1668_v4 = vld [vmem:[#allocation2 + $0xf6] sm:$0xf]  ;;  %v1696_v36 = vld [vmem:[#allocation2 + $0xf0] sm:$0xf]  ;;  %v6828_v25 = vld [vmem:[#allocation42_spill] sm:$0xff] }
 0x1e0   :  { %v1631_v39 = vadd.f32 %v1623_v8, %v1603_v24  ;;  %v1437_v8 = vadd.f32 %v1429_v37, %v1409_v27  ;;  %v1679_v61 = vmul.f32 %v5539_v45, %v1667_v51  ;;  %v1711_v41 = vadd.f32 %v6827_v5, %v5764_v58  ;;  %v1832_v2 = vld [vmem:[#allocation2 + $0x55] sm:$0xf] }
 0x1e1   :  { %v1548_v3 = vadd.f32 %v1540_v9, %v1520_v48  ;;  %v1731_v32 = vmul.f32 %v6817_v52, %v1719_v38  ;;  %v1624_v63 = vmul.f32 %v5529_v40, %v1612_v22  ;;  %v1652_v20 = vmul.f32 %v5532_v17, %v1640_v53  ;;  %v1803_v48 = vld [vmem:[#allocation2 + $0x44] sm:$0xf]  ;;  %v1752_v38 = vld [vmem:[#allocation2 + $0xf2] sm:$0xf] }
 0x1e2   :  { %v1659_v47 = vadd.f32 %v1651_v49, %v1631_v39  ;;  %v1768_v33 = vadd.f32 %v5798_v13, %v5819_v28  ;;  %v1775_v49 = vld [vmem:[#allocation2 + $0x43] sm:$0xf]  ;;  %v1465_v21 = vadd.f32 %v1457_v59, %v1437_v8  ;;  %v1759_v34 = vmul.f32 %v6818_v14, %v1747_v43  ;;  %v1724_v13 = vld [vmem:[#allocation2 + $0xf1] sm:$0xf]  ;;  %v1860_v59 = vld [vmem:[#allocation2 + $0x56] sm:$0xf] }
 0x1e3   :  { %v1576_v0 = vadd.f32 %v1568_v10, %v1548_v3  ;;  %v1739_v31 = vadd.f32 %v1731_v32, %v1711_v41  ;;  %v1680_v24 = vmul.f32 %v5539_v45, %v1668_v4  ;;  %v1816_v9 = vmul.f32 %v6828_v25, %v1804_v42  ;;  %v1831_v3 = vld [vmem:[#allocation2 + $0x45] sm:$0xf]  ;;  %v6829_v10 = vld [vmem:[#allocation43_spill] sm:$0xff]  ;;  %v6830_v8 = vld [vmem:[#allocation44_spill] sm:$0xff] }
 0x1e4   :  { %v1687_v50 = vadd.f32 %v1679_v61, %v1659_v47  ;;  %v1796_v54 = vadd.f32 %v5808_v11, %v1768_v33  ;;  %v1493_v62 = vadd.f32 %v1485_v19, %v1465_v21  ;;  %v1708_v16 = vmul.f32 %v6814_v57, %v1696_v36  ;;  %v1780_v22 = vld [vmem:[#allocation2 + $0xf3] sm:$0xf]  ;;  %v1859_v42 = vld [vmem:[#allocation2 + $0x46] sm:$0xf] }
 0x1e5   :  { %v1604_v7 = vadd.f32 %v1596_v23, %v1576_v0  ;;  %v1767_v28 = vadd.f32 %v1759_v34, %v1739_v31  ;;  %v1787_v37 = vmul.f32 %v6819_v35, %v1775_v49  ;;  %v1709_v12 = vmul.f32 %v6814_v57, %v1697_v1  ;;  %v1889_v0 = vld [vmem:[#allocation2 + $0x60] sm:$0xf] }
 0x1e6   :  { %v1824_v51 = vadd.f32 %v1816_v9, %v1796_v54  ;;  %v1844_v39 = vmul.f32 %v6829_v10, %v1832_v2  ;;  %v1521_v11 = vadd.f32 %v1513_v46, %v1493_v62  ;;  %v1716_v27 = vadd.f32 %v1708_v16, %v1687_v50  ;;  %v1888_v46 = vld [vmem:[#allocation2 + $0x50] sm:$0xf]  ;;  %v6832_v49 = vld [vmem:[#allocation45_spill] sm:$0xff]  ;;  %v2000_v54 = vld [vmem:[#allocation2 + $0x54] sm:$0xf] }
 0x1e7   :  { %v1632_v58 = vadd.f32 %v1624_v63, %v1604_v7  ;;  %v1795_v53 = vadd.f32 %v1787_v37, %v1767_v28  ;;  %v1815_v19 = vmul.f32 %v6828_v25, %v1803_v48  ;;  %v1736_v47 = vmul.f32 %v6817_v52, %v1724_v13  ;;  %v1916_v7 = vld [vmem:[#allocation2 + $0x51] sm:$0xf]  ;;  %v1917_v63 = vld [vmem:[#allocation2 + $0x61] sm:$0xf]  ;;  %v6833_v62 = vld [vmem:[#allocation46_spill] sm:$0xff] }
 0x1e8   :  { %v1852_v43 = vadd.f32 %v1844_v39, %v1824_v51  ;;  %v1872_v4 = vmul.f32 %v6830_v8, %v1860_v59  ;;  %v1549_v61 = vadd.f32 %v1541_v15, %v1521_v11  ;;  %v1764_v5 = vmul.f32 %v6818_v14, %v1752_v38  ;;  %v1944_v50 = vld [vmem:[#allocation2 + $0x52] sm:$0xf]  ;;  %v1945_v1 = vld [vmem:[#allocation2 + $0x62] sm:$0xf]  ;;  %v2056_v39 = vld [vmem:[#allocation2 + $0x56] sm:$0xf] }
 0x1e9   :  { %v1660_v56 = vadd.f32 %v1652_v20, %v1632_v58  ;;  %v1823_v41 = vadd.f32 %v1815_v19, %v1795_v53  ;;  %v1843_v32 = vmul.f32 %v6829_v10, %v1831_v3  ;;  %v1792_v36 = vmul.f32 %v6819_v35, %v1780_v22  ;;  %v1972_v58 = vld [vmem:[#allocation2 + $0x53] sm:$0xf]  ;;  %v2001_v28 = vld [vmem:[#allocation2 + $0x64] sm:$0xf] }
 0x1ea   :  { %v1880_v33 = vadd.f32 %v1872_v4, %v1852_v43  ;;  %v1901_v21 = vmul.f32 %v6832_v49, %v1889_v0  ;;  %v1577_v31 = vadd.f32 %v5880_v60, %v1549_v61  ;;  %v1744_v15 = vadd.f32 %v1736_v47, %v1716_v27  ;;  %v2028_v37 = vld [vmem:[#allocation2 + $0x55] sm:$0xf]  ;;  %v2029_v59 = vld [vmem:[#allocation2 + $0x65] sm:$0xf]  ;;  %v2085_v47 = vld [vmem:[#allocation2 + $0x60] sm:$0xf] }
 0x1eb   :  { %v1688_v23 = vadd.f32 %v1680_v24, %v1660_v56  ;;  %v1851_v34 = vadd.f32 %v1843_v32, %v1823_v41  ;;  %v1871_v2 = vmul.f32 %v6830_v8, %v1859_v42  ;;  %v1973_v24 = vld [vmem:[#allocation2 + $0x63] sm:$0xf]  ;;  %v1900_v48 = vmul.f32 %v6832_v49, %v1888_v46  ;;  %v6835_v38 = vld [vmem:[#allocation47_spill] sm:$0xff]  ;;  %v6836_v27 = vld [vmem:[#allocation48_spill] sm:$0xff] }
 0x1ec   :  { %v1909_v9 = vadd.f32 %v1901_v21, %v1880_v33  ;;  %v1928_v16 = vmul.f32 %v6833_v62, %v1916_v7  ;;  %v1929_v13 = vmul.f32 %v6833_v62, %v1917_v63  ;;  %v1723_v56 = vld [vmem:[#allocation2 + $0xe1] sm:$0xf]  ;;  %v5917_v60 = vadd.f32 %v5884_v26, %v1577_v31  ;;  %v6838_v26 = vld [vmem:[#allocation50_spill] sm:$0xff]  ;;  %v1808_v46 = vld [vmem:[#allocation2 + $0xf4] sm:$0xf] }
 0x1ed   :  { %v5907_v20 = vadd.f32 %v1709_v12, %v1688_v23  ;;  %v1879_v12 = vadd.f32 %v1871_v2, %v1851_v34  ;;  %v1956_v51 = vmul.f32 %v6835_v38, %v1944_v50  ;;  %v1957_v3 = vmul.f32 %v6835_v38, %v1945_v1  ;;  %v6837_v19 = vld [vmem:[#allocation49_spill] sm:$0xff]  ;;  %v6839_v63 = vld [vmem:[#allocation51_spill] sm:$0xff]  ;;  %v6840_v2 = vld [vmem:[#allocation52_spill] sm:$0xff] }
 0x1ee   :  { %6834 = vst [vmem:[#allocation27_spill] sm:$0xff] %v5917_v60  ;;  %v1937_v11 = vadd.f32 %v1929_v13, %v1909_v9  ;;  %v1984_v22 = vmul.f32 %v6836_v27, %v1972_v58  ;;  %v1985_v53 = vmul.f32 %v6836_v27, %v1973_v24  ;;  %v2012_v0 = vmul.f32 %v6837_v19, %v2000_v54  ;;  %v2057_v23 = vld [vmem:[#allocation2 + $0x66] sm:$0xf]  ;;  %v2113_v41 = vld [vmem:[#allocation2 + $0x61] sm:$0xf] }
 0x1ef   :  { %6831 = vst [vmem:[#allocation35_spill] sm:$0xff] %v5907_v20  ;;  %v1908_v43 = vadd.f32 %v1900_v48, %v1879_v12  ;;  %v2013_v42 = vmul.f32 %v6837_v19, %v2001_v28  ;;  %v2040_v4 = vmul.f32 %v6838_v26, %v2028_v37  ;;  %v2041_v61 = vmul.f32 %v6838_v26, %v2029_v59  ;;  %v1751_v32 = vld [vmem:[#allocation2 + $0xe2] sm:$0xf] }
 0x1f0   :  { %v1965_v7 = vadd.f32 %v1957_v3, %v1937_v11  ;;  %v5928_v33 = vmul.f32 %v6839_v63, %v2056_v39  ;;  %v2141_v21 = vld [vmem:[#allocation2 + $0x62] sm:$0xf]  ;;  %v1715_v50 = vadd.f32 %v5866_v44, %v5876_v18  ;;  %v1735_v1 = vmul.f32 %v6817_v52, %v1723_v56  ;;  %v1836_v44 = vld [vmem:[#allocation2 + $0xf5] sm:$0xf]  ;;  %v6842_v56 = vld [vmem:[#allocation54_spill] sm:$0xff] }
 0x1f1   :  { %v1936_v31 = vadd.f32 %v1928_v16, %v1908_v43  ;;  %v2069_v34 = vmul.f32 %v6839_v63, %v2057_v23  ;;  %v5935_v58 = vmul.f32 %v6840_v2, %v2085_v47  ;;  %v2169_v24 = vld [vmem:[#allocation2 + $0x63] sm:$0xf]  ;;  %v1772_v54 = vadd.f32 %v1764_v5, %v1744_v15  ;;  %v6843_v15 = vld [vmem:[#allocation56_spill] sm:$0xff] }
 0x1f2   :  { %v1779_v48 = vld [vmem:[#allocation2 + $0xe3] sm:$0xf]  ;;  %v1993_v9 = vadd.f32 %v1985_v53, %v1965_v7  ;;  %v1743_v59 = vadd.f32 %v1735_v1, %v1715_v50  ;;  %v1763_v12 = vmul.f32 %v6818_v14, %v1751_v32  ;;  %v5942_v16 = vmul.f32 %v6842_v56, %v2141_v21  ;;  %v1864_v7 = vld [vmem:[#allocation2 + $0xf6] sm:$0xf] }
 0x1f3   :  { %v6841_v13 = vld [vmem:[#allocation53_spill] sm:$0xff]  ;;  %v1964_v18 = vadd.f32 %v1956_v51, %v1936_v31  ;;  %v1800_v39 = vadd.f32 %v1792_v36, %v1772_v54  ;;  %v1820_v23 = vmul.f32 %v6828_v25, %v1808_v46  ;;  %v5946_v53 = vmul.f32 %v6843_v15, %v2169_v24  ;;  %v6845_v46 = vld [vmem:[#allocation60_spill] sm:$0xff] }
 0x1f4   :  { %v5938_v28 = vmul.f32 %v6841_v13, %v2113_v41  ;;  %v2197_v37 = vld [vmem:[#allocation2 + $0x64] sm:$0xf]  ;;  %v2021_v5 = vadd.f32 %v2013_v42, %v1993_v9  ;;  %v1771_v43 = vadd.f32 %v1763_v12, %v1743_v59  ;;  %v1791_v41 = vmul.f32 %v6819_v35, %v1779_v48  ;;  %v1892_v59 = vld [vmem:[#allocation2 + $0xf0] sm:$0xf]  ;;  %v1893_v12 = vld [vmem:[#allocation2 + $0x100] sm:$0xf] }
 0x1f5   :  { %v2225_v3 = vld [vmem:[#allocation2 + $0x65] sm:$0xf]  ;;  %v1992_v32 = vadd.f32 %v1984_v22, %v1964_v18  ;;  %v1828_v21 = vadd.f32 %v1820_v23, %v1800_v39  ;;  %v1848_v36 = vmul.f32 %v6829_v10, %v1836_v44  ;;  %v1876_v18 = vmul.f32 %v6830_v8, %v1864_v7  ;;  %v1920_v39 = vld [vmem:[#allocation2 + $0xf1] sm:$0xf]  ;;  %v1921_v23 = vld [vmem:[#allocation2 + $0x101] sm:$0xf] }
 0x1f6   :  { %v1807_v11 = vld [vmem:[#allocation2 + $0xe4] sm:$0xf]  ;;  %v2049_v54 = vadd.f32 %v2041_v61, %v2021_v5  ;;  %v5954_v42 = vmul.f32 %v6845_v46, %v2225_v3  ;;  %v1799_v24 = vadd.f32 %v1791_v41, %v1771_v43  ;;  %v1948_v5 = vld [vmem:[#allocation2 + $0xf2] sm:$0xf] }
 0x1f7   :  { %v2253_v47 = vld [vmem:[#allocation2 + $0x66] sm:$0xf]  ;;  %v1819_v9 = vmul.f32 %v6828_v25, %v1807_v11  ;;  %v2020_v48 = vadd.f32 %v2012_v0, %v1992_v32  ;;  %v1949_v43 = vld [vmem:[#allocation2 + $0x102] sm:$0xf]  ;;  %v1904_v0 = vmul.f32 %v6832_v49, %v1892_v59  ;;  %v1976_v32 = vld [vmem:[#allocation2 + $0xf3] sm:$0xf] }
 0x1f8   :  { %v6844_v50 = vld [vmem:[#allocation57_spill] sm:$0xff]  ;;  %v2077_v44 = vadd.f32 %v2069_v34, %v2049_v54  ;;  %v1932_v34 = vmul.f32 %v6833_v62, %v1920_v39  ;;  %v1933_v54 = vmul.f32 %v6833_v62, %v1921_v23  ;;  %v1961_v59 = vmul.f32 %v6835_v38, %v1949_v43 }
 0x1f9   :  { %v5950_v51 = vmul.f32 %v6844_v50, %v2197_v37  ;;  %v1835_v1 = vld [vmem:[#allocation2 + $0xe5] sm:$0xf]  ;;  %v1856_v37 = vadd.f32 %v1848_v36, %v1828_v21  ;;  %v1827_v60 = vadd.f32 %v1819_v9, %v1799_v24  ;;  %v2048_v11 = vadd.f32 %v2040_v4, %v2020_v48  ;;  %v2032_v48 = vld [vmem:[#allocation2 + $0xf5] sm:$0xf]  ;;  %v2089_v43 = vld [vmem:[#allocation2 + $0x100] sm:$0xf] }
 0x1fa   :  { %v1863_v31 = vld [vmem:[#allocation2 + $0xe6] sm:$0xf]  ;;  %v1847_v61 = vmul.f32 %v6829_v10, %v1835_v1  ;;  %v2004_v1 = vld [vmem:[#allocation2 + $0xf4] sm:$0xf]  ;;  %v1960_v4 = vmul.f32 %v6835_v38, %v1948_v5 }
 0x1fb   :  { %v6846_v20 = vld [vmem:[#allocation61_spill] sm:$0xff]  ;;  %v1875_v3 = vmul.f32 %v6830_v8, %v1863_v31  ;;  %v1884_v41 = vadd.f32 %v1876_v18, %v1856_v37  ;;  %v6847_v36 = vld [vmem:[#allocation58_spill] sm:$0xff]  ;;  %v2076_v31 = vadd.f32 %v5928_v33, %v2048_v11  ;;  %v6848_v37 = vld [vmem:[#allocation59_spill] sm:$0xff]  ;;  %v2016_v33 = vmul.f32 %v6837_v19, %v2004_v1 }
 0x1fc   :  { %v5958_v22 = vmul.f32 %v6846_v20, %v2253_v47  ;;  %v1905_v47 = vmul.f32 %v6832_v49, %v1893_v12  ;;  %v1977_v21 = vld [vmem:[#allocation2 + $0x103] sm:$0xf]  ;;  %v2106_v7 = vadd.f32 %v6847_v36, %v2077_v44  ;;  %v1855_v50 = vadd.f32 %v1847_v61, %v1827_v60  ;;  %v2060_v44 = vld [vmem:[#allocation2 + $0xf6] sm:$0xf] }
 0x1fd   :  { %v2005_v24 = vld [vmem:[#allocation2 + $0x104] sm:$0xf]  ;;  %v1988_v60 = vmul.f32 %v6836_v27, %v1976_v32  ;;  %v1989_v39 = vmul.f32 %v6836_v27, %v1977_v21  ;;  %v2105_v61 = vadd.f32 %v5935_v58, %v2076_v31  ;;  %v2072_v58 = vmul.f32 %v6839_v63, %v2060_v44  ;;  %v6850_v31 = vld [vmem:[#allocation64_spill] sm:$0xff] }
 0x1fe   :  { %v1913_v9 = vadd.f32 %v1905_v47, %v1884_v41  ;;  %v2033_v12 = vld [vmem:[#allocation2 + $0x105] sm:$0xf]  ;;  %v2134_v18 = vadd.f32 %v6848_v37, %v2106_v7  ;;  %v1883_v20 = vadd.f32 %v1875_v3, %v1855_v50  ;;  %v2017_v5 = vmul.f32 %v6837_v19, %v2005_v24 }
 0x1ff   :  { %v1609_v23 = vld [vmem:[#allocation2 + $0x64] sm:$0xf]  ;;  %v6849_v41 = vld [vmem:[#allocation62_spill] sm:$0xff]  ;;  %v2044_v50 = vmul.f32 %v6838_v26, %v2032_v48  ;;  %v2045_v3 = vmul.f32 %v6838_v26, %v2033_v12  ;;  %v2133_v21 = vadd.f32 %v5938_v28, %v2105_v61 }
 0x200   :  { %v1941_v36 = vadd.f32 %v1933_v54, %v1913_v9  ;;  %v2061_v11 = vld [vmem:[#allocation2 + $0x106] sm:$0xf]  ;;  %v2162_v47 = vadd.f32 %v6849_v41, %v2134_v18  ;;  %v1912_v15 = vadd.f32 %v1904_v0, %v1883_v20  ;;  %v1621_v54 = vmul.f32 %v5529_v40, %v1609_v23  ;;  %v1694_v0 = vld [vmem:[#allocation2 + $0x70] sm:$0xf] }
 0x201   :  { %v1637_v32 = vld [vmem:[#allocation2 + $0x65] sm:$0xf]  ;;  %v2073_v37 = vmul.f32 %v6839_v63, %v2061_v11  ;;  %v2101_v20 = vmul.f32 %v6840_v2, %v2089_v43  ;;  %v2161_v12 = vadd.f32 %v5942_v16, %v2133_v21  ;;  %v1722_v41 = vld [vmem:[#allocation2 + $0x71] sm:$0xf]  ;;  %v1706_v16 = vmul.f32 %v6814_v57, %v1694_v0 }
 0x202   :  { %v1969_v7 = vadd.f32 %v1961_v59, %v1941_v36  ;;  %v1665_v1 = vld [vmem:[#allocation2 + $0x66] sm:$0xf]  ;;  %v2190_v24 = vadd.f32 %v6850_v31, %v2162_v47  ;;  %v1940_v9 = vadd.f32 %v1932_v34, %v1912_v15  ;;  %v1629_v28 = vadd.f32 %v1621_v54, %v5847_v55 }
 0x203   :  { %v1777_v48 = vld [vmem:[#allocation2 + $0x63] sm:$0xf]  ;;  %v1649_v59 = vmul.f32 %v5532_v17, %v1637_v32  ;;  %v1677_v36 = vmul.f32 %v5539_v45, %v1665_v1  ;;  %v1741_v15 = vadd.f32 %v5795_v6, %v5840_v30  ;;  %v2189_v34 = vadd.f32 %v5946_v53, %v2161_v12  ;;  %v6852_v47 = vld [vmem:[#allocation66_spill] sm:$0xff]  ;;  %v1750_v32 = vld [vmem:[#allocation2 + $0x72] sm:$0xf] }
 0x204   :  { %v1997_v18 = vadd.f32 %v1989_v39, %v1969_v7  ;;  %v6851_v44 = vld [vmem:[#allocation65_spill] sm:$0xff]  ;;  %v1968_v23 = vadd.f32 %v1960_v4, %v1940_v9  ;;  %v1789_v4 = vmul.f32 %v6819_v35, %v1777_v48  ;;  %v1734_v6 = vmul.f32 %v6817_v52, %v1722_v41  ;;  %v1778_v30 = vld [vmem:[#allocation2 + $0x73] sm:$0xf] }
 0x205   :  { %v2218_v61 = vadd.f32 %v6851_v44, %v2190_v24  ;;  %v1657_v43 = vadd.f32 %v1649_v59, %v1629_v28  ;;  %v1805_v39 = vld [vmem:[#allocation2 + $0x64] sm:$0xf]  ;;  %v1769_v7 = vadd.f32 %v5803_v29, %v1741_v15  ;;  %v2217_v54 = vadd.f32 %v5950_v51, %v2189_v34  ;;  %v1890_v51 = vld [vmem:[#allocation2 + $0x70] sm:$0xf]  ;;  %v1806_v44 = vld [vmem:[#allocation2 + $0x74] sm:$0xf] }
 0x206   :  { %v2025_v11 = vadd.f32 %v2017_v5, %v1997_v18  ;;  %v1996_v21 = vadd.f32 %v1988_v60, %v1968_v23  ;;  %v1833_v53 = vld [vmem:[#allocation2 + $0x65] sm:$0xf]  ;;  %v6853_v5 = vld [vmem:[#allocation67_spill] sm:$0xff]  ;;  %v1817_v12 = vmul.f32 %v6828_v25, %v1805_v39  ;;  %v1762_v48 = vmul.f32 %v6818_v14, %v1750_v32 }
 0x207   :  { %v2246_v55 = vadd.f32 %v6852_v47, %v2218_v61  ;;  %v1685_v31 = vadd.f32 %v1677_v36, %v1657_v43  ;;  %v1797_v0 = vadd.f32 %v1789_v4, %v1769_v7  ;;  %v2245_v60 = vadd.f32 %v5954_v42, %v2217_v54  ;;  %v1861_v28 = vld [vmem:[#allocation2 + $0x66] sm:$0xf]  ;;  %v6854_v36 = vld [vmem:[#allocation68_spill] sm:$0xff]  ;;  %v2145_v7 = vld [vmem:[#allocation2 + $0x102] sm:$0xf] }
 0x208   :  { %v2053_v1 = vadd.f32 %v2045_v3, %v2025_v11  ;;  %v2024_v9 = vadd.f32 %v2016_v33, %v1996_v21  ;;  %v1790_v59 = vmul.f32 %v6819_v35, %v1778_v30  ;;  %v1845_v23 = vmul.f32 %v6829_v10, %v1833_v53  ;;  %v6855_v15 = vld [vmem:[#allocation69_spill] sm:$0xff]  ;;  %v1918_v11 = vld [vmem:[#allocation2 + $0x71] sm:$0xf]  ;;  %v6856_v21 = vld [vmem:[#allocation70_spill] sm:$0xff] }
 0x209   :  { %v2274_v24 = vadd.f32 %v6853_v5, %v2246_v55  ;;  %v1714_v29 = vadd.f32 %v1706_v16, %v1685_v31  ;;  %v1825_v61 = vadd.f32 %v1817_v12, %v1797_v0  ;;  %v2273_v33 = vadd.f32 %v5958_v22, %v2245_v60  ;;  %v1834_v16 = vld [vmem:[#allocation2 + $0x75] sm:$0xf]  ;;  %v6016_v55 = vld [vmem:[%s6680_s6] ss:$0 sm:$0xff]  ;;  %v2173_v12 = vld [vmem:[#allocation2 + $0x103] sm:$0xf] }
 0x20a   :  { %v2081_v18 = vadd.f32 %v2073_v37, %v2053_v1  ;;  %v2052_v3 = vadd.f32 %v2044_v50, %v2024_v9  ;;  %v2117_v37 = vld [vmem:[#allocation2 + $0x101] sm:$0xf]  ;;  %v1873_v50 = vmul.f32 %v6830_v8, %v1861_v28  ;;  %v1902_v47 = vmul.f32 %v6832_v49, %v1890_v51  ;;  %v1946_v54 = vld [vmem:[#allocation2 + $0x72] sm:$0xf]  ;;  %v1862_v30 = vld [vmem:[#allocation2 + $0x76] sm:$0xf] }
 0x20b   :  { %v6008_v41 = vadd.f32 %v6854_v36, %v2274_v24  ;;  %v1742_v34 = vadd.f32 %v1734_v6, %v1714_v29  ;;  %v1853_v39 = vadd.f32 %v1845_v23, %v1825_v61  ;;  %v6019_v22 = vadd.f32 %v6016_v55, %v2273_v33  ;;  %v2230_v6 = vld [vmem:[#allocation2 + $0x115] sm:$0xf]  ;;  %v1891_v51 = vld [vmem:[#allocation2 + $0x80] sm:$0xf]  ;;  %v2201_v33 = vld [vmem:[#allocation2 + $0x104] sm:$0xf] }
 0x20c   :  { %v2110_v42 = vadd.f32 %v6855_v15, %v2081_v18  ;;  %v2080_v43 = vadd.f32 %v2072_v58, %v2052_v3  ;;  %v1818_v58 = vmul.f32 %v6828_v25, %v1806_v44  ;;  %v2129_v31 = vmul.f32 %v6841_v13, %v2117_v37  ;;  %v6857_v9 = vld [vmem:[#allocation71_spill] sm:$0xff]  ;;  %v6858_v61 = vld [vmem:[#allocation72_spill] sm:$0xff] }
 0x20d   :  { %v1770_v4 = vadd.f32 %v1762_v48, %v1742_v34  ;;  %v1881_v53 = vadd.f32 %v1873_v50, %v1853_v39  ;;  %v1930_v5 = vmul.f32 %v6833_v62, %v1918_v11  ;;  %v2306_v24 = vcombine.low %v6019_v22, %v6008_v41  ;;  %v1974_v29 = vld [vmem:[#allocation2 + $0x73] sm:$0xf]  ;;  %v6859_v11 = vld [vmem:[#allocation56_spill] sm:$0xff] }
 0x20e   :  { %v2138_v32 = vadd.f32 %v6856_v21, %v2110_v42  ;;  %v2109_v1 = vadd.f32 %v2101_v20, %v2080_v43  ;;  %v1846_v18 = vmul.f32 %v6829_v10, %v1834_v16  ;;  %v2157_v20 = vmul.f32 %v6842_v56, %v2145_v7  ;;  %v2258_v28 = vld [vmem:[#allocation2 + $0x116] sm:$0xf]  ;;  %v1919_v16 = vld [vmem:[#allocation2 + $0x81] sm:$0xf] }
 0x20f   :  { %v1798_v60 = vadd.f32 %v1790_v59, %v1770_v4  ;;  %v1910_v3 = vadd.f32 %v1902_v47, %v1881_v53  ;;  %v1958_v44 = vmul.f32 %v6835_v38, %v1946_v54  ;;  %2314 = vadd.xlane.f32.xlu0 %v2306_v24  ;;  %v2242_v15 = vmul.f32 %v6845_v46, %v2230_v6  ;;  %v2002_v37 = vld [vmem:[#allocation2 + $0x74] sm:$0xf]  ;;  %v6860_v47 = vld [vmem:[#allocation73_spill] sm:$0xff] }
 0x210   :  { %v2166_v0 = vadd.f32 %v6857_v9, %v2138_v32  ;;  %v2137_v48 = vadd.f32 %v2129_v31, %v2109_v1  ;;  %v1874_v59 = vmul.f32 %v6830_v8, %v1862_v30  ;;  %v2185_v43 = vmul.f32 %v6859_v11, %v2173_v12  ;;  %v2229_v32 = vld [vmem:[#allocation2 + $0x105] sm:$0xf]  ;;  %v2030_v31 = vld [vmem:[#allocation2 + $0x75] sm:$0xf] }
 0x211   :  { %v1826_v42 = vadd.f32 %v1818_v58, %v1798_v60  ;;  %v1938_v39 = vadd.f32 %v1930_v5, %v1910_v3  ;;  %v1986_v50 = vmul.f32 %v6836_v27, %v1974_v29  ;;  %v6861_v7 = vld [vmem:[#allocation61_spill] sm:$0xff]  ;;  %v1903_v1 = vmul.f32 %v6832_v49, %v1891_v51 }
 0x212   :  { %v2194_v23 = vadd.f32 %v6858_v61, %v2166_v0  ;;  %v2165_v34 = vadd.f32 %v2157_v20, %v2137_v48  ;;  %v2270_v4 = vmul.f32 %v6861_v7, %v2258_v28  ;;  %v1725_v58 = vld [vmem:[#allocation2 + $0x101] sm:$0xf]  ;;  %v2014_v0 = vmul.f32 %v6837_v19, %v2002_v37  ;;  %v2257_v12 = vld [vmem:[#allocation2 + $0x106] sm:$0xf]  ;;  %v2058_v48 = vld [vmem:[#allocation2 + $0x76] sm:$0xf] }
 0x213   :  { %v1854_v54 = vadd.f32 %v1846_v18, %v1826_v42  ;;  %v6862_v30 = vld [vmem:[#allocation57_spill] sm:$0xff]  ;;  %v1966_v9 = vadd.f32 %v1958_v44, %v1938_v39  ;;  %v1931_v29 = vmul.f32 %v6833_v62, %v1919_v16  ;;  %v2241_v18 = vmul.f32 %v6845_v46, %v2229_v32 }
 0x214   :  { %v2222_v21 = vadd.f32 %v6860_v47, %v2194_v23  ;;  %v2193_v6 = vadd.f32 %v2185_v43, %v2165_v34  ;;  %v2213_v53 = vmul.f32 %v6862_v30, %v2201_v33  ;;  %v1947_v24 = vld [vmem:[#allocation2 + $0x82] sm:$0xf]  ;;  %v2042_v23 = vmul.f32 %v6838_v26, %v2030_v31  ;;  %v2059_v39 = vld [vmem:[#allocation2 + $0x86] sm:$0xf] }
 0x215   :  { %v1882_v60 = vadd.f32 %v1874_v59, %v1854_v54  ;;  %v1753_v20 = vld [vmem:[#allocation2 + $0x102] sm:$0xf]  ;;  %v1994_v3 = vadd.f32 %v1986_v50, %v1966_v9  ;;  %v1737_v33 = vmul.f32 %v6817_v52, %v1725_v58  ;;  %v2269_v34 = vmul.f32 %v6861_v7, %v2257_v12 }
 0x216   :  { %v2250_v5 = vadd.f32 %v2242_v15, %v2222_v21  ;;  %v2221_v28 = vadd.f32 %v2213_v53, %v2193_v6  ;;  %v1975_v51 = vld [vmem:[#allocation2 + $0x83] sm:$0xf]  ;;  %v1959_v15 = vmul.f32 %v6835_v38, %v1947_v24  ;;  %v2070_v47 = vmul.f32 %v6839_v63, %v2058_v48  ;;  %v1698_v48 = vld [vmem:[#allocation2 + $0x110] sm:$0xf] }
 0x217   :  { %v2003_v61 = vld [vmem:[#allocation2 + $0x84] sm:$0xf]  ;;  %v1911_v42 = vadd.f32 %v1903_v1, %v1882_v60  ;;  %v2087_v37 = vld [vmem:[#allocation2 + $0x80] sm:$0xf]  ;;  %v2022_v43 = vadd.f32 %v2014_v0, %v1994_v3  ;;  %v1765_v50 = vmul.f32 %v6818_v14, %v1753_v20  ;;  %v1987_v54 = vmul.f32 %v6836_v27, %v1975_v51 }
 0x218   :  { %v2278_v44 = vadd.f32 %v2270_v4, %v2250_v5  ;;  %v2249_v59 = vadd.f32 %v2241_v18, %v2221_v28  ;;  %v2031_v16 = vld [vmem:[#allocation2 + $0x85] sm:$0xf]  ;;  %v2015_v4 = vmul.f32 %v6837_v19, %v2003_v61  ;;  %v2115_v1 = vld [vmem:[#allocation2 + $0x81] sm:$0xf]  ;;  %v2099_v24 = vmul.f32 %v6840_v2, %v2087_v37 }
 0x219   :  { %v1613_v21 = vld [vmem:[#allocation2 + $0x104] sm:$0xf]  ;;  %v1939_v32 = vadd.f32 %v1931_v29, %v1911_v42  ;;  %v2050_v53 = vadd.f32 %v2042_v23, %v2022_v43  ;;  %v2043_v5 = vmul.f32 %v6838_v26, %v2031_v16  ;;  %v2071_v12 = vmul.f32 %v6839_v63, %v2059_v39  ;;  %v2088_v23 = vld [vmem:[#allocation2 + $0x90] sm:$0xf] }
 0x21a   :  { %v2143_v31 = vld [vmem:[#allocation2 + $0x82] sm:$0xf]  ;;  %v2277_v58 = vadd.f32 %v2269_v34, %v2249_v59  ;;  %v6052_v6 = vadd.f32 %v6854_v36, %v2278_v44  ;;  %v1625_v60 = vmul.f32 %v5529_v40, %v1613_v21  ;;  %v1669_v29 = vld [vmem:[#allocation2 + $0x106] sm:$0xf]  ;;  %v2127_v51 = vmul.f32 %v6841_v13, %v2115_v1  ;;  %v6863_v42 = vld [vmem:[#allocation27_spill] sm:$0xff] }
 0x21b   :  { %v1641_v9 = vld [vmem:[#allocation2 + $0x105] sm:$0xf]  ;;  %v1967_v0 = vadd.f32 %v1959_v15, %v1939_v32  ;;  %v2078_v18 = vadd.f32 %v2070_v47, %v2050_v53  ;;  %v2155_v3 = vmul.f32 %v6842_v56, %v2143_v31  ;;  %v1726_v59 = vld [vmem:[#allocation2 + $0x111] sm:$0xf]  ;;  %v1681_v39 = vmul.f32 %v5539_v45, %v1669_v29 }
 0x21c   :  { %v1781_v20 = vld [vmem:[#allocation2 + $0x103] sm:$0xf]  ;;  %v6059_v28 = vadd.f32 %v6016_v55, %v2277_v58  ;;  %v1633_v15 = vadd.f32 %v1625_v60, %v6863_v42  ;;  %v1653_v37 = vmul.f32 %v5532_v17, %v1641_v9  ;;  %v6864_v40 = vld [vmem:[#allocation35_spill] sm:$0xff]  ;;  %v1710_v47 = vmul.f32 %v6814_v57, %v1698_v48 }
 0x21d   :  { %v1995_v61 = vadd.f32 %v1987_v54, %v1967_v0  ;;  %v2171_v44 = vld [vmem:[#allocation2 + $0x83] sm:$0xf]  ;;  %v1745_v34 = vadd.f32 %v1737_v33, %v6864_v40  ;;  %v2107_v16 = vadd.f32 %v2099_v24, %v2078_v18  ;;  %v2116_v54 = vld [vmem:[#allocation2 + $0x91] sm:$0xf]  ;;  %v1793_v17 = vmul.f32 %v6819_v35, %v1781_v20 }
 0x21e   :  { %v2308_v43 = vcombine.low %v6059_v28, %v6052_v6  ;;  %v1809_v21 = vld [vmem:[#allocation2 + $0x104] sm:$0xf]  ;;  %v1661_v31 = vadd.f32 %v1653_v37, %v1633_v15  ;;  %v1754_v58 = vld [vmem:[#allocation2 + $0x112] sm:$0xf]  ;;  %v2100_v33 = vmul.f32 %v6840_v2, %v2088_v23  ;;  %v2183_v0 = vmul.f32 %v6859_v11, %v2171_v44 }
 0x21f   :  { %v2023_v32 = vadd.f32 %v2015_v4, %v1995_v61  ;;  %v2199_v1 = vld [vmem:[#allocation2 + $0x84] sm:$0xf]  ;;  %v1773_v53 = vadd.f32 %v1765_v50, %v1745_v34  ;;  %v2135_v9 = vadd.f32 %v2127_v51, %v2107_v16  ;;  %v1738_v24 = vmul.f32 %v6817_v52, %v1726_v59  ;;  %v2144_v57 = vld [vmem:[#allocation2 + $0x92] sm:$0xf] }
 0x220   :  { %2318 = vadd.xlane.f32.xlu0 %v2308_v43  ;;  %v1837_v45 = vld [vmem:[#allocation2 + $0x105] sm:$0xf]  ;;  %v1689_v29 = vadd.f32 %v1681_v39, %v1661_v31  ;;  %v1782_v4 = vld [vmem:[#allocation2 + $0x113] sm:$0xf]  ;;  %v1821_v18 = vmul.f32 %v6828_v25, %v1809_v21  ;;  %v2128_v50 = vmul.f32 %v6841_v13, %v2116_v54  ;;  %v2211_v23 = vmul.f32 %v6862_v30, %v2199_v1 }
 0x221   :  { %v2051_v60 = vadd.f32 %v2043_v5, %v2023_v32  ;;  %v1801_v48 = vadd.f32 %v1793_v17, %v1773_v53  ;;  %v1865_v61 = vld [vmem:[#allocation2 + $0x106] sm:$0xf]  ;;  %v2163_v20 = vadd.f32 %v2155_v3, %v2135_v9  ;;  %v2172_v42 = vld [vmem:[#allocation2 + $0x93] sm:$0xf]  ;;  %v1766_v51 = vmul.f32 %v6818_v14, %v1754_v58 }
 0x222   :  { %v1894_v44 = vld [vmem:[#allocation2 + $0x110] sm:$0xf]  ;;  %v2227_v52 = vld [vmem:[#allocation2 + $0x85] sm:$0xf]  ;;  %v1718_v37 = vadd.f32 %v1710_v47, %v1689_v29  ;;  %v1810_v5 = vld [vmem:[#allocation2 + $0x114] sm:$0xf]  ;;  %v1849_v40 = vmul.f32 %v6829_v10, %v1837_v45  ;;  %v2156_v43 = vmul.f32 %v6842_v56, %v2144_v57  ;;  %v1794_v39 = vmul.f32 %v6819_v35, %v1782_v4 }
 0x223   :  { %v2079_v15 = vadd.f32 %v2071_v12, %v2051_v60  ;;  %v1829_v59 = vadd.f32 %v1821_v18, %v1801_v48  ;;  %v1922_v34 = vld [vmem:[#allocation2 + $0x111] sm:$0xf]  ;;  %v2191_v16 = vadd.f32 %v2183_v0, %v2163_v20  ;;  %v1877_v3 = vmul.f32 %v6830_v8, %v1865_v61  ;;  %v1838_v14 = vld [vmem:[#allocation2 + $0x115] sm:$0xf]  ;;  %v2255_v45 = vld [vmem:[#allocation2 + $0x86] sm:$0xf] }
 0x224   :  { %v2200_v32 = vld [vmem:[#allocation2 + $0x94] sm:$0xf]  ;;  %v1746_v54 = vadd.f32 %v1738_v24, %v1718_v37  ;;  %v1906_v12 = vmul.f32 %v6832_v49, %v1894_v44  ;;  %v2184_v47 = vmul.f32 %v6859_v11, %v2172_v42  ;;  %v2239_v58 = vmul.f32 %v6845_v46, %v2227_v52  ;;  %v1895_v20 = vld [vmem:[#allocation2 + $0x120] sm:$0xf] }
 0x225   :  { %v2108_v21 = vadd.f32 %v2100_v33, %v2079_v15  ;;  %v1857_v1 = vadd.f32 %v1849_v40, %v1829_v59  ;;  %v2228_v31 = vld [vmem:[#allocation2 + $0x95] sm:$0xf]  ;;  %v1822_v53 = vmul.f32 %v6828_v25, %v1810_v5  ;;  %v1934_v17 = vmul.f32 %v6833_v62, %v1922_v34 }
 0x226   :  { %v1950_v9 = vld [vmem:[#allocation2 + $0x112] sm:$0xf]  ;;  %v2219_v0 = vadd.f32 %v2211_v23, %v2191_v16  ;;  %v1774_v33 = vadd.f32 %v1766_v51, %v1746_v54  ;;  %v1866_v60 = vld [vmem:[#allocation2 + $0x116] sm:$0xf]  ;;  %v2212_v29 = vmul.f32 %v6862_v30, %v2200_v32  ;;  %v1850_v4 = vmul.f32 %v6829_v10, %v1838_v14  ;;  %v1923_v10 = vld [vmem:[#allocation2 + $0x121] sm:$0xf] }
 0x227   :  { %v2136_v35 = vadd.f32 %v2128_v50, %v2108_v21  ;;  %v1885_v24 = vadd.f32 %v1877_v3, %v1857_v1  ;;  %v1978_v57 = vld [vmem:[#allocation2 + $0x113] sm:$0xf]  ;;  %v1962_v25 = vmul.f32 %v6835_v38, %v1950_v9  ;;  %v2240_v44 = vmul.f32 %v6845_v46, %v2228_v31  ;;  %v1951_v3 = vld [vmem:[#allocation2 + $0x122] sm:$0xf] }
 0x228   :  { %v2256_v18 = vld [vmem:[#allocation2 + $0x96] sm:$0xf]  ;;  %v1802_v61 = vadd.f32 %v1794_v39, %v1774_v33  ;;  %v2267_v50 = vmul.f32 %v6861_v7, %v2255_v45  ;;  %v1878_v23 = vmul.f32 %v6830_v8, %v1866_v60  ;;  %v1990_v51 = vmul.f32 %v6836_v27, %v1978_v57  ;;  %v1979_v31 = vld [vmem:[#allocation2 + $0x123] sm:$0xf] }
 0x229   :  { %v2164_v48 = vadd.f32 %v2156_v43, %v2136_v35  ;;  %v1914_v42 = vadd.f32 %v1906_v12, %v1885_v24  ;;  %v2006_v15 = vld [vmem:[#allocation2 + $0x114] sm:$0xf]  ;;  %v2247_v37 = vadd.f32 %v2239_v58, %v2219_v0  ;;  %v2268_v34 = vmul.f32 %v6861_v7, %v2256_v18  ;;  %v2007_v35 = vld [vmem:[#allocation2 + $0x124] sm:$0xf] }
 0x22a   :  { %v1830_v5 = vadd.f32 %v1822_v53, %v1802_v61  ;;  %v2034_v40 = vld [vmem:[#allocation2 + $0x115] sm:$0xf]  ;;  %v1907_v43 = vmul.f32 %v6832_v49, %v1895_v20  ;;  %v2018_v32 = vmul.f32 %v6837_v19, %v2006_v15  ;;  %v1935_v8 = vmul.f32 %v6833_v62, %v1923_v10  ;;  %v2091_v53 = vld [vmem:[#allocation2 + $0x120] sm:$0xf] }
 0x22b   :  { %v2192_v52 = vadd.f32 %v2184_v47, %v2164_v48  ;;  %v1942_v59 = vadd.f32 %v1934_v17, %v1914_v42  ;;  %v2046_v54 = vmul.f32 %v6838_v26, %v2034_v40  ;;  %v2062_v14 = vld [vmem:[#allocation2 + $0x116] sm:$0xf]  ;;  %v2275_v12 = vadd.f32 %v2267_v50, %v2247_v37  ;;  %v2119_v60 = vld [vmem:[#allocation2 + $0x121] sm:$0xf]  ;;  %v2035_v48 = vld [vmem:[#allocation2 + $0x125] sm:$0xf] }
 0x22c   :  { %v1858_v39 = vadd.f32 %v1850_v4, %v1830_v5  ;;  %v1963_v17 = vmul.f32 %v6835_v38, %v1951_v3  ;;  %v2074_v45 = vmul.f32 %v6839_v63, %v2062_v14  ;;  %v1991_v33 = vmul.f32 %v6836_v27, %v1979_v31  ;;  %v2147_v18 = vld [vmem:[#allocation2 + $0x122] sm:$0xf]  ;;  %v2120_v40 = vld [vmem:[#allocation2 + $0x131] sm:$0xf] }
 0x22d   :  { %v2220_v16 = vadd.f32 %v2212_v29, %v2192_v52  ;;  %v1970_v21 = vadd.f32 %v1962_v25, %v1942_v59  ;;  %v2103_v62 = vmul.f32 %v6840_v2, %v2091_v53  ;;  %v6104_v24 = vadd.f32 %v6016_v55, %v2275_v12  ;;  %v2063_v25 = vld [vmem:[#allocation2 + $0x126] sm:$0xf]  ;;  %v2092_v52 = vld [vmem:[#allocation2 + $0x130] sm:$0xf] }
 0x22e   :  { %v1886_v47 = vadd.f32 %v1878_v23, %v1858_v39  ;;  %v2019_v38 = vmul.f32 %v6837_v19, %v2007_v35  ;;  %v2131_v42 = vmul.f32 %v6841_v13, %v2119_v60  ;;  %v2047_v23 = vmul.f32 %v6838_v26, %v2035_v48  ;;  %v2203_v19 = vld [vmem:[#allocation2 + $0x124] sm:$0xf]  ;;  %v2148_v26 = vld [vmem:[#allocation2 + $0x132] sm:$0xf] }
 0x22f   :  { %v2248_v1 = vadd.f32 %v2240_v44, %v2220_v16  ;;  %v1998_v58 = vadd.f32 %v1990_v51, %v1970_v21  ;;  %v2175_v44 = vld [vmem:[#allocation2 + $0x123] sm:$0xf]  ;;  %v2159_v15 = vmul.f32 %v6842_v56, %v2147_v18  ;;  %v2075_v5 = vmul.f32 %v6839_v63, %v2063_v25  ;;  %v2176_v63 = vld [vmem:[#allocation2 + $0x133] sm:$0xf] }
 0x230   :  { %v1915_v9 = vadd.f32 %v1907_v43, %v1886_v47  ;;  %v2187_v59 = vmul.f32 %v6859_v11, %v2175_v44  ;;  %v2104_v16 = vmul.f32 %v6840_v2, %v2092_v52  ;;  %v2215_v3 = vmul.f32 %v6862_v30, %v2203_v19  ;;  %v2259_v21 = vld [vmem:[#allocation2 + $0x126] sm:$0xf] }
 0x231   :  { %v2276_v49 = vadd.f32 %v2268_v34, %v2248_v1  ;;  %v2026_v0 = vadd.f32 %v2018_v32, %v1998_v58  ;;  %v2231_v34 = vld [vmem:[#allocation2 + $0x125] sm:$0xf]  ;;  %v2160_v12 = vmul.f32 %v6842_v56, %v2148_v26  ;;  %v2271_v31 = vmul.f32 %v6861_v7, %v2259_v21  ;;  %v2204_v58 = vld [vmem:[#allocation2 + $0x134] sm:$0xf] }
 0x232   :  { %v1943_v29 = vadd.f32 %v1935_v8, %v1915_v9  ;;  %v2132_v8 = vmul.f32 %v6841_v13, %v2120_v40  ;;  %v2243_v14 = vmul.f32 %v6845_v46, %v2231_v34  ;;  %v2188_v53 = vmul.f32 %v6859_v11, %v2176_v63  ;;  %v4638_v63 = vld [vmem:[#allocation9 + $0xc] ss:$16 sps:$4 sm:$0xff]  }
 0x233   :  { %v6107_v57 = vadd.f32 %v6854_v36, %v2276_v49  ;;  %v2054_v4 = vadd.f32 %v2046_v54, %v2026_v0  ;;  %v2232_v49 = vld [vmem:[#allocation2 + $0x135] sm:$0xf]  ;;  %v2216_v35 = vmul.f32 %v6862_v30, %v2204_v58  ;;  %v5038_v48 = vmov 839922192   ;;  %2842 = vmatprep.subr.bf16.mxu0 %v4638_v63 }
 0x234   :  { %v1971_v20 = vadd.f32 %v1963_v17, %v1943_v29  ;;  %v2260_v0 = vld [vmem:[#allocation2 + $0x136] sm:$0xf]  ;;  %v2332_v18 = vunpack.c.l.s4 %v5038_v48 }
 0x235   :  { %v2307_v61 = vcombine.low %v6104_v24, %v6107_v57  ;;  %v2082_v27 = vadd.f32 %v2074_v45, %v2054_v4  ;;  %v2272_v56 = vmul.f32 %v6861_v7, %v2260_v0  ;;  %v4647_v0 = vld [vmem:[#allocation9 + $0x44] ss:$16 sps:$4 sm:$0xff]   ;;  %v4662_v48 = vld [vmem:[#allocation9 + $0x8c] ss:$16 sps:$4 sm:$0xff]  }
 0x236   :  { %v1999_v50 = vadd.f32 %v1991_v33, %v1971_v20  ;;  %v2244_v33 = vmul.f32 %v6845_v46, %v2232_v49  ;;  %v2333_v20 = vunpack.c.0.s8 %v2332_v18  ;;  %v4665_v18 = vld [vmem:[#allocation9 + $0xa4] ss:$16 sps:$4 sm:$0xff]  }
 0x237   :  { %2316 = vadd.xlane.f32.xlu1 %v2307_v61  ;;  %v2111_v51 = vadd.f32 %v2103_v62, %v2082_v27  ;;  %v5039_v61 = vmov 1985246804  }
 0x238   :  { %v2027_v37 = vadd.f32 %v2019_v38, %v1999_v50  ;;  %v2339_v30 = vunpack.c.l.s4 %v5039_v61  ;;  %v4668_v61 = vld [vmem:[#allocation9 + $0xac] ss:$16 sps:$4 sm:$0xff]  }
 0x239   :  { %v2139_v10 = vadd.f32 %v2131_v42, %v2111_v51  ;;  %v6865_v42 = vld [vmem:[#allocation20_spill] sm:$0xff] }
 0x23a   :  { %v2055_v43 = vadd.f32 %v2047_v23, %v2027_v37  ;;  %v2340_v27 = vunpack.c.0.s8 %v2339_v30  ;;  %v6130_v25 = vsub.s32 %v2333_v20, %v6865_v42  ;;  %v4663_v30 = vld [vmem:[#allocation9 + $0xa0] ss:$16 sps:$4 sm:$0xff]   ;;  %v4666_v20 = vld [vmem:[#allocation9 + $0xa8] ss:$16 sps:$4 sm:$0xff]  }
 0x23b   :  { %v2167_v39 = vadd.f32 %v2159_v15, %v2139_v10 }
 0x23c   :  { %v2083_v32 = vadd.f32 %v2075_v5, %v2055_v43  ;;  %v6133_v46 = vsub.s32 %v2340_v27, %v6865_v42  ;;  %v4671_v27 = vld [vmem:[#allocation9 + $0xc4] ss:$16 sps:$4 sm:$0xff]   ;;  %v4674_v42 = vld [vmem:[#allocation9 + $0xcc] ss:$16 sps:$4 sm:$0xff]  }
 0x23d   :  { %v2195_v54 = vadd.f32 %v2187_v59, %v2167_v39 }
 0x23e   :  { %v2112_v1 = vadd.f32 %v2104_v16, %v2083_v32 }
 0x23f   :  { %v2223_v47 = vadd.f32 %v2215_v3, %v2195_v54  ;;  %v4635_v54 = vld [vmem:[#allocation9 + $0x4] ss:$16 sps:$4 sm:$0xff]  }
 0x240   :  { %v2140_v2 = vadd.f32 %v2132_v8, %v2112_v1  ;;  %v4633_v8 = vld [vmem:[#allocation9] ss:$16 sps:$4 sm:$0xff]   ;;  %v4641_v1 = vld [vmem:[#allocation9 + $0x24] ss:$16 sps:$4 sm:$0xff]   ;;  %2789 = vmatprep.subr.bf16.mxu1 %v4635_v54 }
 0x241   :  { %v2251_v17 = vadd.f32 %v2243_v14, %v2223_v47  ;;  %v4636_v14 = vld [vmem:[#allocation9 + $0x8] ss:$16 sps:$4 sm:$0xff]   ;;  %2790 = vmatpush1.bf16.msra.mxu1 %v4633_v8 }
 0x242   :  { %v2168_v9 = vadd.f32 %v2160_v12, %v2140_v2  ;;  %v4644_v12 = vld [vmem:[#allocation9 + $0x2c] ss:$16 sps:$4 sm:$0xff]   ;;  %2843 = vmatpush1.bf16.msra.mxu0 %v4636_v14  ;;  %2791 = vmatprep.subr.bf16.mxu1 %v4641_v1 }
 0x243   :  { %v2279_v13 = vadd.f32 %v2271_v31, %v2251_v17  ;;  %2844 = vmatprep.subr.bf16.mxu0 %v4644_v12 }
 0x244   :  { %v2196_v45 = vadd.f32 %v2188_v53, %v2168_v9 }
 0x245   :  { %v2296_v4 = vadd.f32 %v6016_v55, %v2279_v13  ;;  %v4645_v13 = vld [vmem:[#allocation9 + $0x40] ss:$16 sps:$4 sm:$0xff]  }
 0x246   :  { %v2224_v62 = vadd.f32 %v2216_v35, %v2196_v45  ;;  %v4648_v45 = vld [vmem:[#allocation9 + $0x48] ss:$16 sps:$4 sm:$0xff]  }
 0x248   :  { %v2252_v60 = vadd.f32 %v2244_v33, %v2224_v62  ;;  %v4650_v33 = vld [vmem:[#allocation9 + $0x4c] ss:$16 sps:$4 sm:$0xff]   ;;  %v4653_v62 = vld [vmem:[#allocation9 + $0x64] ss:$16 sps:$4 sm:$0xff]  }
 0x24a   :  { %v2280_v29 = vadd.f32 %v2272_v56, %v2252_v60  ;;  %v4656_v56 = vld [vmem:[#allocation9 + $0x6c] ss:$16 sps:$4 sm:$0xff]   ;;  %v4651_v60 = vld [vmem:[#allocation9 + $0x60] ss:$16 sps:$4 sm:$0xff]  }
 0x24c   :  { %v2297_v38 = vadd.f32 %v6854_v36, %v2280_v29  ;;  %v4654_v29 = vld [vmem:[#allocation9 + $0x68] ss:$16 sps:$4 sm:$0xff]  }
 0x24e   :  { %v2309_v11 = vcombine.low %v2296_v4, %v2297_v38 }
 0x250   :  { %2320 = vadd.xlane.f32.xlu0 %v2309_v11  ;;  %v4660_v11 = vld [vmem:[#allocation9 + $0x88] ss:$16 sps:$4 sm:$0xff]  }
 0x29c   :  { %v2315_v7 = vpop.xlane.xlu0 %2314 }
 0x29d   :  { %v2323_v44 = vmul.f32 0.0078125, %v2315_v7  ;;  %v4669_v7 = vld [vmem:[#allocation9 + $0xc0] ss:$16 sps:$4 sm:$0xff]  }
 0x29f   :  { %v2337_v55 = vrot.slane %v2323_v44, %v6130_v25  ;;  %v2344_v36 = vrot.slane %v2323_v44, %v6133_v46  ;;  %v4672_v44 = vld [vmem:[#allocation9 + $0xc8] ss:$16 sps:$4 sm:$0xff]  }
 0x2a1   :  { %v6138_v50 = vsub.f32 %v6019_v22, %v2337_v55  ;;  %v6141_v23 = vsub.f32 %v6008_v41, %v2344_v36  ;;  %v4677_v55 = vld [vmem:[#allocation9 + $0xe4] ss:$16 sps:$4 sm:$0xff]   ;;  %v4680_v36 = vld [vmem:[#allocation9 + $0xec] ss:$16 sps:$4 sm:$0xff]  }
 0x2a3   :  { %v2403_v51 = vmul.f32 %v6138_v50, %v6138_v50  ;;  %v2404_v15 = vmul.f32 %v6141_v23, %v6141_v23 }
 0x2a5   :  { %v2419_v52 = vcombine.low %v2403_v51, %v2404_v15  ;;  %v4675_v51 = vld [vmem:[#allocation9 + $0xe0] ss:$16 sps:$4 sm:$0xff]   ;;  %v4678_v15 = vld [vmem:[#allocation9 + $0xe8] ss:$16 sps:$4 sm:$0xff]  }
 0x2a7   :  { %2427 = vadd.xlane.f32.xlu1 %v2419_v52 }
 0x2ad   :  { %v2319_v19 = vpop.xlane.xlu0 %2318 }
 0x2ae   :  { %v2325_v37 = vmul.f32 0.0078125, %v2319_v19 }
 0x2b0   :  { %v2365_v5 = vrot.slane %v2325_v37, %v6130_v25  ;;  %v2372_v10 = vrot.slane %v2325_v37, %v6133_v46 }
 0x2b2   :  { %v6150_v22 = vsub.f32 %v6059_v28, %v2365_v5  ;;  %v6153_v41 = vsub.f32 %v6052_v6, %v2372_v10 }
 0x2b4   :  { %v2407_v59 = vmul.f32 %v6150_v22, %v6150_v22  ;;  %v2408_v40 = vmul.f32 %v6153_v41, %v6153_v41 }
 0x2b6   :  { %v2421_v34 = vcombine.low %v2407_v59, %v2408_v40 }
 0x2b8   :  { %2431 = vadd.xlane.f32.xlu1 %v2421_v34 }
 0x2c4   :  { %v2317_v43 = vpop.xlane.xlu1 %2316 }
 0x2c5   :  { %v2324_v16 = vmul.f32 0.0078125, %v2317_v43 }
 0x2c7   :  { %v2351_v39 = vrot.slane %v2324_v16, %v6130_v25  ;;  %v2358_v3 = vrot.slane %v2324_v16, %v6133_v46  ;;  %v4288_v16 = vld [vmem:[%s6681_s7] ss:$0 sm:$0xff] }
 0x2c9   :  { %v6162_v28 = vsub.f32 %v6104_v24, %v2351_v39  ;;  %v6165_v6 = vsub.f32 %v6107_v57, %v2358_v3  ;;  %v4639_v24 = vld [vmem:[#allocation9 + $0x20] ss:$16 sps:$4 sm:$0xff]   ;;  %v4642_v57 = vld [vmem:[#allocation9 + $0x28] ss:$16 sps:$4 sm:$0xff]   ;;  %v2530_v3 = vcombine.high %v4288_v16, %v4288_v16 }
 0x2ca   :  { %2792 = vmatpush1.bf16.msra.mxu1 %v4639_v24  ;;  %2845 = vmatpush1.bf16.msra.mxu0 %v4642_v57 }
 0x2cb   :  { %v2405_v26 = vmul.f32 %v6162_v28, %v6162_v28  ;;  %v2406_v21 = vmul.f32 %v6165_v6, %v6165_v6  ;;  %2793 = vmatprep.subr.bf16.mxu1 %v4647_v0  ;;  %2846 = vmatprep.subr.bf16.mxu0 %v4650_v33 }
 0x2cd   :  { %v2420_v32 = vcombine.low %v2405_v26, %v2406_v21 }
 0x2ce   :  { %2794 = vmatpush1.bf16.msra.mxu1 %v4645_v13  ;;  %2847 = vmatpush1.bf16.msra.mxu0 %v4648_v45 }
 0x2cf   :  { %2429 = vadd.xlane.f32.xlu0 %v2420_v32  ;;  %2795 = vmatprep.subr.bf16.mxu1 %v4653_v62  ;;  %v4289_v32 = vld [vmem:[%s6682_s8] ss:$0 sm:$0xff] }
 0x2d0   :  { %2848 = vmatprep.subr.bf16.mxu0 %v4656_v56  ;;  %v2547_v14 = vcombine.high %v4289_v32, %v4289_v32  ;;  %v6866_v56 = vmov 0  }
 0x2d2   :  { %2796 = vmatpush1.bf16.msra.mxu1 %v4651_v60  ;;  %2849 = vmatpush1.bf16.msra.mxu0 %v4654_v29 }
 0x2d3   :  { %2850 = vmatprep.subr.bf16.mxu0 %v4662_v48 }
 0x2d6   :  { %2851 = vmatpush1.bf16.msra.mxu0 %v4660_v11 }
 0x2d7   :  { %2852 = vmatprep.subr.bf16.mxu0 %v4668_v61 }
 0x2da   :  { %2853 = vmatpush1.bf16.msra.mxu0 %v4666_v20 }
 0x2db   :  { %2854 = vmatprep.subr.bf16.mxu0 %v4674_v42 }
 0x2dd   :  { %v2321_v47 = vpop.xlane.xlu0 %2320 }
 0x2de   :  { %v2326_v31 = vmul.f32 0.0078125, %v2321_v47  ;;  %2855 = vmatpush1.bf16.msra.mxu0 %v4672_v44 }
 0x2df   :  { %2856 = vmatprep.subr.bf16.mxu0 %v4680_v36 }
 0x2e0   :  { %v2379_v58 = vrot.slane %v2326_v31, %v6130_v25  ;;  %v2386_v2 = vrot.slane %v2326_v31, %v6133_v46 }
 0x2e2   :  { %v6173_v53 = vsub.f32 %v2296_v4, %v2379_v58  ;;  %v6175_v17 = vsub.f32 %v2297_v38, %v2386_v2  ;;  %v4657_v4 = vld [vmem:[#allocation9 + $0x80] ss:$16 sps:$4 sm:$0xff]   ;;  %v4659_v38 = vld [vmem:[#allocation9 + $0x84] ss:$16 sps:$4 sm:$0xff]   ;;  %2857 = vmatpush1.bf16.msra.mxu0 %v4678_v15 }
 0x2e3   :  { %2797 = vmatprep.subr.bf16.mxu1 %v4659_v38  ;;  %v4682_v15 = vld [vmem:[#allocation11 + $0xc0] sm:$0xff]  }
 0x2e4   :  { %v2409_v49 = vmul.f32 %v6173_v53, %v6173_v53  ;;  %v2410_v9 = vmul.f32 %v6175_v17, %v6175_v17  ;;  %2798 = vmatpush1.bf16.msra.mxu1 %v4657_v4  ;;  %4515 = vmatprep.subr.bf16.mxu0 %v4682_v15 }
 0x2e5   :  { %2799 = vmatprep.subr.bf16.mxu1 %v4665_v18 }
 0x2e6   :  { %v2422_v35 = vcombine.low %v2409_v49, %v2410_v9 }
 0x2e8   :  { %2433 = vadd.xlane.f32.xlu0 %v2422_v35  ;;  %2800 = vmatpush1.bf16.msra.mxu1 %v4663_v30 }
 0x2e9   :  { %2801 = vmatprep.subr.bf16.mxu1 %v4671_v27 }
 0x2ec   :  { %2802 = vmatpush1.bf16.msra.mxu1 %v4669_v7 }
 0x2ed   :  { %2803 = vmatprep.subr.bf16.mxu1 %v4677_v55 }
 0x2f0   :  { %2804 = vmatpush1.bf16.msra.mxu1 %v4675_v51 }
 0x334   :  { %v2428_v52 = vpop.xlane.xlu1 %2427 }
 0x335   :  { %v2435_v19 = vmul.f32 0.0078125, %v2428_v52  ;;  %v4684_v52 = vld [vmem:[#allocation11 + $0x80] sm:$0xff]  }
 0x337   :  { %v2439_v37 = vadd.f32 1e-05, %v2435_v19  ;;  %v4687_v19 = vld [vmem:[#allocation11 + $0x8] sm:$0xff]  }
 0x339   :  { %4785 = vrsqrt.f32 %v2439_v37  ;;  %v4688_v37 = vld [vmem:[#allocation11 + $0x88] sm:$0xff]  }
 0x343   :  { %v4786_v40 = vpop.eup %4785 }
 0x344   :  { %v2457_v34 = vrot.slane %v4786_v40, %v6130_v25  ;;  %v2464_v43 = vrot.slane %v4786_v40, %v6133_v46  ;;  %v4692_v40 = vld [vmem:[#allocation11 + $0x90] sm:$0xff]  }
 0x345   :  { %v2432_v39 = vpop.xlane.xlu1 %2431 }
 0x346   :  { %v2515_v26 = vmul.f32 %v2457_v34, %v6138_v50  ;;  %v2516_v21 = vmul.f32 %v2464_v43, %v6141_v23  ;;  %v2437_v8 = vmul.f32 0.0078125, %v2432_v39  ;;  %v4693_v34 = vld [vmem:[#allocation11 + $0x58] sm:$0xff]  }
 0x347   :  { %v4694_v43 = vld [vmem:[#allocation11 + $0xd8] sm:$0xff]  }
 0x348   :  { %v2532_v63 = vmul.f32 %v4288_v16, %v2515_v26  ;;  %v2533_v1 = vmul.f32 %v2530_v3, %v2516_v21  ;;  %v2441_v57 = vadd.f32 1e-05, %v2437_v8  ;;  %v4696_v39 = vld [vmem:[#allocation11 + $0x98] sm:$0xff]   ;;  %v4698_v26 = vld [vmem:[#allocation11 + $0xe0] sm:$0xff]   ;;  %v4701_v8 = vld [vmem:[#allocation11 + $0x68] sm:$0xff]  }
 0x349   :  { %v4699_v21 = vld [vmem:[#allocation11 + $0x20] sm:$0xff]  }
 0x34a   :  { %v2549_v58 = vadd.f32 %v4289_v32, %v2532_v63  ;;  %v2550_v2 = vadd.f32 %v2547_v14, %v2533_v1  ;;  %v4704_v63 = vld [vmem:[#allocation11 + $0xa8] sm:$0xff]   ;;  %v4705_v1 = vld [vmem:[#allocation11 + $0x70] sm:$0xff]  }
 0x34c   :  { %v2565_v35 = vcombine.low %v2549_v58, %v2550_v2  ;;  %v4712_v58 = vld [vmem:[#allocation11 + $0xb8] sm:$0xff]   ;;  %v6867_v2 = vld [vmem:[#allocation21_spill] sm:$0xff] }
 0x35c   :  { %v2430_v5 = vpop.xlane.xlu0 %2429 }
 0x35d   :  { %v2436_v10 = vmul.f32 0.0078125, %v2430_v5  ;;  %v4689_v5 = vld [vmem:[#allocation11 + $0x50] sm:$0xff]  }
 0x35f   :  { %v2440_v59 = vadd.f32 1e-05, %v2436_v10  ;;  %v4690_v10 = vld [vmem:[#allocation11 + $0xd0] sm:$0xff]  }
 0x361   :  { %4787 = vrsqrt.f32 %v2440_v59  ;;  %v4691_v59 = vld [vmem:[#allocation11 + $0x10] sm:$0xff]  }
 0x362   :  { %4789 = vrsqrt.f32 %v2441_v57  ;;  %v4708_v57 = vld [vmem:[#allocation11 + $0xb0] sm:$0xff]  }
 0x36b   :  { %v4788_v54 = vpop.eup %4787 }
 0x36c   :  { %v2471_v12 = vrot.slane %v4788_v54, %v6130_v25  ;;  %v2478_v24 = vrot.slane %v4788_v54, %v6133_v46  ;;  %v4702_v54 = vld [vmem:[#allocation11 + $0xe8] sm:$0xff]  }
 0x36e   :  { %v2517_v47 = vmul.f32 %v2471_v12, %v6162_v28  ;;  %v2518_v50 = vmul.f32 %v2478_v24, %v6165_v6  ;;  %v4790_v28 = vpop.eup %4789  ;;  %v4706_v12 = vld [vmem:[#allocation11 + $0xf0] sm:$0xff]  }
 0x36f   :  { %v2485_v6 = vrot.slane %v4790_v28, %v6130_v25  ;;  %v2492_v60 = vrot.slane %v4790_v28, %v6133_v46  ;;  %v4707_v24 = vld [vmem:[#allocation11 + $0x30] sm:$0xff]  }
 0x370   :  { %v2534_v31 = vmul.f32 %v4288_v16, %v2517_v47  ;;  %v2535_v23 = vmul.f32 %v2530_v3, %v2518_v50  ;;  %v2607_v47 = vld [vmem:[%s6684_s10] sm:$0xf]  ;;  %v4709_v50 = vld [vmem:[#allocation11 + $0x78] sm:$0xff]  }
 0x371   :  { %v2519_v29 = vmul.f32 %v2485_v6, %v6150_v22  ;;  %v2520_v4 = vmul.f32 %v2492_v60, %v6153_v41 }
 0x372   :  { %v2551_v49 = vadd.f32 %v4289_v32, %v2534_v31  ;;  %v2552_v9 = vadd.f32 %v2547_v14, %v2535_v23  ;;  %v4710_v31 = vld [vmem:[#allocation11 + $0xf8] sm:$0xff]  }
 0x373   :  { %v2536_v18 = vmul.f32 %v4288_v16, %v2519_v29  ;;  %v2537_v61 = vmul.f32 %v2530_v3, %v2520_v4  ;;  %v4711_v23 = vld [vmem:[#allocation11 + $0x38] sm:$0xff]  }
 0x374   :  { %v2566_v13 = vcombine.low %v2551_v49, %v2552_v9  ;;  %v6209_v49 = vrot.slane %v2607_v47, %v6867_v2  ;;  %v6868_v9 = vld [vmem:[#allocation23_spill] sm:$0xff] }
 0x375   :  { %v2434_v0 = vpop.xlane.xlu0 %2433  ;;  %v2553_v7 = vadd.f32 %v4289_v32, %v2536_v18  ;;  %v2554_v44 = vadd.f32 %v2547_v14, %v2537_v61 }
 0x376   :  { %v2573_v45 = vpack.c.bf16 %v2566_v13, %v2565_v35  ;;  %v2438_v33 = vmul.f32 0.0078125, %v2434_v0  ;;  %v6212_v35 = vrot.slane %v2607_v47, %v6868_v9  ;;  %v6869_v13 = vld [vmem:[#allocation22_spill] sm:$0xff] }
 0x377   :  { %v2567_v22 = vcombine.low %v2553_v7, %v2554_v44  ;;  %v6215_v0 = vrot.slane %v2607_v47, %v6869_v13 }
 0x378   :  { %2822 = vmatmul.mubr.bf16.vlgmr.msra.gmra.mrb[8].mxu1 %v2573_v45  ;;  %2875 = vmatmul.mubr.bf16.vlgmr.msra.gmra.mrb[16].mxu0 %v2573_v45  ;;  %v2442_v62 = vadd.f32 1e-05, %v2438_v33  ;;  %v6870_v45 = vld [vmem:[#allocation24_spill] sm:$0xff] }
 0x379   :  { %2831 = vmatprep.mubr.bf16.mxu1 %v6866_v56  ;;  %2884 = vmatprep.mubr.bf16.mxu0 %v6866_v56  ;;  %v6218_v33 = vrot.slane %v2607_v47, %v6870_v45 }
 0x37a   :  { %4791 = vrsqrt.f32 %v2442_v62  ;;  %4516 = vmatpush3.bf16.msra.mxu0 %v4684_v52 }
 0x384   :  { %v4792_v38 = vpop.eup %4791 }
 0x385   :  { %v2499_v11 = vrot.slane %v4792_v38, %v6130_v25  ;;  %v2506_v48 = vrot.slane %v4792_v38, %v6133_v46  ;;  %v4681_v25 = vld [vmem:[#allocation11 + $0x40] sm:$0xff]  }
 0x386   :  { %v4683_v46 = vld [vmem:[#allocation11] sm:$0xff]   ;;  %4487 = vmatprep.subr.bf16.mxu1 %v4681_v25 }
 0x387   :  { %v2521_v30 = vmul.f32 %v2499_v11, %v6173_v53  ;;  %v2522_v20 = vmul.f32 %v2506_v48, %v6175_v17  ;;  %4488 = vmatpush3.bf16.msra.mxu1 %v4683_v46  ;;  %v4685_v53 = vld [vmem:[#allocation11 + $0x48] sm:$0xff]   ;;  %v4715_v46 = vld [vmem:[#allocation12 + $0x4] ss:$24 sps:$4 sm:$0xff]  }
 0x388   :  { %v4686_v17 = vld [vmem:[#allocation11 + $0xc8] sm:$0xff]   ;;  %4489 = vmatprep.subr.bf16.mxu1 %v4685_v53 }
 0x389   :  { %v2538_v27 = vmul.f32 %v4288_v16, %v2521_v30  ;;  %v2539_v42 = vmul.f32 %v2530_v3, %v2522_v20  ;;  %4517 = vmatprep.subr.bf16.mxu0 %v4686_v17  ;;  %v4695_v16 = vld [vmem:[#allocation11 + $0x18] sm:$0xff]   ;;  %v4697_v3 = vld [vmem:[#allocation11 + $0x60] sm:$0xff]  }
 0x38a   :  { %4518 = vmatpush3.bf16.msra.mxu0 %v4688_v37 }
 0x38b   :  { %v2555_v55 = vadd.f32 %v4289_v32, %v2538_v27  ;;  %v2556_v36 = vadd.f32 %v2547_v14, %v2539_v42  ;;  %4490 = vmatpush3.bf16.msra.mxu1 %v4687_v19  ;;  %4519 = vmatprep.subr.bf16.mxu0 %v4690_v10  ;;  %v4700_v32 = vld [vmem:[#allocation11 + $0xa0] sm:$0xff]   ;;  %v4703_v14 = vld [vmem:[#allocation11 + $0x28] sm:$0xff]  }
 0x38c   :  { %4491 = vmatprep.subr.bf16.mxu1 %v4689_v5  ;;  %v4718_v19 = vld [vmem:[#allocation12 + $0xc] ss:$24 sps:$4 sm:$0xff]  }
 0x38d   :  { %v2568_v51 = vcombine.low %v2555_v55, %v2556_v36 }
 0x38e   :  { %4520 = vmatpush3.bf16.msra.mxu0 %v4692_v40 }
 0x38f   :  { %v2574_v41 = vpack.c.bf16 %v2568_v51, %v2567_v22  ;;  %4492 = vmatpush3.bf16.msra.mxu1 %v4691_v59  ;;  %4521 = vmatprep.subr.bf16.mxu0 %v4694_v43 }
 0x390   :  { %4493 = vmatprep.subr.bf16.mxu1 %v4693_v34 }
 0x391   :  { %2832 = vmatmul.mubr.bf16.gmra.mrb[12].mxu1 %v2574_v41  ;;  %2885 = vmatmul.mubr.bf16.gmra.mrb[20].mxu0 %v2574_v41 }
 0x392   :  { %4522 = vmatpush3.bf16.msra.mxu0 %v4696_v39 }
 0x393   :  { %4494 = vmatpush3.bf16.msra.mxu1 %v4695_v16  ;;  %4523 = vmatprep.subr.bf16.mxu0 %v4698_v26 }
 0x394   :  { %4495 = vmatprep.subr.bf16.mxu1 %v4697_v3 }
 0x396   :  { %4524 = vmatpush3.bf16.msra.mxu0 %v4700_v32 }
 0x397   :  { %4496 = vmatpush3.bf16.msra.mxu1 %v4699_v21  ;;  %4525 = vmatprep.subr.bf16.mxu0 %v4702_v54 }
 0x398   :  { %4497 = vmatprep.subr.bf16.mxu1 %v4701_v8 }
 0x39a   :  { %4526 = vmatpush3.bf16.msra.mxu0 %v4704_v63 }
 0x39b   :  { %4498 = vmatpush3.bf16.msra.mxu1 %v4703_v14  ;;  %4527 = vmatprep.subr.bf16.mxu0 %v4706_v12 }
 0x39c   :  { %4499 = vmatprep.subr.bf16.mxu1 %v4705_v1 }
 0x39e   :  { %4528 = vmatpush3.bf16.msra.mxu0 %v4708_v57 }
 0x39f   :  { %4500 = vmatpush3.bf16.msra.mxu1 %v4707_v24  ;;  %4529 = vmatprep.subr.bf16.mxu0 %v4710_v31 }
 0x3a0   :  { %4501 = vmatprep.subr.bf16.mxu1 %v4709_v50 }
 0x3a2   :  { %4530 = vmatpush3.bf16.msra.mxu0 %v4712_v58 }
 0x3a3   :  { %4502 = vmatpush3.bf16.msra.mxu1 %v4711_v23  ;;  %4075 = vmatprep.subr.bf16.mxu0 %v4718_v19 }
 0x3a4   :  { %4022 = vmatprep.subr.bf16.mxu1 %v4715_v46 }
 0x44b   :  { %v2823_v62 = vpop.f32.mrb[8].mxu1  ;;  %v2876_v28 = vpop.f32.mrb[16].mxu0 }
 0x44c   :  { %v2824_v6 = vadd.f32 %v2823_v62, %v6209_v49  ;;  %v6222_v60 = vadd.f32 %v2876_v28, %v6212_v35  ;;  %v2825_v29 = vpop.f32.mrb[9].mxu1  ;;  %v2878_v4 = vpop.f32.mrb[17].mxu0 }
 0x44d   :  { %v6225_v38 = vadd.f32 %v2825_v29, %v6215_v0  ;;  %v6228_v11 = vadd.f32 %v2878_v4, %v6218_v33  ;;  %v2827_v48 = vpop.f32.mrb[10].mxu1  ;;  %v2880_v18 = vpop.f32.mrb[18].mxu0 }
 0x44e   :  { %v6230_v61 = vmul.f32 0.70710677, %v2824_v6  ;;  %v6233_v30 = vmul.f32 0.70710677, %v6222_v60  ;;  %v2829_v55 = vpop.f32.mrb[11].mxu1  ;;  %v2882_v41 = vpop.f32.mrb[19].mxu0  ;;  %v6251_v17 = vadd.f32 %v2827_v48, %v6209_v49  ;;  %v6258_v10 = vadd.f32 %v2880_v18, %v6212_v35 }
 0x44f   :  { %v6236_v20 = vmul.f32 0.70710677, %v6225_v38  ;;  %v6244_v44 = vmul.f32 0.70710677, %v6228_v11  ;;  %v6261_v40 = vadd.f32 %v2829_v55, %v6215_v0  ;;  %v6277_v32 = vadd.f32 %v2882_v41, %v6218_v33 }
 0x450   :  { %v2959_v27 = vand.u32 2147483647, %v6230_v61  ;;  %v2961_v42 = vand.u32 2147483647, %v6233_v30  ;;  %v6255_v5 = vmul.f32 0.70710677, %v6251_v17 }
 0x451   :  { %v6241_v7 = vand.u32 2147483647, %v6236_v20  ;;  %v6248_v52 = vand.u32 2147483647, %v6244_v44  ;;  %v6267_v43 = vmul.f32 0.70710677, %v6258_v10 }
 0x452   :  { %v2975_v36 = vmul.f32 0.3275911, %v2959_v27  ;;  %v2977_v22 = vmul.f32 0.3275911, %v2961_v42  ;;  %v6264_v34 = vand.u32 2147483647, %v6255_v5 }
 0x453   :  { %v2976_v51 = vmul.f32 0.3275911, %v6241_v7  ;;  %v2978_v37 = vmul.f32 0.3275911, %v6248_v52  ;;  %v3183_v16 = vsub.f32 0.0, %v2959_v27  ;;  %v3185_v8 = vsub.f32 0.0, %v2961_v42 }
 0x454   :  { %v2991_v25 = vadd.f32 1.0, %v2975_v36  ;;  %v2993_v15 = vadd.f32 1.0, %v2977_v22  ;;  %v2979_v39 = vmul.f32 0.3275911, %v6264_v34  ;;  %v6271_v3 = vand.u32 2147483647, %v6267_v43 }
 0x455   :  { %v2992_v53 = vadd.f32 1.0, %v2976_v51  ;;  %v2994_v59 = vadd.f32 1.0, %v2978_v37  ;;  %v6274_v26 = vmul.f32 0.70710677, %v6261_v40  ;;  %v3199_v1 = vmul.f32 %v3183_v16, %v2959_v27 }
 0x456   :  { %4793 = vrcp.f32 %v2991_v25  ;;  %v2995_v21 = vadd.f32 1.0, %v2979_v39  ;;  %v2981_v54 = vmul.f32 0.3275911, %v6271_v3  ;;  %v6287_v24 = vmul.f32 0.5, %v2824_v6 }
 0x457   :  { %4795 = vrcp.f32 %v2993_v15  ;;  %v6281_v14 = vand.u32 2147483647, %v6274_v26  ;;  %vm2927_vm0 = vcmp.ge.f32.partialorder %v6230_v61, 0.0  ;;  %v3184_v23 = vsub.f32 0.0, %v6241_v7 }
 0x458   :  { %4797 = vrcp.f32 %v2992_v53  ;;  %v2997_v47 = vadd.f32 1.0, %v2981_v54  ;;  %v6295_v58 = vmul.f32 0.70710677, %v6277_v32  ;;  %v3201_v28 = vmul.f32 %v3185_v8, %v2961_v42 }
 0x459   :  { %4799 = vrcp.f32 %v2994_v59  ;;  %v2980_v50 = vmul.f32 0.3275911, %v6281_v14  ;;  %v3215_v4 = vmul.f32 1.442695, %v3199_v1  ;;  %v6751_v27 = vmov -1.0  }
 0x45a   :  { %4801 = vrcp.f32 %v2995_v21  ;;  %v6300_v18 = vand.u32 2147483647, %v6295_v58  ;;  %v6303_v61 = vsel %vm2927_vm0, 1.0, %v6751_v27  ;;  %vm2929_vm1 = vcmp.ge.f32.partialorder %v6233_v30, 0.0 }
 0x45b   :  { %4803 = vrcp.f32 %v2997_v47  ;;  %v2996_v29 = vadd.f32 1.0, %v2980_v50  ;;  %v3187_v41 = vsub.f32 0.0, %v6264_v34  ;;  %v3219_v37 = vmul.f32 1.442695, %v3201_v28 }
 0x45c   :  { %v2982_v25 = vmul.f32 0.3275911, %v6300_v18  ;;  %v3200_v59 = vmul.f32 %v3184_v23, %v6241_v7  ;;  %v3186_v16 = vsub.f32 0.0, %v6248_v52  ;;  %v3189_v21 = vsub.f32 0.0, %v6271_v3 }
 0x45d   :  { %4805 = vrcp.f32 %v2996_v29  ;;  %v6330_v47 = vsel %vm2929_vm1, 1.0, %v6751_v27  ;;  %vm2931_vm2 = vcmp.ge.f32.partialorder %v6255_v5, 0.0  ;;  %vm2933_vm3 = vcmp.ge.f32.partialorder %v6267_v43, 0.0 }
 0x45e   :  { %4807 = vpow2.f32 %v3215_v4  ;;  %v2998_v8 = vadd.f32 1.0, %v2982_v25  ;;  %v3203_v4 = vmul.f32 %v3187_v41, %v6264_v34  ;;  %v3205_v25 = vmul.f32 %v3189_v21, %v6271_v3 }
 0x45f   :  { %vm2928_vm4 = vcmp.ge.f32.partialorder %v6236_v20, 0.0  ;;  %vm2932_vm5 = vcmp.ge.f32.partialorder %v6274_v26, 0.0  ;;  %v6471_v20 = vmul.f32 0.5, %v6228_v11  ;;  %vm2934_vm6 = vcmp.ge.f32.partialorder %v6295_v58, 0.0 }
 0x460   :  { %v6283_v63 = vpop.eup %4793  ;;  %4809 = vrcp.f32 %v2998_v8  ;;  %v3223_v8 = vmul.f32 1.442695, %v3203_v4  ;;  %vm2930_vm7 = vcmp.ge.f32.partialorder %v6244_v44, 0.0 }
 0x461   :  { %v6285_v12 = vpop.eup %4795  ;;  %v3039_v57 = vmul.f32 1.0614054, %v6283_v63  ;;  %4811 = vpow2.f32 %v3219_v37 }
 0x462   :  { %v3041_v31 = vmul.f32 1.0614054, %v6285_v12  ;;  %v6297_v6 = vpop.eup %4797  ;;  %4813 = vpow2.f32 %v3223_v8 }
 0x463   :  { %v3055_v62 = vadd.f32 -1.4531521, %v3039_v57  ;;  %v3040_v36 = vmul.f32 1.0614054, %v6297_v6  ;;  %v6317_v53 = vpop.eup %4799 }
 0x464   :  { %v3057_v48 = vadd.f32 -1.4531521, %v3041_v31  ;;  %v2833_v42 = vpop.f32.mrb[12].mxu1  ;;  %v6308_v22 = vpop.f32.mrb[20].mxu0  ;;  %v3042_v29 = vmul.f32 1.0614054, %v6317_v53 }
 0x465   :  { %v3071_v55 = vmul.f32 %v6283_v63, %v3055_v62  ;;  %v6313_v15 = vpop.f32.mrb[13].mxu1  ;;  %v6315_v46 = vpop.f32.mrb[21].mxu0  ;;  %v3056_v50 = vadd.f32 -1.4531521, %v3040_v36  ;;  %v6333_v7 = vadd.f32 %v2833_v42, %v6209_v49 }
 0x466   :  { %v3073_v51 = vmul.f32 %v6285_v12, %v3057_v48  ;;  %v6322_v54 = vpop.f32.mrb[14].mxu1  ;;  %v6324_v1 = vpop.f32.mrb[22].mxu0  ;;  %v3217_v48 = vmul.f32 1.442695, %v3200_v59 }
 0x467   :  { %v3087_v19 = vadd.f32 1.4214138, %v3071_v55  ;;  %6871 = vst [vmem:[#allocation36_spill] sm:$0xff] %v6333_v7  ;;  %v6335_v31 = vpop.f32.mrb[15].mxu1  ;;  %v6337_v23 = vpop.f32.mrb[23].mxu0  ;;  %v3202_v55 = vmul.f32 %v3186_v16, %v6248_v52  ;;  %v3072_v34 = vmul.f32 %v6297_v6, %v3056_v50 }
 0x468   :  { %v3089_v39 = vadd.f32 1.4214138, %v3073_v51  ;;  %v6339_v62 = vpop.eup %4801  ;;  %v6347_v51 = vmul.f32 0.5, %v6251_v17  ;;  %v6355_v59 = vmul.f32 0.70710677, %v6333_v7 }
 0x469   :  { %v3103_v57 = vmul.f32 %v6283_v63, %v3087_v19  ;;  %v3043_v36 = vmul.f32 1.0614054, %v6339_v62  ;;  %v6350_v19 = vpop.eup %4803  ;;  %v3058_v16 = vadd.f32 -1.4531521, %v3042_v29  ;;  %v3088_v27 = vadd.f32 1.4214138, %v3072_v34 }
 0x46a   :  { %v3105_v28 = vmul.f32 %v6285_v12, %v3089_v39  ;;  %6872 = vst [vmem:[#allocation37_spill] sm:$0xff] %v6355_v59  ;;  %v3045_v37 = vmul.f32 1.0614054, %v6350_v19  ;;  %v6361_v21 = vpop.eup %4805  ;;  %v6365_v29 = vand.u32 2147483647, %v6355_v59 }
 0x46b   :  { %v3119_v30 = vadd.f32 -0.28449672, %v3103_v57  ;;  %v3059_v41 = vadd.f32 -1.4531521, %v3043_v36  ;;  %v3221_v57 = vmul.f32 1.442695, %v3202_v55  ;;  %v4808_v4 = vpop.eup %4807  ;;  %v3104_v8 = vmul.f32 %v6297_v6, %v3088_v27 }
 0x46c   :  { %v3121_v42 = vadd.f32 -0.28449672, %v3105_v28  ;;  %v3061_v50 = vadd.f32 -1.4531521, %v3045_v37  ;;  %v6373_v34 = vpop.eup %4809  ;;  %v6873_v37 = vmov -1.0  }
 0x46d   :  { %v3135_v39 = vmul.f32 %v6283_v63, %v3119_v30  ;;  %v3075_v3 = vmul.f32 %v6339_v62, %v3059_v41  ;;  %v3227_v30 = vmul.f32 1.442695, %v3205_v25  ;;  %v3046_v9 = vmul.f32 1.0614054, %v6373_v34 }
 0x46e   :  { %v3137_v52 = vmul.f32 %v6285_v12, %v3121_v42  ;;  %v3074_v42 = vmul.f32 %v6317_v53, %v3058_v16  ;;  %v3077_v55 = vmul.f32 %v6350_v19, %v3061_v50  ;;  %v3120_v56 = vadd.f32 -0.28449672, %v3104_v8 }
 0x46f   :  { %v3151_v17 = vadd.f32 0.2548296, %v3135_v39  ;;  %v3091_v45 = vadd.f32 1.4214138, %v3075_v3  ;;  %v3044_v39 = vmul.f32 1.0614054, %v6361_v21  ;;  %4815 = vpow2.f32 %v3227_v30 }
 0x470   :  { %v3153_v28 = vadd.f32 0.2548296, %v3137_v52  ;;  %v3093_v3 = vadd.f32 1.4214138, %v3077_v55  ;;  %4817 = vpow2.f32 %v3217_v48  ;;  %v2948_v26 = vsel %vm2932_vm5, 1.0, %v6873_v37 }
 0x471   :  { %v3167_v36 = vmul.f32 %v6283_v63, %v3151_v17  ;;  %v3107_v25 = vmul.f32 %v6339_v62, %v3091_v45  ;;  %v3188_v63 = vsub.f32 0.0, %v6281_v14  ;;  %v2947_v17 = vsel %vm2931_vm2, 1.0, %v6873_v37 }
 0x472   :  { %v3169_v52 = vmul.f32 %v6285_v12, %v3153_v28  ;;  %v3060_v16 = vadd.f32 -1.4531521, %v3044_v39  ;;  %v2983_v12 = vmul.f32 0.3275911, %v6365_v29  ;;  %v4812_v28 = vpop.eup %4811  ;;  %v3090_v45 = vadd.f32 1.4214138, %v3074_v42 }
 0x473   :  { %v3247_v41 = vmul.f32 %v4808_v4, %v3167_v36  ;;  %v3123_v50 = vadd.f32 -0.28449672, %v3107_v25  ;;  %v3190_v36 = vsub.f32 0.0, %v6300_v18  ;;  %v3109_v4 = vmul.f32 %v6350_v19, %v3093_v3 }
 0x474   :  { %v3076_v13 = vmul.f32 %v6361_v21, %v3060_v16  ;;  %v3249_v2 = vmul.f32 %v4812_v28, %v3169_v52  ;;  %v3204_v55 = vmul.f32 %v3188_v63, %v6281_v14  ;;  %v3062_v25 = vadd.f32 -1.4531521, %v3046_v9 }
 0x475   :  { %v3263_v5 = vsub.f32 1.0, %v3247_v41  ;;  %v3139_v30 = vmul.f32 %v6339_v62, %v3123_v50  ;;  %v3125_v27 = vadd.f32 -0.28449672, %v3109_v4  ;;  %v3206_v42 = vmul.f32 %v3190_v36, %v6300_v18 }
 0x476   :  { %v3092_v39 = vadd.f32 1.4214138, %v3076_v13  ;;  %v2999_v59 = vadd.f32 1.0, %v2983_v12  ;;  %v3106_v3 = vmul.f32 %v6317_v53, %v3090_v45  ;;  %v3078_v52 = vmul.f32 %v6373_v34, %v3062_v25  ;;  %v4814_v13 = vpop.eup %4813 }
 0x477   :  { %v3155_v7 = vadd.f32 0.2548296, %v3139_v30  ;;  %v3141_v16 = vmul.f32 %v6350_v19, %v3125_v27  ;;  %v3265_v50 = vsub.f32 1.0, %v3249_v2  ;;  %4819 = vpow2.f32 %v3221_v57 }
 0x478   :  { %v3108_v41 = vmul.f32 %v6361_v21, %v3092_v39  ;;  %v3225_v48 = vmul.f32 1.442695, %v3204_v55  ;;  %v3279_v9 = vmul.f32 %v3263_v5, %v6303_v61  ;;  %v3094_v18 = vadd.f32 1.4214138, %v3078_v52 }
 0x479   :  { %v3171_v14 = vmul.f32 %v6339_v62, %v3155_v7  ;;  %v3157_v63 = vadd.f32 0.2548296, %v3141_v16  ;;  %v3229_v12 = vmul.f32 1.442695, %v3206_v42  ;;  %4821 = vrcp.f32 %v2999_v59  ;;  %v4816_v45 = vpop.eup %4815 }
 0x47a   :  { %v3124_v8 = vadd.f32 -0.28449672, %v3108_v41  ;;  %v6395_v28 = vadd.f32 %v6308_v22, %v6212_v35  ;;  %v3136_v2 = vmul.f32 %v6297_v6, %v3120_v56  ;;  %v3122_v57 = vadd.f32 -0.28449672, %v3106_v3  ;;  %v4818_v27 = vpop.eup %4817 }
 0x47b   :  { %v3251_v36 = vmul.f32 %v4814_v13, %v3171_v14  ;;  %v3173_v7 = vmul.f32 %v6350_v19, %v3157_v63  ;;  %v3110_v62 = vmul.f32 %v6373_v34, %v3094_v18  ;;  %4823 = vpow2.f32 %v3225_v48 }
 0x47c   :  { %v3140_v61 = vmul.f32 %v6361_v21, %v3124_v8  ;;  %v3295_v5 = vadd.f32 1.0, %v3279_v9  ;;  %v3281_v59 = vmul.f32 %v3265_v50, %v6330_v47  ;;  %4825 = vpow2.f32 %v3229_v12 }
 0x47d   :  { %v3267_v4 = vsub.f32 1.0, %v3251_v36  ;;  %v3253_v30 = vmul.f32 %v4816_v45, %v3173_v7  ;;  %v3126_v22 = vadd.f32 -0.28449672, %v3110_v62  ;;  %v6404_v56 = vmul.f32 0.70710677, %v6395_v28 }
 0x47e   :  { %v6408_v19 = vadd.f32 %v6313_v15, %v6215_v0  ;;  %v3152_v39 = vadd.f32 0.2548296, %v3136_v2  ;;  %v3138_v25 = vmul.f32 %v6317_v53, %v3122_v57  ;;  %v2949_v47 = vsel %vm2933_vm3, 1.0, %v6873_v37 }
 0x47f   :  { %v3283_v55 = vmul.f32 %v3267_v4, %v2947_v17  ;;  %v3269_v42 = vsub.f32 1.0, %v3253_v30  ;;  %v3142_v3 = vmul.f32 %v6373_v34, %v3126_v22  ;;  %v3156_v17 = vadd.f32 0.2548296, %v3140_v61 }
 0x480   :  { %v6416_v41 = vand.u32 2147483647, %v6404_v56  ;;  %v6419_v52 = vmul.f32 %v3295_v5, %v6287_v24  ;;  %v2897_v15 = vmul.f32 0.5, %v6222_v60  ;;  %v3297_v50 = vadd.f32 1.0, %v3281_v59 }
 0x481   :  { %v3299_v16 = vadd.f32 1.0, %v3283_v55  ;;  %v3285_v14 = vmul.f32 %v3269_v42, %v2949_v47  ;;  %v4820_v48 = vpop.eup %4819  ;;  %v3158_v9 = vadd.f32 0.2548296, %v3142_v3  ;;  %v6427_v43 = vmul.f32 0.70710677, %v6408_v19 }
 0x482   :  { %v2985_v63 = vmul.f32 0.3275911, %v6416_v41  ;;  %v3168_v8 = vmul.f32 %v6297_v6, %v3152_v39  ;;  %v3154_v18 = vadd.f32 0.2548296, %v3138_v25  ;;  %v2901_v24 = vmul.f32 0.5, %v6258_v10 }
 0x483   :  { %v6423_v13 = vmul.f32 %v3299_v16, %v6347_v51  ;;  %v3301_v36 = vadd.f32 1.0, %v3285_v14  ;;  %v6431_v12 = vpop.eup %4821  ;;  %v3172_v51 = vmul.f32 %v6361_v21, %v3156_v17  ;;  %v6436_v2 = vmul.f32 %v3297_v50, %v2897_v15 }
 0x484   :  { %v3001_v45 = vadd.f32 1.0, %v2985_v63  ;;  %v3047_v7 = vmul.f32 1.0614054, %v6431_v12  ;;  %v3174_v6 = vmul.f32 %v6373_v34, %v3158_v9  ;;  %v6443_v10 = vand.u32 2147483647, %v6427_v43 }
 0x485   :  { %v3327_v60 = vpack.c.bf16 %v6423_v13, %v6419_v52  ;;  %v6438_v57 = vmul.f32 %v3301_v36, %v2901_v24  ;;  %v4824_v62 = vpop.eup %4823  ;;  %v6447_v4 = vadd.f32 %v6315_v46, %v6218_v33  ;;  %v3248_v61 = vmul.f32 %v4818_v27, %v3168_v8 }
 0x486   :  { %4827 = vrcp.f32 %v3001_v45  ;;  %v3170_v21 = vmul.f32 %v6317_v53, %v3154_v18  ;;  %v4826_v59 = vpop.eup %4825  ;;  %v3252_v30 = vmul.f32 %v4824_v62, %v3172_v51  ;;  %v2984_v22 = vmul.f32 0.3275911, %v6443_v10 }
 0x487   :  { %v3329_v5 = vpack.c.bf16 %v6438_v57, %v6436_v2  ;;  %v2896_v34 = vmul.f32 0.5, %v6225_v38  ;;  %v3063_v55 = vadd.f32 -1.4531521, %v3047_v7  ;;  %v6456_v39 = vmul.f32 0.70710677, %v6447_v4 }
 0x488   :  { %v3254_v46 = vmul.f32 %v4826_v59, %v3174_v6  ;;  %v3000_v25 = vadd.f32 1.0, %v2984_v22  ;;  %v6460_v53 = vadd.f32 %v6322_v54, %v6209_v49  ;;  %v6464_v27 = vadd.f32 %v6324_v1, %v6212_v35  ;;  %v4733_v2 = vld [vmem:[#allocation12 + $0x94] ss:$24 sps:$4 sm:$0xff]  }
 0x489   :  { %v3264_v42 = vsub.f32 1.0, %v3248_v61  ;;  %v3250_v3 = vmul.f32 %v4820_v48, %v3170_v21  ;;  %v6468_v38 = vand.u32 2147483647, %v6456_v39  ;;  %v3268_v16 = vsub.f32 1.0, %v3252_v30 }
 0x48a   :  { %4829 = vrcp.f32 %v3000_v25  ;;  %v2944_v49 = vsel %vm2928_vm4, 1.0, %v6873_v37  ;;  %v3079_v35 = vmul.f32 %v6431_v12, %v3063_v55  ;;  %v3270_v1 = vsub.f32 1.0, %v3254_v46 }
 0x48b   :  { %v2986_v54 = vmul.f32 0.3275911, %v6468_v38  ;;  %v6480_v47 = vmul.f32 0.70710677, %v6460_v53  ;;  %v6483_v11 = vmul.f32 0.70710677, %v6464_v27  ;;  %v3280_v17 = vmul.f32 %v3264_v42, %v2944_v49 }
 0x48c   :  { %v3266_v58 = vsub.f32 1.0, %v3250_v3  ;;  %v2950_v15 = vsel %vm2934_vm6, 1.0, %v6873_v37  ;;  %v3284_v48 = vmul.f32 %v3268_v16, %v2948_v26  ;;  %v3191_v9 = vsub.f32 0.0, %v6365_v29 }
 0x48d   :  { %v3002_v50 = vadd.f32 1.0, %v2986_v54  ;;  %v2971_v63 = vand.u32 2147483647, %v6480_v47  ;;  %v6491_v8 = vand.u32 2147483647, %v6483_v11  ;;  %v6496_v36 = vadd.f32 %v6335_v31, %v6215_v0 }
 0x48e   :  { %v3095_v18 = vadd.f32 1.4214138, %v3079_v35  ;;  %v2946_v51 = vsel %vm2930_vm7, 1.0, %v6873_v37  ;;  %v3286_v45 = vmul.f32 %v3270_v1, %v2950_v15  ;;  %v3193_v7 = vsub.f32 0.0, %v6416_v41 }
 0x48f   :  { %4831 = vrcp.f32 %v3002_v50  ;;  %v2987_v62 = vmul.f32 0.3275911, %v2971_v63  ;;  %v3296_v6 = vadd.f32 1.0, %v3280_v17  ;;  %v2900_v61 = vmul.f32 0.5, %v6261_v40 }
 0x490   :  { %v6486_v14 = vpop.eup %4827  ;;  %v2989_v59 = vmul.f32 0.3275911, %v6491_v8  ;;  %v3282_v30 = vmul.f32 %v3266_v58, %v2946_v51  ;;  %v3300_v22 = vadd.f32 1.0, %v3284_v48  ;;  %v3207_v55 = vmul.f32 %v3191_v9, %v6365_v29 }
 0x491   :  { %v3049_v24 = vmul.f32 1.0614054, %v6486_v14  ;;  %v3003_v0 = vadd.f32 1.0, %v2987_v62  ;;  %v3111_v31 = vmul.f32 %v6431_v12, %v3095_v18  ;;  %v6508_v25 = vmul.f32 0.70710677, %v6496_v36 }
 0x492   :  { %v3005_v46 = vadd.f32 1.0, %v2989_v59  ;;  %v3302_v3 = vadd.f32 1.0, %v3286_v45  ;;  %v3209_v40 = vmul.f32 %v3193_v7, %v6416_v41  ;;  %v3192_v16 = vsub.f32 0.0, %v6443_v10  ;;  %v4713_v45 = vld [vmem:[#allocation12] ss:$24 sps:$4 sm:$0xff]  }
 0x493   :  { %v3065_v21 = vadd.f32 -1.4531521, %v3049_v24  ;;  %4833 = vrcp.f32 %v3003_v0  ;;  %v6517_v35 = vadd.f32 %v6337_v23, %v6218_v33  ;;  %v3312_v54 = vmul.f32 %v3296_v6, %v2896_v34 }
 0x494   :  { %v6510_v42 = vpop.eup %4829  ;;  %4835 = vrcp.f32 %v3005_v46  ;;  %v3316_v26 = vmul.f32 %v3300_v22, %v2900_v61  ;;  %v2902_v1 = vmul.f32 0.5, %v6277_v32  ;;  %v6521_v17 = vand.u32 2147483647, %v6508_v25  ;;  %v4721_v22 = vld [vmem:[#allocation12 + $0x34] ss:$24 sps:$4 sm:$0xff]  }
 0x495   :  { %v3081_v44 = vmul.f32 %v6486_v14, %v3065_v21  ;;  %v3048_v29 = vmul.f32 1.0614054, %v6510_v42  ;;  %v3127_v58 = vadd.f32 -0.28449672, %v3111_v31  ;;  %v3231_v41 = vmul.f32 1.442695, %v3207_v55 }
 0x496   :  { %v3298_v48 = vadd.f32 1.0, %v3282_v30  ;;  %v3235_v9 = vmul.f32 1.442695, %v3209_v40  ;;  %v3195_v18 = vsub.f32 0.0, %v2971_v63  ;;  %v2988_v24 = vmul.f32 0.3275911, %v6521_v17 }
 0x497   :  { %v3097_v49 = vadd.f32 1.4214138, %v3081_v44  ;;  %v3064_v50 = vadd.f32 -1.4531521, %v3048_v29  ;;  %v3318_v33 = vmul.f32 %v3302_v3, %v2902_v1  ;;  %v3208_v32 = vmul.f32 %v3192_v16, %v6443_v10  ;;  %v4716_v31 = vld [vmem:[#allocation12 + $0x8] ss:$24 sps:$4 sm:$0xff]  }
 0x498   :  { %v6530_v34 = vmul.f32 0.70710677, %v6517_v35  ;;  %v3004_v6 = vadd.f32 1.0, %v2988_v24  ;;  %v3328_v61 = vpack.c.bf16 %v3316_v26, %v3312_v54  ;;  %v3143_v21 = vmul.f32 %v6431_v12, %v3127_v58  ;;  %v4719_v40 = vld [vmem:[#allocation12 + $0x30] ss:$24 sps:$4 sm:$0xff]  }
 0x499   :  { %v3113_v15 = vmul.f32 %v6486_v14, %v3097_v49  ;;  %v6525_v51 = vpop.eup %4831  ;;  %v3080_v23 = vmul.f32 %v6510_v42, %v3064_v50  ;;  %4837 = vpow2.f32 %v3231_v41  ;;  %v3197_v30 = vsub.f32 0.0, %v6491_v8  ;;  %v4724_v54 = vld [vmem:[#allocation12 + $0x3c] ss:$24 sps:$4 sm:$0xff]  }
 0x49a   :  { %v3050_v62 = vmul.f32 1.0614054, %v6525_v51  ;;  %v3314_v55 = vmul.f32 %v3298_v48, %v6471_v20  ;;  %v3211_v10 = vmul.f32 %v3195_v18, %v2971_v63  ;;  %4839 = vrcp.f32 %v3004_v6  ;;  %3630 = vmatprep.mubr.bf16.mxu1 %v3328_v61  ;;  %v4727_v26 = vld [vmem:[#allocation12 + $0x64] ss:$24 sps:$4 sm:$0xff]   ;;  %v4722_v48 = vld [vmem:[#allocation12 + $0x38] ss:$24 sps:$4 sm:$0xff]  }
 0x49b   :  { %v3129_v7 = vadd.f32 -0.28449672, %v3113_v15  ;;  %v3096_v59 = vadd.f32 1.4214138, %v3080_v23  ;;  %4841 = vpow2.f32 %v3235_v9  ;;  %v3233_v46 = vmul.f32 1.442695, %v3208_v32  ;;  %3631 = vmatmul.mubr.bf16.vlgmr.msra.gmra.mrb[16].mxu1 %v3327_v60 }
 0x49c   :  { %v3066_v0 = vadd.f32 -1.4531521, %v3050_v62  ;;  %v6538_v3 = vand.u32 2147483647, %v6530_v34  ;;  %v3194_v49 = vsub.f32 0.0, %v6468_v38  ;;  %v3330_v29 = vpack.c.bf16 %v3318_v33, %v3314_v55  ;;  %4023 = vmatpush1.bf16.msra.mxu1 %v4713_v45  ;;  %v6874_v18 = vld [vmem:[#allocation37_spill] sm:$0xff] }
 0x49d   :  { %v3112_v44 = vmul.f32 %v6510_v42, %v3096_v59  ;;  %v6543_v16 = vpop.eup %4833  ;;  %v3145_v20 = vmul.f32 %v6486_v14, %v3129_v7  ;;  %v3159_v58 = vadd.f32 0.2548296, %v3143_v21  ;;  %v3213_v52 = vmul.f32 %v3197_v30, %v6491_v8  ;;  %4024 = vmatprep.subr.bf16.mxu1 %v4721_v22  ;;  %v4725_v9 = vld [vmem:[#allocation12 + $0x60] ss:$24 sps:$4 sm:$0xff]   ;;  %v4730_v59 = vld [vmem:[#allocation12 + $0x6c] ss:$24 sps:$4 sm:$0xff]  }
 0x49e   :  { %v3082_v63 = vmul.f32 %v6525_v51, %v3066_v0  ;;  %v6548_v1 = vpop.eup %4835  ;;  %v3051_v41 = vmul.f32 1.0614054, %v6543_v16  ;;  %v2990_v13 = vmul.f32 0.3275911, %v6538_v3  ;;  %v3239_v15 = vmul.f32 1.442695, %v3211_v10  ;;  %3679 = vmatprep.mubr.bf16.mxu0 %v3330_v29 }
 0x49f   :  { %v3053_v50 = vmul.f32 1.0614054, %v6548_v1  ;;  %vm2935_vm8 = vcmp.ge.f32.partialorder %v6874_v18, 0.0  ;;  %v3128_v24 = vadd.f32 -0.28449672, %v3112_v44  ;;  %3680 = vmatmul.mubr.bf16.vlgmr.msra.gmra.mrb[24].mxu0 %v3329_v5  ;;  %v6875_v8 = vld [vmem:[#allocation36_spill] sm:$0xff]  ;;  %v3210_v6 = vmul.f32 %v3194_v49, %v6468_v38 }
 0x4a0   :  { %v3098_v60 = vadd.f32 1.4214138, %v3082_v63  ;;  %v3067_v33 = vadd.f32 -1.4531521, %v3051_v41  ;;  %v3006_v23 = vadd.f32 1.0, %v2990_v13  ;;  %v6559_v32 = vmul.f32 0.5, %v6875_v8  ;;  %4076 = vmatpush1.bf16.msra.mxu0 %v4716_v31  ;;  %4025 = vmatpush1.bf16.msra.mxu1 %v4719_v40 }
 0x4a1   :  { %v3161_v45 = vadd.f32 0.2548296, %v3145_v20  ;;  %v3069_v7 = vadd.f32 -1.4531521, %v3053_v50  ;;  %v3196_v62 = vsub.f32 0.0, %v6521_v17  ;;  %4077 = vmatprep.subr.bf16.mxu0 %v4724_v54  ;;  %4026 = vmatprep.subr.bf16.mxu1 %v4727_v26  ;;  %v6567_v57 = vsel %vm2935_vm8, 1.0, %v6873_v37 }
 0x4a2   :  { %v3083_v61 = vmul.f32 %v6543_v16, %v3067_v33  ;;  %v3243_v21 = vmul.f32 1.442695, %v3213_v52  ;;  %4843 = vrcp.f32 %v3006_v23  ;;  %v3175_v5 = vmul.f32 %v6431_v12, %v3159_v58  ;;  %v4728_v10 = vld [vmem:[#allocation12 + $0x68] ss:$24 sps:$4 sm:$0xff]   ;;  %v4736_v63 = vld [vmem:[#allocation12 + $0x9c] ss:$24 sps:$4 sm:$0xff]  }
 0x4a3   :  { %v3114_v30 = vmul.f32 %v6525_v51, %v3098_v60  ;;  %v3085_v22 = vmul.f32 %v6548_v1, %v3069_v7  ;;  %v4838_v38 = vpop.eup %4837  ;;  %vm2937_vm9 = vcmp.ge.f32.partialorder %v6404_v56, 0.0  ;;  %v3144_v55 = vmul.f32 %v6510_v42, %v3128_v24  ;;  %v4731_v20 = vld [vmem:[#allocation12 + $0x90] ss:$24 sps:$4 sm:$0xff]   ;;  %v4739_v26 = vld [vmem:[#allocation12 + $0xc4] ss:$24 sps:$4 sm:$0xff]  }
 0x4a4   :  { %4845 = vpow2.f32 %v3233_v46  ;;  %v3099_v0 = vadd.f32 1.4214138, %v3083_v61  ;;  %v6574_v31 = vpop.eup %4839  ;;  %v3177_v44 = vmul.f32 %v6486_v14, %v3161_v45  ;;  %v3212_v12 = vmul.f32 %v3196_v62, %v6521_v17  ;;  %4078 = vmatpush1.bf16.msra.mxu0 %v4722_v48  ;;  %4027 = vmatpush1.bf16.msra.mxu1 %v4725_v9  ;;  %v4734_v52 = vld [vmem:[#allocation12 + $0x98] ss:$24 sps:$4 sm:$0xff]   ;;  %v4742_v45 = vld [vmem:[#allocation12 + $0xcc] ss:$24 sps:$4 sm:$0xff]  }
 0x4a5   :  { %4847 = vpow2.f32 %v3239_v15  ;;  %v3101_v40 = vadd.f32 1.4214138, %v3085_v22  ;;  %v4842_v49 = vpop.eup %4841  ;;  %v3237_v29 = vmul.f32 1.442695, %v3210_v6  ;;  %v3052_v46 = vmul.f32 1.0614054, %v6574_v31  ;;  %4079 = vmatprep.subr.bf16.mxu0 %v4730_v59  ;;  %4028 = vmatprep.subr.bf16.mxu1 %v4733_v2 }
 0x4a6   :  { %v3115_v54 = vmul.f32 %v6543_v16, %v3099_v0  ;;  %4849 = vpow2.f32 %v3243_v21  ;;  %v3255_v58 = vmul.f32 %v4838_v38, %v3175_v5  ;;  %v3130_v14 = vadd.f32 -0.28449672, %v3114_v30  ;;  %v4737_v18 = vld [vmem:[#allocation12 + $0xc0] ss:$24 sps:$4 sm:$0xff]  }
 0x4a7   :  { %v3117_v41 = vmul.f32 %v6548_v1, %v3101_v40  ;;  %v3198_v17 = vsub.f32 0.0, %v6538_v3  ;;  %v3160_v13 = vadd.f32 0.2548296, %v3144_v55  ;;  %v3068_v15 = vadd.f32 -1.4531521, %v3052_v46 }
 0x4a8   :  { %v3131_v60 = vadd.f32 -0.28449672, %v3115_v54  ;;  %v3257_v50 = vmul.f32 %v4842_v49, %v3177_v44  ;;  %v3241_v9 = vmul.f32 1.442695, %v3212_v12  ;;  %4080 = vmatpush1.bf16.msra.mxu0 %v4728_v10  ;;  %4029 = vmatpush1.bf16.msra.mxu1 %v4731_v20  ;;  %v6583_v24 = vmul.f32 0.5, %v6395_v28 }
 0x4a9   :  { %v3133_v48 = vadd.f32 -0.28449672, %v3117_v41  ;;  %v2953_v33 = vsel %vm2937_vm9, 1.0, %v6873_v37  ;;  %v3084_v8 = vmul.f32 %v6574_v31, %v3068_v15  ;;  %4081 = vmatprep.subr.bf16.mxu0 %v4736_v63  ;;  %4030 = vmatprep.subr.bf16.mxu1 %v4739_v26  ;;  %v3271_v7 = vsub.f32 1.0, %v3255_v58  ;;  %v4740_v2 = vld [vmem:[#allocation12 + $0xc8] ss:$24 sps:$4 sm:$0xff]  }
 0x4aa   :  { %v3147_v23 = vmul.f32 %v6543_v16, %v3131_v60  ;;  %v3146_v62 = vmul.f32 %v6525_v51, %v3130_v14  ;;  %4851 = vpow2.f32 %v3237_v29  ;;  %v3176_v28 = vmul.f32 %v6510_v42, %v3160_v13 }
 0x4ab   :  { %v3149_v6 = vmul.f32 %v6548_v1, %v3133_v48  ;;  %v3100_v56 = vadd.f32 1.4214138, %v3084_v8  ;;  %v3214_v59 = vmul.f32 %v3198_v17, %v6538_v3  ;;  %v3273_v5 = vsub.f32 1.0, %v3257_v50 }
 0x4ac   :  { %v6592_v61 = vpop.eup %4843  ;;  %v3163_v21 = vadd.f32 0.2548296, %v3147_v23  ;;  %4853 = vpow2.f32 %v3241_v9  ;;  %4082 = vmatpush1.bf16.msra.mxu0 %v4734_v52  ;;  %4031 = vmatpush1.bf16.msra.mxu1 %v4737_v18  ;;  %vm2939_vm10 = vcmp.ge.f32.partialorder %v6480_v47, 0.0  ;;  %vm2941_vm11 = vcmp.ge.f32.partialorder %v6483_v11, 0.0 }
 0x4ad   :  { %v3165_v30 = vadd.f32 0.2548296, %v3149_v6  ;;  %v3054_v22 = vmul.f32 1.0614054, %v6592_v61  ;;  %v3116_v42 = vmul.f32 %v6574_v31, %v3100_v56  ;;  %4083 = vmatprep.subr.bf16.mxu0 %v4742_v45  ;;  %v3287_v3 = vmul.f32 %v3271_v7, %v6567_v57 }
 0x4ae   :  { %v4846_v38 = vpop.eup %4845  ;;  %v3179_v55 = vmul.f32 %v6543_v16, %v3163_v21  ;;  %v3162_v10 = vadd.f32 0.2548296, %v3146_v62  ;;  %v3245_v29 = vmul.f32 1.442695, %v3214_v59  ;;  %v3289_v54 = vmul.f32 %v3273_v5, %v2953_v33 }
 0x4af   :  { %v4848_v0 = vpop.eup %4847  ;;  %v3181_v44 = vmul.f32 %v6548_v1, %v3165_v30  ;;  %v3070_v40 = vadd.f32 -1.4531521, %v3054_v22  ;;  %v3256_v20 = vmul.f32 %v4846_v38, %v3176_v28  ;;  %v3132_v49 = vadd.f32 -0.28449672, %v3116_v42 }
 0x4b0   :  { %v4850_v12 = vpop.eup %4849  ;;  %v3259_v63 = vmul.f32 %v4848_v0, %v3179_v55  ;;  %vm2936_vm12 = vcmp.ge.f32.partialorder %v6427_v43, 0.0  ;;  %4084 = vmatpush1.bf16.msra.mxu0 %v4740_v2  ;;  %v2955_v57 = vsel %vm2939_vm10, 1.0, %v6873_v37  ;;  %v2957_v1 = vsel %vm2941_vm11, 1.0, %v6873_v37 }
 0x4b1   :  { %v3261_v16 = vmul.f32 %v4850_v12, %v3181_v44  ;;  %v3086_v46 = vmul.f32 %v6592_v61, %v3070_v40  ;;  %v3148_v58 = vmul.f32 %v6574_v31, %v3132_v49  ;;  %v3303_v14 = vadd.f32 1.0, %v3287_v3 }
 0x4b2   :  { %v3275_v26 = vsub.f32 1.0, %v3259_v63  ;;  %v3178_v41 = vmul.f32 %v6525_v51, %v3162_v10  ;;  %v3272_v13 = vsub.f32 1.0, %v3256_v20  ;;  %4855 = vpow2.f32 %v3245_v29 }
 0x4b3   :  { %v3277_v17 = vsub.f32 1.0, %v3261_v16  ;;  %v3102_v52 = vadd.f32 1.4214138, %v3086_v46  ;;  %v3164_v15 = vadd.f32 0.2548296, %v3148_v58  ;;  %v3305_v48 = vadd.f32 1.0, %v3289_v54 }
 0x4b4   :  { %v3291_v60 = vmul.f32 %v3275_v26, %v2955_v57  ;;  %v4852_v50 = vpop.eup %4851  ;;  %v2952_v47 = vsel %vm2936_vm12, 1.0, %v6873_v37  ;;  %v2907_v18 = vmul.f32 0.5, %v6460_v53  ;;  %v2909_v51 = vmul.f32 0.5, %v6464_v27  ;;  %v4745_v57 = vld [vmem:[#allocation12 + $0xf4] ss:$24 sps:$4 sm:$0xff]  }
 0x4b5   :  { %v3293_v9 = vmul.f32 %v3277_v17, %v2957_v1  ;;  %v3118_v11 = vmul.f32 %v6592_v61, %v3102_v52  ;;  %v3180_v23 = vmul.f32 %v6574_v31, %v3164_v15  ;;  %v3258_v45 = vmul.f32 %v4852_v50, %v3178_v41  ;;  %v4746_v26 = vld [vmem:[#allocation12 + $0xf8] ss:$24 sps:$4 sm:$0xff]   ;;  %v4748_v1 = vld [vmem:[#allocation12 + $0xfc] ss:$24 sps:$4 sm:$0xff]   ;;  %4032 = vmatprep.subr.bf16.mxu1 %v4745_v57  ;;  %v4752_v58 = vld [vmem:[#allocation12 + $0x128] ss:$24 sps:$4 sm:$0xff]  }
 0x4b6   :  { %v3307_v33 = vadd.f32 1.0, %v3291_v60  ;;  %v4854_v8 = vpop.eup %4853  ;;  %vm2940_vm13 = vcmp.ge.f32.partialorder %v6508_v25, 0.0  ;;  %v3319_v6 = vmul.f32 %v3303_v14, %v6559_v32  ;;  %v3288_v43 = vmul.f32 %v3272_v13, %v2952_v47  ;;  %4085 = vmatprep.subr.bf16.mxu0 %v4748_v1  ;;  %v4754_v14 = vld [vmem:[#allocation12 + $0x12c] ss:$24 sps:$4 sm:$0xff]   ;;  %v4755_v17 = vld [vmem:[#allocation12 + $0x150] ss:$24 sps:$4 sm:$0xff]  }
 0x4b7   :  { %v3309_v7 = vadd.f32 1.0, %v3293_v9  ;;  %v3134_v62 = vadd.f32 -0.28449672, %v3118_v11  ;;  %v3260_v21 = vmul.f32 %v4854_v8, %v3180_v23  ;;  %v3321_v56 = vmul.f32 %v3305_v48, %v6583_v24  ;;  %4086 = vmatpush1.bf16.msra.mxu0 %v4746_v26  ;;  %v4757_v41 = vld [vmem:[#allocation12 + $0x154] ss:$24 sps:$4 sm:$0xff]   ;;  %v6879_v1 = vld [vmem:[#allocation55_spill] sm:$0xff] }
 0x4b8   :  { %v3323_v28 = vmul.f32 %v3307_v33, %v2907_v18  ;;  %vm2938_vm14 = vcmp.ge.f32.partialorder %v6456_v39, 0.0  ;;  %v3274_v2 = vsub.f32 1.0, %v3258_v45  ;;  %v2956_v5 = vsel %vm2940_vm13, 1.0, %v6873_v37  ;;  %4087 = vmatprep.subr.bf16.mxu0 %v4754_v14  ;;  %v4760_v52 = vld [vmem:[#allocation12 + $0x15c] ss:$24 sps:$4 sm:$0xff]  }
 0x4b9   :  { %v3325_v59 = vmul.f32 %v3309_v7, %v2909_v51  ;;  %v3150_v53 = vmul.f32 %v6592_v61, %v3134_v62  ;;  %v3276_v27 = vsub.f32 1.0, %v3260_v21  ;;  %v3304_v22 = vadd.f32 1.0, %v3288_v43  ;;  %v4758_v13 = vld [vmem:[#allocation12 + $0x158] ss:$24 sps:$4 sm:$0xff]   ;;  %v4763_v60 = vld [vmem:[#allocation12 + $0x14] ss:$24 sps:$4 sm:$0xff]  }
 0x4ba   :  { %v3331_v31 = vpack.c.bf16 %v3323_v28, %v3319_v6  ;;  %v2904_v42 = vmul.f32 0.5, %v6408_v19  ;;  %v2954_v24 = vsel %vm2938_vm14, 1.0, %v6873_v37  ;;  %v2908_v0 = vmul.f32 0.5, %v6496_v36  ;;  %v6639_v50 = vld [vmem:[%s6686_s12] ss:$0 sm:$0xff]  ;;  %v6877_v21 = vld [vmem:[#allocation34_spill] sm:$0xff] }
 0x4bb   :  { %v3166_v30 = vadd.f32 0.2548296, %v3150_v53  ;;  %v3333_v25 = vpack.c.bf16 %v3325_v59, %v3321_v56  ;;  %v3292_v38 = vmul.f32 %v3276_v27, %v2956_v5  ;;  %v3290_v39 = vmul.f32 %v3274_v2, %v2954_v24  ;;  %4088 = vmatpush1.bf16.msra.mxu0 %v4752_v58  ;;  %v6878_v59 = vld [vmem:[#allocation39_spill] sm:$0xff]  ;;  %v4761_v27 = vld [vmem:[#allocation12 + $0x10] ss:$24 sps:$4 sm:$0xff]  }
 0x4bc   :  { %v4856_v55 = vpop.eup %4855  ;;  %vm2942_vm15 = vcmp.ge.f32.partialorder %v6530_v34, 0.0  ;;  %v3320_v44 = vmul.f32 %v3304_v22, %v2904_v42  ;;  %v2906_v19 = vmul.f32 0.5, %v6447_v4  ;;  %v2910_v29 = vmul.f32 0.5, %v6517_v35  ;;  %v4749_v4 = vld [vmem:[#allocation12 + $0x120] ss:$24 sps:$4 sm:$0xff]   ;;  %4089 = vmatprep.subr.bf16.mxu0 %v4760_v52 }
 0x4bd   :  { %v3182_v32 = vmul.f32 %v6592_v61, %v3166_v30  ;;  %v3308_v3 = vadd.f32 1.0, %v3292_v38  ;;  %v2958_v20 = vsel %vm2942_vm15, 1.0, %v6873_v37  ;;  %v3306_v49 = vadd.f32 1.0, %v3290_v39  ;;  %v4743_v37 = vld [vmem:[#allocation12 + $0xf0] ss:$24 sps:$4 sm:$0xff]  }
 0x4be   :  { %v6876_v36 = vmov 0   ;;  %4033 = vmatpush1.bf16.msra.mxu1 %v4743_v37  ;;  %v4751_v35 = vld [vmem:[#allocation12 + $0x124] ss:$24 sps:$4 sm:$0xff]   ;;  %v4764_v5 = vld [vmem:[#allocation12 + $0x40] ss:$24 sps:$4 sm:$0xff]  }
 0x4bf   :  { %v3262_v10 = vmul.f32 %v4856_v55, %v3182_v32  ;;  %v3324_v40 = vmul.f32 %v3308_v3, %v2908_v0  ;;  %v3322_v16 = vmul.f32 %v3306_v49, %v2906_v19  ;;  %4034 = vmatprep.subr.bf16.mxu1 %v4751_v35  ;;  %4090 = vmatpush1.bf16.msra.mxu0 %v4758_v13  ;;  %v4766_v2 = vld [vmem:[#allocation12 + $0x44] ss:$24 sps:$4 sm:$0xff]   ;;  %v4769_v30 = vld [vmem:[#allocation12 + $0x74] ss:$24 sps:$4 sm:$0xff]   ;;  %v4770_v38 = vld [vmem:[#allocation12 + $0xa0] ss:$24 sps:$4 sm:$0xff]  }
 0x4c0   :  { %v4772_v22 = vld [vmem:[#allocation12 + $0xa4] ss:$24 sps:$4 sm:$0xff]   ;;  %v4775_v32 = vld [vmem:[#allocation12 + $0xd4] ss:$24 sps:$4 sm:$0xff]   ;;  %v4773_v55 = vld [vmem:[#allocation12 + $0xd0] ss:$24 sps:$4 sm:$0xff]  }
 0x4c1   :  { %v3278_v12 = vsub.f32 1.0, %v3262_v10  ;;  %v3332_v63 = vpack.c.bf16 %v3324_v40, %v3320_v44  ;;  %v4778_v42 = vld [vmem:[#allocation12 + $0x104] ss:$24 sps:$4 sm:$0xff]   ;;  %v4776_v24 = vld [vmem:[#allocation12 + $0x100] ss:$24 sps:$4 sm:$0xff]  }
 0x4c2   :  { %4035 = vmatpush1.bf16.msra.mxu1 %v4749_v4  ;;  %v4781_v0 = vld [vmem:[#allocation12 + $0x134] ss:$24 sps:$4 sm:$0xff]   ;;  %v4779_v3 = vld [vmem:[#allocation12 + $0x130] ss:$24 sps:$4 sm:$0xff]   ;;  %v4784_v39 = vld [vmem:[#allocation12 + $0x164] ss:$24 sps:$4 sm:$0xff]  }
 0x4c3   :  { %v3294_v61 = vmul.f32 %v3278_v12, %v2958_v20  ;;  %3638 = vmatprep.mubr.bf16.mxu1 %v3332_v63  ;;  %4036 = vmatprep.subr.bf16.mxu1 %v4757_v41  ;;  %v4782_v44 = vld [vmem:[#allocation12 + $0x160] ss:$24 sps:$4 sm:$0xff]   ;;  %v3750_v41 = vld [vmem:[%s6688_s14] sm:$0x3f]  ;;  %s5041_s14 = smov [#allocation14]  }
 0x4c4   :  { %3639 = vmatmul.mubr.bf16.gmra.mrb[20].mxu1 %v3331_v31  ;;  %v6880_v35 = vld [vmem:[#allocation63_spill] sm:$0xff]  ;;  %s4210_s11 = sshll.u32 %s5041_s14, 4  ;;  %s4211_s11 = int_to_ptr.vmem [resolvable:$true] %s4210_s11 }
 0x4c5   :  { %v3310_v54 = vadd.f32 1.0, %v3294_v61  ;;  %4054 = vmatprep.mubr.bf16.mxu1 %v6876_v36  ;;  %v6882_v13 = vld [vmem:[#allocation23_spill] sm:$0xff]  ;;  %s4990_s29 = scalar_lea.vmem %s4211_s11, 3072  ;;  %p4995_p7 = scmp.lt.s32.totalorder %s4211_s11, %s4211_s11 }
 0x4c6   :  { %4037 = vmatpush1.bf16.msra.mxu1 %v4755_v17  ;;  %v6881_v17 = vld [vmem:[#allocation21_spill] sm:$0xff]  ;;  %p4991_p6 = scmp.ne.s32.totalorder %s4211_s11, %s4990_s29  ;;  %p4996_p8 = scmp.lt.s32.totalorder %s4990_s29, %s4990_s29 }
 0x4c7   :  { %v3326_v34 = vmul.f32 %v3310_v54, %v2910_v29  ;;  %4128 = vmatprep.subr.bf16.mxu1 %v4763_v60  ;;  %v3755_v52 = vrot.slane %v3750_v41, %v6881_v17  ;;  %v3763_v60 = vrot.slane %v3750_v41, %v6882_v13 }
 0x4c8   :  { %p4997_p9 = por %p4996_p8, %p4995_p7 }
 0x4c9   :  { %v3334_v46 = vpack.c.bf16 %v3326_v34, %v3322_v16 }
 0x4ca   :  { %p4998_p10 = pnand %p4997_p9, %p4991_p6 }
 0x4cb   :  { %3687 = vmatprep.mubr.bf16.mxu0 %v3334_v46 }
 0x4cc   :  { %3688 = vmatmul.mubr.bf16.gmra.mrb[28].mxu0 %v3333_v25  ;;  %v4767_v25 = vld [vmem:[#allocation12 + $0x70] ss:$24 sps:$4 sm:$0xff]  }
 0x4cd   :  { %4107 = vmatprep.mubr.bf16.mxu0 %v6876_v36 }
 0x56e   :  { %v4503_v15 = vpop.f32.mrb[16].mxu1 }
 0x56f   :  { %v4504_v48 = vpop.f32.mrb[17].mxu1 }
 0x570   :  { %v4505_v47 = vadd.f32 %v4504_v48, %v4503_v15  ;;  %v4506_v9 = vpop.f32.mrb[18].mxu1  ;;  %v6883_v15 = vld [vmem:[#allocation22_spill] sm:$0xff]  ;;  %v6884_v48 = vld [vmem:[#allocation24_spill] sm:$0xff] }
 0x571   :  { %v4507_v11 = vpop.f32.mrb[19].mxu1 }
 0x572   :  { %v4531_v18 = vpop.f32.mrb[24].mxu0  ;;  %v3633_v33 = vadd.f32 %v4505_v47, %v6639_v50  ;;  %v4508_v51 = vadd.f32 %v4507_v11, %v4506_v9  ;;  %v3767_v47 = vrot.slane %v3750_v41, %v6884_v48 }
 0x573   :  { %v4532_v23 = vpop.f32.mrb[25].mxu0 }
 0x574   :  { %v4533_v8 = vadd.f32 %v4532_v23, %v4531_v18  ;;  %v4534_v45 = vpop.f32.mrb[26].mxu0  ;;  %v3636_v7 = vadd.f32 %v4508_v51, %v6639_v50 }
 0x575   :  { %v4535_v62 = vpop.f32.mrb[27].mxu0 }
 0x576   :  { %v3682_v6 = vadd.f32 %v4533_v8, %v3633_v33  ;;  %v4536_v43 = vadd.f32 %v4535_v62, %v4534_v45 }
 0x578   :  { %v3685_v28 = vadd.f32 %v4536_v43, %v3636_v7  ;;  %v3696_v56 = vadd.f32 %v3682_v6, %v6877_v21 }
 0x57a   :  { %v3697_v53 = vadd.f32 %v3685_v28, %v6878_v59 }
 0x57c   :  { %v3700_v31 = vpack.c.bf16 %v3697_v53, %v3696_v56 }
 0x57e   :  { %4055 = vmatmul.mubr.bf16.vlgmr.msra.gmra.mrb[24].mxu1 %v3700_v31  ;;  %4108 = vmatmul.mubr.bf16.vlgmr.msra.gmra.mrb[32].mxu0 %v3700_v31 }
 0x57f   :  { %4129 = vmatpush1.bf16.msra.mxu1 %v4761_v27  ;;  %4064 = vmatprep.mubr.bf16.mxu1 %v6876_v36 }
 0x580   :  { %4130 = vmatprep.subr.bf16.mxu1 %v4766_v2  ;;  %4117 = vmatprep.mubr.bf16.mxu0 %v6876_v36 }
 0x583   :  { %4131 = vmatpush1.bf16.msra.mxu1 %v4764_v5 }
 0x584   :  { %4132 = vmatprep.subr.bf16.mxu1 %v4769_v30 }
 0x587   :  { %4133 = vmatpush1.bf16.msra.mxu1 %v4767_v25 }
 0x588   :  { %4134 = vmatprep.subr.bf16.mxu1 %v4772_v22 }
 0x58b   :  { %4135 = vmatpush1.bf16.msra.mxu1 %v4770_v38 }
 0x58c   :  { %4136 = vmatprep.subr.bf16.mxu1 %v4775_v32 }
 0x58f   :  { %4137 = vmatpush1.bf16.msra.mxu1 %v4773_v55 }
 0x590   :  { %4138 = vmatprep.subr.bf16.mxu1 %v4778_v42 }
 0x593   :  { %4139 = vmatpush1.bf16.msra.mxu1 %v4776_v24 }
 0x594   :  { %4140 = vmatprep.subr.bf16.mxu1 %v4781_v0 }
 0x597   :  { %v4509_v10 = vpop.f32.mrb[20].mxu1  ;;  %4141 = vmatpush1.bf16.msra.mxu1 %v4779_v3 }
 0x598   :  { %v4510_v40 = vpop.f32.mrb[21].mxu1  ;;  %4142 = vmatprep.subr.bf16.mxu1 %v4784_v39  ;;  %v6885_v39 = vld [vmem:[#allocation25_spill] sm:$0xff] }
 0x599   :  { %v4511_v12 = vadd.f32 %v4510_v40, %v4509_v10  ;;  %v4512_v20 = vpop.f32.mrb[22].mxu1  ;;  %v3771_v10 = vrot.slane %v3750_v41, %v6885_v39 }
 0x59a   :  { %v4513_v63 = vpop.f32.mrb[23].mxu1 }
 0x59b   :  { %v4514_v49 = vadd.f32 %v4513_v63, %v4512_v20  ;;  %4143 = vmatpush1.bf16.msra.mxu1 %v4782_v44  ;;  %v3641_v19 = vadd.f32 %v4511_v12, %v6639_v50  ;;  %v6886_v44 = vld [vmem:[#allocation26_spill] sm:$0xff] }
 0x59c   :  { %v3775_v40 = vrot.slane %v3750_v41, %v6886_v44 }
 0x59d   :  { %v3644_v34 = vadd.f32 %v4514_v49, %v6639_v50  ;;  %v3759_v50 = vrot.slane %v3750_v41, %v6883_v15 }
 0x59f   :  { %v4537_v61 = vpop.f32.mrb[28].mxu0 }
 0x5a0   :  { %v4538_v29 = vpop.f32.mrb[29].mxu0 }
 0x5a1   :  { %v4539_v54 = vadd.f32 %v4538_v29, %v4537_v61  ;;  %v4540_v16 = vpop.f32.mrb[30].mxu0 }
 0x5a2   :  { %v4541_v46 = vpop.f32.mrb[31].mxu0 }
 0x5a3   :  { %v3690_v37 = vadd.f32 %v4539_v54, %v3641_v19  ;;  %v4542_v57 = vadd.f32 %v4541_v46, %v4540_v16 }
 0x5a5   :  { %v3693_v26 = vadd.f32 %v4542_v57, %v3644_v34  ;;  %v3698_v4 = vadd.f32 %v3690_v37, %v6879_v1 }
 0x5a7   :  { %v3699_v58 = vadd.f32 %v3693_v26, %v6880_v35 }
 0x5a9   :  { %v3701_v14 = vpack.c.bf16 %v3699_v58, %v3698_v4 }
 0x5ab   :  { %4065 = vmatmul.mubr.bf16.gmra.mrb[28].mxu1 %v3701_v14  ;;  %4118 = vmatmul.mubr.bf16.gmra.mrb[36].mxu0 %v3701_v14 }
 0x5ac   :  { %4160 = vmatprep.mubr.bf16.mxu1 %v6876_v36 }
 0x5b3   :  { %4161 = vmatmul.mubr.bf16.vlgmr.msra.gmra.mrb[32].mxu1 %v3700_v31 }
 0x5b4   :  { %4170 = vmatprep.mubr.bf16.mxu1 %v6876_v36 }
 0x5bb   :  { %4171 = vmatmul.mubr.bf16.gmra.mrb[36].mxu1 %v3701_v14 }
 0x651   :  { %v4056_v9 = vpop.f32.mrb[24].mxu1  ;;  %v4109_v11 = vpop.f32.mrb[32].mxu0 }
 0x652   :  { %v4057_v18 = vadd.f32 %v4056_v9, %v3755_v52  ;;  %v4110_v33 = vadd.f32 %v4109_v11, %v3763_v60  ;;  %v4058_v51 = vpop.f32.mrb[25].mxu1  ;;  %v4111_v23 = vpop.f32.mrb[33].mxu0 }
 0x653   :  { %v4059_v36 = vadd.f32 %v4058_v51, %v3759_v50  ;;  %v4112_v8 = vadd.f32 %v4111_v23, %v3767_v47  ;;  %v4060_v45 = vpop.f32.mrb[26].mxu1  ;;  %v4113_v7 = vpop.f32.mrb[34].mxu0 }
 0x654   :  { %4181 = vst [vmem:[#allocation14] sm:$0xff] %v4057_v18  ;;  %4183 = vst [vmem:[#allocation14 + $0x10] sm:$0xff] %v4110_v33  ;;  %v4061_v62 = vadd.f32 %v4060_v45, %v3755_v52  ;;  %v4114_v6 = vadd.f32 %v4113_v7, %v3763_v60  ;;  %v4062_v43 = vpop.f32.mrb[27].mxu1  ;;  %v4115_v28 = vpop.f32.mrb[35].mxu0 }
 0x655   :  { %4182 = vst [vmem:[#allocation14 + $0x8] sm:$0xff] %v4059_v36  ;;  %4184 = vst [vmem:[#allocation14 + $0x18] sm:$0xff] %v4112_v8  ;;  %v4063_v21 = vadd.f32 %v4062_v43, %v3759_v50  ;;  %v4116_v56 = vadd.f32 %v4115_v28, %v3767_v47 }
 0x656   :  { %4187 = vst [vmem:[#allocation14 + $0x30] sm:$0xff] %v4061_v62  ;;  %4189 = vst [vmem:[#allocation14 + $0x40] sm:$0xff] %v4114_v6 }
 0x657   :  { %4188 = vst [vmem:[#allocation14 + $0x38] sm:$0xff] %v4063_v21  ;;  %4190 = vst [vmem:[#allocation14 + $0x48] sm:$0xff] %v4116_v56 }
 0x67e   :  { %v4066_v59 = vpop.f32.mrb[28].mxu1  ;;  %v4119_v53 = vpop.f32.mrb[36].mxu0 }
 0x67f   :  { %v4067_v27 = vadd.f32 %v4066_v59, %v3755_v52  ;;  %v4120_v31 = vadd.f32 %v4119_v53, %v3763_v60  ;;  %v4068_v2 = vpop.f32.mrb[29].mxu1  ;;  %v4121_v5 = vpop.f32.mrb[37].mxu0 }
 0x680   :  { %v4069_v30 = vadd.f32 %v4068_v2, %v3759_v50  ;;  %v4122_v25 = vadd.f32 %v4121_v5, %v3767_v47  ;;  %v4070_v22 = vpop.f32.mrb[30].mxu1  ;;  %v4123_v38 = vpop.f32.mrb[38].mxu0 }
 0x681   :  { %4193 = vst [vmem:[#allocation14 + $0x60] sm:$0xff] %v4067_v27  ;;  %4195 = vst [vmem:[#allocation14 + $0x70] sm:$0xff] %v4120_v31  ;;  %v4071_v32 = vadd.f32 %v4070_v22, %v3755_v52  ;;  %v4124_v55 = vadd.f32 %v4123_v38, %v3763_v60  ;;  %v4072_v42 = vpop.f32.mrb[31].mxu1  ;;  %v4125_v24 = vpop.f32.mrb[39].mxu0 }
 0x682   :  { %4194 = vst [vmem:[#allocation14 + $0x68] sm:$0xff] %v4069_v30  ;;  %4196 = vst [vmem:[#allocation14 + $0x78] sm:$0xff] %v4122_v25  ;;  %v4073_v0 = vadd.f32 %v4072_v42, %v3759_v50  ;;  %v4126_v3 = vadd.f32 %v4125_v24, %v3767_v47 }
 0x683   :  { %4199 = vst [vmem:[#allocation14 + $0x90] sm:$0xff] %v4071_v32  ;;  %4201 = vst [vmem:[#allocation14 + $0xa0] sm:$0xff] %v4124_v55 }
 0x684   :  { %4200 = vst [vmem:[#allocation14 + $0x98] sm:$0xff] %v4073_v0  ;;  %4202 = vst [vmem:[#allocation14 + $0xa8] sm:$0xff] %v4126_v3 }
 0x686   :  { %v4162_v12 = vpop.f32.mrb[32].mxu1 }
 0x687   :  { %v4163_v20 = vadd.f32 %v4162_v12, %v3771_v10  ;;  %v4164_v63 = vpop.f32.mrb[33].mxu1 }
 0x688   :  { %v4165_v49 = vadd.f32 %v4164_v63, %v3775_v40  ;;  %v4166_v61 = vpop.f32.mrb[34].mxu1 }
 0x689   :  { %4185 = vst [vmem:[#allocation14 + $0x20] sm:$0xff] %v4163_v20  ;;  %v4167_v19 = vadd.f32 %v4166_v61, %v3771_v10  ;;  %v4168_v29 = vpop.f32.mrb[35].mxu1 }
 0x68a   :  { %4186 = vst [vmem:[#allocation14 + $0x28] sm:$0xff] %v4165_v49  ;;  %v4169_v54 = vadd.f32 %v4168_v29, %v3775_v40 }
 0x68b   :  { %4191 = vst [vmem:[#allocation14 + $0x50] sm:$0xff] %v4167_v19 }
 0x68c   :  { %4192 = vst [vmem:[#allocation14 + $0x58] sm:$0xff] %v4169_v54 }
 0x68e   :  { %v4172_v16 = vpop.f32.mrb[36].mxu1 }
 0x68f   :  { %v4173_v34 = vadd.f32 %v4172_v16, %v3771_v10  ;;  %v4174_v46 = vpop.f32.mrb[37].mxu1 }
 0x690   :  { %v4175_v37 = vadd.f32 %v4174_v46, %v3775_v40  ;;  %v4176_v57 = vpop.f32.mrb[38].mxu1 }
 0x691   :  { %4197 = vst [vmem:[#allocation14 + $0x80] sm:$0xff] %v4173_v34  ;;  %v4177_v26 = vadd.f32 %v4176_v57, %v3771_v10  ;;  %v4178_v1 = vpop.f32.mrb[39].mxu1 }
 0x692   :  { %4198 = vst [vmem:[#allocation14 + $0x88] sm:$0xff] %v4175_v37  ;;  %v4179_v4 = vadd.f32 %v4178_v1, %v3775_v40 }
 0x693   :  { %4203 = vst [vmem:[#allocation14 + $0xb0] sm:$0xff] %v4177_v26 }
 0x694   :  { %4204 = vst [vmem:[#allocation14 + $0xb8] sm:$0xff] %v4179_v4 }
 0x695   :  { %5001 = shalt.err (!%p4998_p10)
}
 0x696   :  { %s5002_s18 = scalar_lea.hbm %s6689_s15, 3072 }
 0x697   :  { %p5003_p11 = scmp.ne.s32.totalorder %s6689_s15, %s5002_s18  ;;  %p5006_p12 = scmp.lt.u32.totalorder %s5002_s18, %s6689_s15 }
 0x699   :  { %p5008_p13 = pnand %p5006_p12, %p5003_p11 }
 0x69b   :  { %5011 = shalt.err (!%p5008_p13)
}
 0x69c   :  { %s5042_s5 = smov 768   ;;  %s5043_s16 = smov 48  }
 0x69d   :  { %4216 = dma.vmem_to_hbm [thread:$0]  %s4211_s11, 3072, %s6689_s15, [#allocation5], %s5042_s5, %s5042_s5, %s5043_s16  }
 0x69e   :  { %5020 = dma.done.wait [#allocation5], 3072  }
 0x69f   :  { %5021 = vsyncadd [#allocation5], 4294964224 }
 0x6a0   :  { %4220 = vsyncpa [#allocation4], 1 }
 0x6a1   :  { %4221 = vsyncpa [#allocation7], 1 }
 0x6a2   :  { %4222 = vsyncpa [#allocation10], 1 }
 0x6a3   :  { %4223 = vsyncpa [#allocation13], 1 }
 0x6a4   :  { %4224 = vsyncpa [#allocation5], 1 }

</bundles_post_ra>
